<compile_context>
chip_gen: v7x
topology: tpu7x:2x2x1
jax: 0.10.0
libtpu: 0.0.40
codegen_flags: <defaults>
</compile_context>

<pallas_src>
import math
import functools

import jax
import jax.numpy as jnp
from jax.experimental import pallas as pl
from jax.experimental.pallas import tpu as pltpu


# -----------------------------------------------------------------------------
# Pallas kernel: Bw windows per grid step, fused qkv + fused output projection
# -----------------------------------------------------------------------------
def _wmsa_kernel(x_ref, wqkv_ref, qkvb_ref, ls_ref, bias_ref, pw_ref, pb_ref,
                 o_ref, *, num_heads, head_dim, bw, n_tok):
    C = num_heads * head_dim
    rows = bw * n_tok
    eps2 = jnp.float32(1e-24)            # F.normalize eps = 1e-12, squared

    # (Bw, N, C) -> (Bw*N, C): leading-dim merge only (requires N % 8 == 0, asserted in wrapper)
    x = x_ref[...].reshape(rows, C)
    x_bf = x.astype(jnp.bfloat16)

    # Fused qkv projection: one wide MXU matmul, bias added once.
    # Column order is [q(C) | k(C) | v(C)], heads contiguous inside each (torch Linear layout).
    qkv = jnp.dot(x_bf, wqkv_ref[...], preferred_element_type=jnp.float32)
    qkv = qkv + qkvb_ref[...]                                     # (rows, 3C), f32

    o_parts = []
    for h in range(num_heads):
        lo = h * head_dim                                          # lane slices at multiples of 8
        q_h = qkv[:, lo:lo + head_dim].reshape(bw, n_tok, head_dim)
        k_h = qkv[:, C + lo:C + lo + head_dim].reshape(bw, n_tok, head_dim)
        v_h = qkv[:, 2 * C + lo:2 * C + lo + head_dim].reshape(bw, n_tok, head_dim)

        # F.normalize(dim=-1); per-head logit scale (clamp+exp done in wrapper, SMEM scalar here)
        # is folded into q's normalization factor.
        q_n = q_h * (ls_ref[h] * jax.lax.rsqrt(
            jnp.maximum(jnp.sum(q_h * q_h, axis=-1, keepdims=True), eps2)))
        k_n = k_h * jax.lax.rsqrt(
            jnp.maximum(jnp.sum(k_h * k_h, axis=-1, keepdims=True), eps2))

        # Cosine-attention scores in f32 (bf16 here would be amplified by the logit scale),
        # batched over the bw windows of this step; + un-replicated (N, N) rel-pos bias.
        s = jnp.einsum('bnd,bmd->bnm', q_n, k_n,
                       preferred_element_type=jnp.float32)         # (bw, N, N)
        s = s + bias_ref[h]

        # softmax (f32; EUP exp + approx reciprocal -> rows sum to 1 +/- ~2e-4)
        s = jnp.exp(s - jnp.max(s, axis=-1, keepdims=True))
        s = s * pl.reciprocal(jnp.sum(s, axis=-1, keepdims=True), approx=True)

        # attn @ v (bf16 operands, f32 accumulation)
        o_h = jnp.einsum('bnm,bmd->bnd',
                         s.astype(jnp.bfloat16), v_h.astype(jnp.bfloat16),
                         preferred_element_type=jnp.float32)       # (bw, N, hd)
        o_parts.append(o_h.reshape(rows, head_dim))

    # Pack heads back into the lane dim and run ONE fused output projection.
    o_packed = jnp.concatenate(o_parts, axis=-1)                   # (rows, C)
    out = jnp.dot(o_packed.astype(jnp.bfloat16), pw_ref[...],
                  preferred_element_type=jnp.float32) + pb_ref[...]
    o_ref[...] = out.reshape(bw, n_tok, C).astype(o_ref.dtype)


# -----------------------------------------------------------------------------
# Device-dependent grid sizing
# -----------------------------------------------------------------------------
def _num_tensorcores():
    """Best-effort TensorCores-per-chip query; defaults to 1 (v5e/v6e)."""
    try:
        info = pltpu.get_tpu_info()
        for attr in ("num_cores", "core_count", "num_tensorcores",
                     "tensorcore_count", "cores_per_chip"):
            v = getattr(info, attr, None)
            if isinstance(v, int) and v > 0:
                return v
    except Exception:
        pass
    try:
        v = getattr(jax.devices()[0], "num_cores", None)
        if isinstance(v, int) and v > 0:
            return v
    except Exception:
        pass
    return 1


def _pick_windows_per_step(B_, N, num_cores, max_rows=1024):
    """Windows per grid step.

    Single TensorCore: the grid is a serial loop -> use as few steps as possible (biggest block
    that fits the row budget).  Multi TensorCore (v7x): need >= num_cores steps, prefer a step
    count that is a multiple of num_cores so both cores stay busy.
    """
    cap = max(1, max_rows // max(N, 1))
    divs = [d for d in range(1, B_ + 1) if B_ % d == 0 and d <= cap]
    if not divs:
        divs = [1]
    if num_cores <= 1:
        return max(divs)
    cands = [d for d in divs if B_ // d >= num_cores]
    if not cands:
        return max(divs)
    pref = [d for d in cands if (B_ // d) % num_cores == 0]
    return max(pref) if pref else max(cands)


def _vmem_bytes_estimate(bw, N, C, H):
    """Rough per-step VMEM footprint (double-buffered operands + f32 intermediates)."""
    rows = bw * N
    pipelined = rows * C * 4 * 2                       # x block + out block
    consts = (C * 3 * C * 2) + (3 * C * 4) + (H * N * N * 4) + (C * C * 2) + (C * 4)
    interm = rows * 3 * C * 4 + 2 * bw * N * N * 4 + 2 * rows * C * 4
    return 2 * (pipelined + consts) + interm + (1 << 20)


# -----------------------------------------------------------------------------
# One-time parameter preprocessing (hoisted out of the per-call path)
# -----------------------------------------------------------------------------
def prepare_wmsa_params(qkv_w, qkv_bias, logit_scale, rel_pos_bias, proj_w, proj_b,
                        num_heads):
    """qkv_w: (3C, C), proj_w: (C, C) in torch Linear layout; rel_pos_bias: (H, N, N)."""
    C = proj_w.shape[0]
    max_log = jnp.float32(math.log(1.0 / 0.01))
    return dict(
        num_heads=num_heads,
        wqkv_t=jnp.transpose(qkv_w).astype(jnp.bfloat16),            # (C, 3C)
        qkv_b=qkv_bias.reshape(1, 3 * C).astype(jnp.float32),         # (1, 3C)
        ls=jnp.exp(jnp.minimum(logit_scale.reshape(num_heads),
                               max_log)).astype(jnp.float32),         # (H,)  SMEM scalars
        bias=rel_pos_bias.astype(jnp.float32),                        # (H, N, N)
        proj_wt=jnp.transpose(proj_w).astype(jnp.bfloat16),           # (C, C)
        proj_b=proj_b.reshape(1, C).astype(jnp.float32),              # (1, C)
    )


def wmsa_pallas(x, params, *, windows_per_step=None):
    """x: (B_, N, C) float32; params from prepare_wmsa_params."""
    B_, N, C = x.shape
    num_heads = params["num_heads"]
    hd = C // num_heads
    # TODO(synk): N % 8 != 0 (e.g. Swin's 7x7 window, N=49) needs a padded path.
    assert N % 8 == 0, "kernel merges (bw, N, C)->(bw*N, C); requires N % 8 == 0"

    cores = _num_tensorcores()
    bw = windows_per_step or _pick_windows_per_step(B_, N, cores)
    assert B_ % bw == 0, (B_, bw)
    n_steps = B_ // bw

    est = _vmem_bytes_estimate(bw, N, C, num_heads)
    vlim = int(min(est, 64 << 20)) if est > (32 << 20) else None

    kernel = functools.partial(_wmsa_kernel, num_heads=num_heads, head_dim=hd,
                               bw=bw, n_tok=N)

    return pl.pallas_call(
        kernel,
        out_shape=jax.ShapeDtypeStruct((B_, N, C), jnp.float32),
        grid_spec=pltpu.PrefetchScalarGridSpec(
            num_scalar_prefetch=0,
            grid=(n_steps,),
            in_specs=[
                pl.BlockSpec((bw, N, C), lambda s: (s, 0, 0)),            # x (bw windows/step)
                pl.BlockSpec((C, 3 * C), lambda s: (0, 0)),               # Wqkv^T (fused)
                pl.BlockSpec((1, 3 * C), lambda s: (0, 0)),               # qkv bias
                pl.BlockSpec(memory_space=pltpu.MemorySpace.SMEM),        # logit scale (H,)
                pl.BlockSpec((num_heads, N, N), lambda s: (0, 0, 0)),     # rel-pos bias (no repl.)
                pl.BlockSpec((C, C), lambda s: (0, 0)),                   # proj W^T (fused)
                pl.BlockSpec((1, C), lambda s: (0, 0)),                   # proj bias
            ],
            out_specs=pl.BlockSpec((bw, N, C), lambda s: (s, 0, 0)),
        ),
        compiler_params=pltpu.CompilerParams(
            dimension_semantics=("parallel",),
            vmem_limit_bytes=vlim),
    )(x, params["wqkv_t"], params["qkv_b"], params["ls"], params["bias"],
      params["proj_wt"], params["proj_b"])


# -----------------------------------------------------------------------------
# Glue (plain JAX, precomputable buffers): relative coords table / index, cpb_mlp
# -----------------------------------------------------------------------------
def make_relative_coords_table(window_size):
    Wh, Ww = window_size
    rch = jnp.arange(-(Wh - 1), Wh, dtype=jnp.float32)
    rcw = jnp.arange(-(Ww - 1), Ww, dtype=jnp.float32)
    gh, gw = jnp.meshgrid(rch, rcw, indexing="ij")
    table = jnp.stack([gh, gw], axis=-1)[None]            # (1, 2Wh-1, 2Ww-1, 2)
    table = table.at[:, :, :, 0].divide(Wh - 1)
    table = table.at[:, :, :, 1].divide(Ww - 1)
    table = table * 8.0
    table = jnp.sign(table) * jnp.log2(jnp.abs(table) + 1.0) / math.log2(8)
    return table


def make_relative_position_index(window_size):
    Wh, Ww = window_size
    ch, cw = jnp.meshgrid(jnp.arange(Wh), jnp.arange(Ww), indexing="ij")
    coords = jnp.stack([ch, cw])
    flat = coords.reshape(2, -1)
    rel = flat[:, :, None] - flat[:, None, :]
    rel = rel.transpose(1, 2, 0)
    rel = rel.at[:, :, 0].add(Wh - 1)
    rel = rel.at[:, :, 1].add(Ww - 1)
    rel = rel.at[:, :, 0].multiply(2 * Ww - 1)
    return rel.sum(-1)                                     # (N, N)


def compute_rel_pos_bias(coords_table, rel_index, w1, b1, w2, num_heads, N):
    # cpb_mlp: Linear(2, 512) -> ReLU -> Linear(512, num_heads, bias=False)
    flat = coords_table.reshape(-1, 2)
    hidden = jnp.maximum(flat @ w1.T + b1, 0.0)
    table = hidden @ w2.T
    bias = jnp.take(table, rel_index.reshape(-1), axis=0)
    bias = bias.reshape(N, N, num_heads).transpose(2, 0, 1)  # (H, N, N)
    return 16.0 * jax.nn.sigmoid(bias)


# -----------------------------------------------------------------------------
# Pure-JAX reference (mirrors the PyTorch forward) for correctness check
# -----------------------------------------------------------------------------
def wmsa_ref(x, qkv_w, qkv_bias, logit_scale, rel_pos_bias, proj_w, proj_b, num_heads):
    B_, N, C = x.shape
    hd = C // num_heads
    qkv = x @ qkv_w.T + qkv_bias
    qkv = qkv.reshape(B_, N, 3, num_heads, hd).transpose(2, 0, 3, 1, 4)
    q, k, v = qkv[0], qkv[1], qkv[2]
    qn = q / jnp.maximum(jnp.linalg.norm(q, axis=-1, keepdims=True), 1e-12)
    kn = k / jnp.maximum(jnp.linalg.norm(k, axis=-1, keepdims=True), 1e-12)
    attn = qn @ kn.transpose(0, 1, 3, 2)
    scale = jnp.exp(jnp.minimum(logit_scale.reshape(num_heads), math.log(1.0 / 0.01)))
    attn = attn * scale[None, :, None, None]
    attn = attn + rel_pos_bias[None]
    attn = jax.nn.softmax(attn, axis=-1)
    out = (attn @ v).transpose(0, 2, 1, 3).reshape(B_, N, C)
    return out @ proj_w.T + proj_b


# -----------------------------------------------------------------------------
if __name__ == "__main__":
    dim = 32
    window_size = (4, 4)
    num_heads = 4
    N = window_size[0] * window_size[1]       # 16 tokens per window
    B_ = 8                                     # number of windows

    key = jax.random.PRNGKey(0)
    ks = jax.random.split(key, 10)

    x = jax.random.normal(ks[0], (B_, N, dim), dtype=jnp.float32)

    # Parameters (deterministic synthetic init; shapes follow __init__)
    qkv_w = 0.02 * jax.random.normal(ks[1], (3 * dim, dim), dtype=jnp.float32)
    q_bias = 0.02 * jax.random.normal(ks[2], (dim,), dtype=jnp.float32)
    v_bias = 0.02 * jax.random.normal(ks[3], (dim,), dtype=jnp.float32)
    qkv_bias = jnp.concatenate([q_bias, jnp.zeros((dim,), jnp.float32), v_bias])
    logit_scale = jnp.log(10.0 * jnp.ones((num_heads,), jnp.float32)) \
        + 0.01 * jax.random.normal(ks[4], (num_heads,), dtype=jnp.float32)
    cpb_w1 = 0.1 * jax.random.normal(ks[5], (512, 2), dtype=jnp.float32)
    cpb_b1 = 0.1 * jax.random.normal(ks[6], (512,), dtype=jnp.float32)
    cpb_w2 = 0.1 * jax.random.normal(ks[7], (num_heads, 512), dtype=jnp.float32)
    proj_w = 0.02 * jax.random.normal(ks[8], (dim, dim), dtype=jnp.float32)
    proj_b = 0.02 * jax.random.normal(ks[9], (dim,), dtype=jnp.float32)

    # Buffers + relative position bias (module buffers / cpb_mlp, plain JAX)
    coords_table = make_relative_coords_table(window_size)
    rel_index = make_relative_position_index(window_size)
    rel_pos_bias = compute_rel_pos_bias(coords_table, rel_index,
                                        cpb_w1, cpb_b1, cpb_w2, num_heads, N)

    # One-time parameter preprocessing (hoisted out of the per-forward path).
    params = prepare_wmsa_params(qkv_w, qkv_bias, logit_scale, rel_pos_bias,
                                 proj_w, proj_b, num_heads)
    params = jax.tree_util.tree_map(
        lambda a: jax.block_until_ready(a) if isinstance(a, jax.Array) else a, params)

    # TODO(synk): attn_drop / proj_drop are identity in eval mode; shifted-window mask path
    # (mask is not None) is not implemented.
    out = wmsa_pallas(x, params)
    out = jax.block_until_ready(out)

    ref = wmsa_ref(x, qkv_w, qkv_bias, logit_scale, rel_pos_bias,
                   proj_w, proj_b, num_heads)
    assert out.shape == (B_, N, dim)
    max_err = float(jnp.max(jnp.abs(out - ref)))
    # bf16 matmul operands (qkv / attn@v / proj) + approx softmax reciprocal -> loose tolerance
    assert jnp.allclose(out, ref, atol=2e-2, rtol=2e-2), max_err

    print("KERNEL_OK")
</pallas_src>

<mosaic_0001>
module attributes {stable_mosaic.version = 11 : i64} {
  func.func @_wmsa_kernel(%arg0: i32, %arg1: memref<8x16x32xf32, #tpu.memory_space<vmem>>, %arg2: memref<32x96xbf16, #tpu.memory_space<vmem>>, %arg3: memref<1x96xf32, #tpu.memory_space<vmem>>, %arg4: memref<4xf32, #tpu.memory_space<smem>>, %arg5: memref<4x16x16xf32, #tpu.memory_space<vmem>>, %arg6: memref<32x32xbf16, #tpu.memory_space<vmem>>, %arg7: memref<1x32xf32, #tpu.memory_space<vmem>>, %arg8: memref<8x16x32xf32, #tpu.memory_space<vmem>>) attributes {dimension_semantics = [#tpu.dimension_semantics<parallel>], iteration_bounds = array<i64: 1>, scalar_prefetch = 0 : i64, scratch_operands = 0 : i64, tpu.core_type = #tpu.core_type<tc>, window_params = [{transform_indices = @transform_0, window_bounds = array<i64: 8, 16, 32>}, {pipeline_mode = #tpu.pipeline_mode<synchronous>, transform_indices = @transform_1, window_bounds = array<i64: 32, 96>}, {pipeline_mode = #tpu.pipeline_mode<synchronous>, transform_indices = @transform_2, window_bounds = array<i64: 1, 96>}, {transform_indices = @transform_3, window_bounds = array<i64: 4>}, {pipeline_mode = #tpu.pipeline_mode<synchronous>, transform_indices = @transform_4, window_bounds = array<i64: 4, 16, 16>}, {pipeline_mode = #tpu.pipeline_mode<synchronous>, transform_indices = @transform_5, window_bounds = array<i64: 32, 32>}, {pipeline_mode = #tpu.pipeline_mode<synchronous>, transform_indices = @transform_6, window_bounds = array<i64: 1, 32>}, {transform_indices = @transform_7, window_bounds = array<i64: 8, 16, 32>}]} {
    %c0 = arith.constant 0 : index
    %c0_0 = arith.constant 0 : index
    %c0_1 = arith.constant 0 : index
    %0 = vector.load %arg1[%c0, %c0_0, %c0_1] : memref<8x16x32xf32, #tpu.memory_space<vmem>>, vector<8x16x32xf32>
    %1 = vector.shape_cast %0 : vector<8x16x32xf32> to vector<128x32xf32>
    %2 = arith.truncf %1 : vector<128x32xf32> to vector<128x32xbf16>
    %c0_2 = arith.constant 0 : index
    %c0_3 = arith.constant 0 : index
    %3 = vector.load %arg2[%c0_2, %c0_3] : memref<32x96xbf16, #tpu.memory_space<vmem>>, vector<32x96xbf16>
    %cst = arith.constant dense<0.000000e+00> : vector<128x96xf32>
    %4 = tpu.matmul %2, %3, %cst {dimension_numbers = #tpu.dot_dimension_numbers<[1], [0], [0], [1], [0, 0, 1, 1], [], []>} : vector<128x32xbf16>, vector<32x96xbf16>, vector<128x96xf32> -> vector<128x96xf32>
    %c0_4 = arith.constant 0 : index
    %c0_5 = arith.constant 0 : index
    %5 = vector.load %arg3[%c0_4, %c0_5] : memref<1x96xf32, #tpu.memory_space<vmem>>, vector<1x96xf32>
    %6 = vector.broadcast %5 : vector<1x96xf32> to vector<128x96xf32>
    %7 = arith.addf %4, %6 : vector<128x96xf32>
    %8 = vector.extract_strided_slice %7 {offsets = [0, 0], sizes = [128, 8], strides = [1, 1]} : vector<128x96xf32> to vector<128x8xf32>
    %9 = vector.shape_cast %8 : vector<128x8xf32> to vector<8x16x8xf32>
    %10 = vector.extract_strided_slice %7 {offsets = [0, 32], sizes = [128, 8], strides = [1, 1]} : vector<128x96xf32> to vector<128x8xf32>
    %11 = vector.shape_cast %10 : vector<128x8xf32> to vector<8x16x8xf32>
    %12 = vector.extract_strided_slice %7 {offsets = [0, 64], sizes = [128, 8], strides = [1, 1]} : vector<128x96xf32> to vector<128x8xf32>
    %13 = vector.shape_cast %12 : vector<128x8xf32> to vector<8x16x8xf32>
    %c0_6 = arith.constant 0 : index
    %14 = memref.load %arg4[%c0_6] : memref<4xf32, #tpu.memory_space<smem>>
    %15 = arith.mulf %9, %9 : vector<8x16x8xf32>
    %cst_7 = arith.constant dense<0.000000e+00> : vector<8x16xf32>
    %16 = vector.multi_reduction <add>, %15, %cst_7 [2] : vector<8x16x8xf32> to vector<8x16xf32>
    %17 = vector.shape_cast %16 : vector<8x16xf32> to vector<8x16x1xf32>
    %cst_8 = arith.constant 1.000000e-24 : f32
    %18 = vector.broadcast %cst_8 : f32 to vector<8x16x1xf32>
    %19 = arith.maximumf %17, %18 : vector<8x16x1xf32>
    %20 = math.rsqrt %19 : vector<8x16x1xf32>
    %21 = vector.broadcast %14 : f32 to vector<8x16x1xf32>
    %22 = arith.mulf %21, %20 : vector<8x16x1xf32>
    %23 = vector.broadcast %22 : vector<8x16x1xf32> to vector<8x16x8xf32>
    %24 = arith.mulf %9, %23 : vector<8x16x8xf32>
    %25 = arith.mulf %11, %11 : vector<8x16x8xf32>
    %cst_9 = arith.constant dense<0.000000e+00> : vector<8x16xf32>
    %26 = vector.multi_reduction <add>, %25, %cst_9 [2] : vector<8x16x8xf32> to vector<8x16xf32>
    %27 = vector.shape_cast %26 : vector<8x16xf32> to vector<8x16x1xf32>
    %cst_10 = arith.constant 1.000000e-24 : f32
    %28 = vector.broadcast %cst_10 : f32 to vector<8x16x1xf32>
    %29 = arith.maximumf %27, %28 : vector<8x16x1xf32>
    %30 = math.rsqrt %29 : vector<8x16x1xf32>
    %31 = vector.broadcast %30 : vector<8x16x1xf32> to vector<8x16x8xf32>
    %32 = arith.mulf %11, %31 : vector<8x16x8xf32>
    "tpu.trace_start"() <{level = 10 : i32, message = "bnd,bmd->bnm"}> : () -> ()
    %cst_11 = arith.constant dense<0.000000e+00> : vector<8x16x16xf32>
    %33 = tpu.matmul %24, %32, %cst_11 {dimension_numbers = #tpu.dot_dimension_numbers<[2], [2], [1], [1], [0, 0, 0, 1, 1, 1], [0], [0]>} : vector<8x16x8xf32>, vector<8x16x8xf32>, vector<8x16x16xf32> -> vector<8x16x16xf32>
    "tpu.trace_stop"() : () -> ()
    %c0_12 = arith.constant 0 : index
    %c0_13 = arith.constant 0 : index
    %c0_14 = arith.constant 0 : index
    %34 = vector.load %arg5[%c0_12, %c0_13, %c0_14] : memref<4x16x16xf32, #tpu.memory_space<vmem>>, vector<1x16x16xf32>
    %35 = vector.shape_cast %34 : vector<1x16x16xf32> to vector<16x16xf32>
    %36 = vector.shape_cast %35 : vector<16x16xf32> to vector<1x16x16xf32>
    %37 = vector.broadcast %36 : vector<1x16x16xf32> to vector<8x16x16xf32>
    %38 = arith.addf %33, %37 : vector<8x16x16xf32>
    %cst_15 = arith.constant dense<0xFF800000> : vector<8x16xf32>
    %39 = vector.multi_reduction <maximumf>, %38, %cst_15 [2] : vector<8x16x16xf32> to vector<8x16xf32>
    %40 = vector.shape_cast %39 : vector<8x16xf32> to vector<8x16x1xf32>
    %41 = vector.broadcast %40 : vector<8x16x1xf32> to vector<8x16x16xf32>
    %42 = arith.subf %38, %41 : vector<8x16x16xf32>
    %43 = math.exp %42 : vector<8x16x16xf32>
    %cst_16 = arith.constant dense<0.000000e+00> : vector<8x16xf32>
    %44 = vector.multi_reduction <add>, %43, %cst_16 [2] : vector<8x16x16xf32> to vector<8x16xf32>
    %45 = vector.shape_cast %44 : vector<8x16xf32> to vector<8x16x1xf32>
    %46 = tpu.reciprocal %45 {approx = true} : vector<8x16x1xf32> -> vector<8x16x1xf32>
    %47 = vector.broadcast %46 : vector<8x16x1xf32> to vector<8x16x16xf32>
    %48 = arith.mulf %43, %47 : vector<8x16x16xf32>
    %49 = arith.truncf %48 : vector<8x16x16xf32> to vector<8x16x16xbf16>
    %50 = arith.truncf %13 : vector<8x16x8xf32> to vector<8x16x8xbf16>
    "tpu.trace_start"() <{level = 10 : i32, message = "bnm,bmd->bnd"}> : () -> ()
    %cst_17 = arith.constant dense<0.000000e+00> : vector<8x16x8xf32>
    %51 = tpu.matmul %49, %50, %cst_17 {dimension_numbers = #tpu.dot_dimension_numbers<[2], [1], [1], [2], [0, 0, 0, 1, 1, 2], [0], [0]>} : vector<8x16x16xbf16>, vector<8x16x8xbf16>, vector<8x16x8xf32> -> vector<8x16x8xf32>
    "tpu.trace_stop"() : () -> ()
    %52 = vector.shape_cast %51 : vector<8x16x8xf32> to vector<128x8xf32>
    %53 = vector.extract_strided_slice %7 {offsets = [0, 8], sizes = [128, 8], strides = [1, 1]} : vector<128x96xf32> to vector<128x8xf32>
    %54 = vector.shape_cast %53 : vector<128x8xf32> to vector<8x16x8xf32>
    %55 = vector.extract_strided_slice %7 {offsets = [0, 40], sizes = [128, 8], strides = [1, 1]} : vector<128x96xf32> to vector<128x8xf32>
    %56 = vector.shape_cast %55 : vector<128x8xf32> to vector<8x16x8xf32>
    %57 = vector.extract_strided_slice %7 {offsets = [0, 72], sizes = [128, 8], strides = [1, 1]} : vector<128x96xf32> to vector<128x8xf32>
    %58 = vector.shape_cast %57 : vector<128x8xf32> to vector<8x16x8xf32>
    %c1 = arith.constant 1 : index
    %59 = memref.load %arg4[%c1] : memref<4xf32, #tpu.memory_space<smem>>
    %60 = arith.mulf %54, %54 : vector<8x16x8xf32>
    %cst_18 = arith.constant dense<0.000000e+00> : vector<8x16xf32>
    %61 = vector.multi_reduction <add>, %60, %cst_18 [2] : vector<8x16x8xf32> to vector<8x16xf32>
    %62 = vector.shape_cast %61 : vector<8x16xf32> to vector<8x16x1xf32>
    %cst_19 = arith.constant 1.000000e-24 : f32
    %63 = vector.broadcast %cst_19 : f32 to vector<8x16x1xf32>
    %64 = arith.maximumf %62, %63 : vector<8x16x1xf32>
    %65 = math.rsqrt %64 : vector<8x16x1xf32>
    %66 = vector.broadcast %59 : f32 to vector<8x16x1xf32>
    %67 = arith.mulf %66, %65 : vector<8x16x1xf32>
    %68 = vector.broadcast %67 : vector<8x16x1xf32> to vector<8x16x8xf32>
    %69 = arith.mulf %54, %68 : vector<8x16x8xf32>
    %70 = arith.mulf %56, %56 : vector<8x16x8xf32>
    %cst_20 = arith.constant dense<0.000000e+00> : vector<8x16xf32>
    %71 = vector.multi_reduction <add>, %70, %cst_20 [2] : vector<8x16x8xf32> to vector<8x16xf32>
    %72 = vector.shape_cast %71 : vector<8x16xf32> to vector<8x16x1xf32>
    %cst_21 = arith.constant 1.000000e-24 : f32
    %73 = vector.broadcast %cst_21 : f32 to vector<8x16x1xf32>
    %74 = arith.maximumf %72, %73 : vector<8x16x1xf32>
    %75 = math.rsqrt %74 : vector<8x16x1xf32>
    %76 = vector.broadcast %75 : vector<8x16x1xf32> to vector<8x16x8xf32>
    %77 = arith.mulf %56, %76 : vector<8x16x8xf32>
    "tpu.trace_start"() <{level = 10 : i32, message = "bnd,bmd->bnm"}> : () -> ()
    %cst_22 = arith.constant dense<0.000000e+00> : vector<8x16x16xf32>
    %78 = tpu.matmul %69, %77, %cst_22 {dimension_numbers = #tpu.dot_dimension_numbers<[2], [2], [1], [1], [0, 0, 0, 1, 1, 1], [0], [0]>} : vector<8x16x8xf32>, vector<8x16x8xf32>, vector<8x16x16xf32> -> vector<8x16x16xf32>
    "tpu.trace_stop"() : () -> ()
    %c1_23 = arith.constant 1 : index
    %c0_24 = arith.constant 0 : index
    %c0_25 = arith.constant 0 : index
    %79 = vector.load %arg5[%c1_23, %c0_24, %c0_25] : memref<4x16x16xf32, #tpu.memory_space<vmem>>, vector<1x16x16xf32>
    %80 = vector.shape_cast %79 : vector<1x16x16xf32> to vector<16x16xf32>
    %81 = vector.shape_cast %80 : vector<16x16xf32> to vector<1x16x16xf32>
    %82 = vector.broadcast %81 : vector<1x16x16xf32> to vector<8x16x16xf32>
    %83 = arith.addf %78, %82 : vector<8x16x16xf32>
    %cst_26 = arith.constant dense<0xFF800000> : vector<8x16xf32>
    %84 = vector.multi_reduction <maximumf>, %83, %cst_26 [2] : vector<8x16x16xf32> to vector<8x16xf32>
    %85 = vector.shape_cast %84 : vector<8x16xf32> to vector<8x16x1xf32>
    %86 = vector.broadcast %85 : vector<8x16x1xf32> to vector<8x16x16xf32>
    %87 = arith.subf %83, %86 : vector<8x16x16xf32>
    %88 = math.exp %87 : vector<8x16x16xf32>
    %cst_27 = arith.constant dense<0.000000e+00> : vector<8x16xf32>
    %89 = vector.multi_reduction <add>, %88, %cst_27 [2] : vector<8x16x16xf32> to vector<8x16xf32>
    %90 = vector.shape_cast %89 : vector<8x16xf32> to vector<8x16x1xf32>
    %91 = tpu.reciprocal %90 {approx = true} : vector<8x16x1xf32> -> vector<8x16x1xf32>
    %92 = vector.broadcast %91 : vector<8x16x1xf32> to vector<8x16x16xf32>
    %93 = arith.mulf %88, %92 : vector<8x16x16xf32>
    %94 = arith.truncf %93 : vector<8x16x16xf32> to vector<8x16x16xbf16>
    %95 = arith.truncf %58 : vector<8x16x8xf32> to vector<8x16x8xbf16>
    "tpu.trace_start"() <{level = 10 : i32, message = "bnm,bmd->bnd"}> : () -> ()
    %cst_28 = arith.constant dense<0.000000e+00> : vector<8x16x8xf32>
    %96 = tpu.matmul %94, %95, %cst_28 {dimension_numbers = #tpu.dot_dimension_numbers<[2], [1], [1], [2], [0, 0, 0, 1, 1, 2], [0], [0]>} : vector<8x16x16xbf16>, vector<8x16x8xbf16>, vector<8x16x8xf32> -> vector<8x16x8xf32>
    "tpu.trace_stop"() : () -> ()
    %97 = vector.shape_cast %96 : vector<8x16x8xf32> to vector<128x8xf32>
    %98 = vector.extract_strided_slice %7 {offsets = [0, 16], sizes = [128, 8], strides = [1, 1]} : vector<128x96xf32> to vector<128x8xf32>
    %99 = vector.shape_cast %98 : vector<128x8xf32> to vector<8x16x8xf32>
    %100 = vector.extract_strided_slice %7 {offsets = [0, 48], sizes = [128, 8], strides = [1, 1]} : vector<128x96xf32> to vector<128x8xf32>
    %101 = vector.shape_cast %100 : vector<128x8xf32> to vector<8x16x8xf32>
    %102 = vector.extract_strided_slice %7 {offsets = [0, 80], sizes = [128, 8], strides = [1, 1]} : vector<128x96xf32> to vector<128x8xf32>
    %103 = vector.shape_cast %102 : vector<128x8xf32> to vector<8x16x8xf32>
    %c2 = arith.constant 2 : index
    %104 = memref.load %arg4[%c2] : memref<4xf32, #tpu.memory_space<smem>>
    %105 = arith.mulf %99, %99 : vector<8x16x8xf32>
    %cst_29 = arith.constant dense<0.000000e+00> : vector<8x16xf32>
    %106 = vector.multi_reduction <add>, %105, %cst_29 [2] : vector<8x16x8xf32> to vector<8x16xf32>
    %107 = vector.shape_cast %106 : vector<8x16xf32> to vector<8x16x1xf32>
    %cst_30 = arith.constant 1.000000e-24 : f32
    %108 = vector.broadcast %cst_30 : f32 to vector<8x16x1xf32>
    %109 = arith.maximumf %107, %108 : vector<8x16x1xf32>
    %110 = math.rsqrt %109 : vector<8x16x1xf32>
    %111 = vector.broadcast %104 : f32 to vector<8x16x1xf32>
    %112 = arith.mulf %111, %110 : vector<8x16x1xf32>
    %113 = vector.broadcast %112 : vector<8x16x1xf32> to vector<8x16x8xf32>
    %114 = arith.mulf %99, %113 : vector<8x16x8xf32>
    %115 = arith.mulf %101, %101 : vector<8x16x8xf32>
    %cst_31 = arith.constant dense<0.000000e+00> : vector<8x16xf32>
    %116 = vector.multi_reduction <add>, %115, %cst_31 [2] : vector<8x16x8xf32> to vector<8x16xf32>
    %117 = vector.shape_cast %116 : vector<8x16xf32> to vector<8x16x1xf32>
    %cst_32 = arith.constant 1.000000e-24 : f32
    %118 = vector.broadcast %cst_32 : f32 to vector<8x16x1xf32>
    %119 = arith.maximumf %117, %118 : vector<8x16x1xf32>
    %120 = math.rsqrt %119 : vector<8x16x1xf32>
    %121 = vector.broadcast %120 : vector<8x16x1xf32> to vector<8x16x8xf32>
    %122 = arith.mulf %101, %121 : vector<8x16x8xf32>
    "tpu.trace_start"() <{level = 10 : i32, message = "bnd,bmd->bnm"}> : () -> ()
    %cst_33 = arith.constant dense<0.000000e+00> : vector<8x16x16xf32>
    %123 = tpu.matmul %114, %122, %cst_33 {dimension_numbers = #tpu.dot_dimension_numbers<[2], [2], [1], [1], [0, 0, 0, 1, 1, 1], [0], [0]>} : vector<8x16x8xf32>, vector<8x16x8xf32>, vector<8x16x16xf32> -> vector<8x16x16xf32>
    "tpu.trace_stop"() : () -> ()
    %c2_34 = arith.constant 2 : index
    %c0_35 = arith.constant 0 : index
    %c0_36 = arith.constant 0 : index
    %124 = vector.load %arg5[%c2_34, %c0_35, %c0_36] : memref<4x16x16xf32, #tpu.memory_space<vmem>>, vector<1x16x16xf32>
    %125 = vector.shape_cast %124 : vector<1x16x16xf32> to vector<16x16xf32>
    %126 = vector.shape_cast %125 : vector<16x16xf32> to vector<1x16x16xf32>
    %127 = vector.broadcast %126 : vector<1x16x16xf32> to vector<8x16x16xf32>
    %128 = arith.addf %123, %127 : vector<8x16x16xf32>
    %cst_37 = arith.constant dense<0xFF800000> : vector<8x16xf32>
    %129 = vector.multi_reduction <maximumf>, %128, %cst_37 [2] : vector<8x16x16xf32> to vector<8x16xf32>
    %130 = vector.shape_cast %129 : vector<8x16xf32> to vector<8x16x1xf32>
    %131 = vector.broadcast %130 : vector<8x16x1xf32> to vector<8x16x16xf32>
    %132 = arith.subf %128, %131 : vector<8x16x16xf32>
    %133 = math.exp %132 : vector<8x16x16xf32>
    %cst_38 = arith.constant dense<0.000000e+00> : vector<8x16xf32>
    %134 = vector.multi_reduction <add>, %133, %cst_38 [2] : vector<8x16x16xf32> to vector<8x16xf32>
    %135 = vector.shape_cast %134 : vector<8x16xf32> to vector<8x16x1xf32>
    %136 = tpu.reciprocal %135 {approx = true} : vector<8x16x1xf32> -> vector<8x16x1xf32>
    %137 = vector.broadcast %136 : vector<8x16x1xf32> to vector<8x16x16xf32>
    %138 = arith.mulf %133, %137 : vector<8x16x16xf32>
    %139 = arith.truncf %138 : vector<8x16x16xf32> to vector<8x16x16xbf16>
    %140 = arith.truncf %103 : vector<8x16x8xf32> to vector<8x16x8xbf16>
    "tpu.trace_start"() <{level = 10 : i32, message = "bnm,bmd->bnd"}> : () -> ()
    %cst_39 = arith.constant dense<0.000000e+00> : vector<8x16x8xf32>
    %141 = tpu.matmul %139, %140, %cst_39 {dimension_numbers = #tpu.dot_dimension_numbers<[2], [1], [1], [2], [0, 0, 0, 1, 1, 2], [0], [0]>} : vector<8x16x16xbf16>, vector<8x16x8xbf16>, vector<8x16x8xf32> -> vector<8x16x8xf32>
    "tpu.trace_stop"() : () -> ()
    %142 = vector.shape_cast %141 : vector<8x16x8xf32> to vector<128x8xf32>
    %143 = vector.extract_strided_slice %7 {offsets = [0, 24], sizes = [128, 8], strides = [1, 1]} : vector<128x96xf32> to vector<128x8xf32>
    %144 = vector.shape_cast %143 : vector<128x8xf32> to vector<8x16x8xf32>
    %145 = vector.extract_strided_slice %7 {offsets = [0, 56], sizes = [128, 8], strides = [1, 1]} : vector<128x96xf32> to vector<128x8xf32>
    %146 = vector.shape_cast %145 : vector<128x8xf32> to vector<8x16x8xf32>
    %147 = vector.extract_strided_slice %7 {offsets = [0, 88], sizes = [128, 8], strides = [1, 1]} : vector<128x96xf32> to vector<128x8xf32>
    %148 = vector.shape_cast %147 : vector<128x8xf32> to vector<8x16x8xf32>
    %c3 = arith.constant 3 : index
    %149 = memref.load %arg4[%c3] : memref<4xf32, #tpu.memory_space<smem>>
    %150 = arith.mulf %144, %144 : vector<8x16x8xf32>
    %cst_40 = arith.constant dense<0.000000e+00> : vector<8x16xf32>
    %151 = vector.multi_reduction <add>, %150, %cst_40 [2] : vector<8x16x8xf32> to vector<8x16xf32>
    %152 = vector.shape_cast %151 : vector<8x16xf32> to vector<8x16x1xf32>
    %cst_41 = arith.constant 1.000000e-24 : f32
    %153 = vector.broadcast %cst_41 : f32 to vector<8x16x1xf32>
    %154 = arith.maximumf %152, %153 : vector<8x16x1xf32>
    %155 = math.rsqrt %154 : vector<8x16x1xf32>
    %156 = vector.broadcast %149 : f32 to vector<8x16x1xf32>
    %157 = arith.mulf %156, %155 : vector<8x16x1xf32>
    %158 = vector.broadcast %157 : vector<8x16x1xf32> to vector<8x16x8xf32>
    %159 = arith.mulf %144, %158 : vector<8x16x8xf32>
    %160 = arith.mulf %146, %146 : vector<8x16x8xf32>
    %cst_42 = arith.constant dense<0.000000e+00> : vector<8x16xf32>
    %161 = vector.multi_reduction <add>, %160, %cst_42 [2] : vector<8x16x8xf32> to vector<8x16xf32>
    %162 = vector.shape_cast %161 : vector<8x16xf32> to vector<8x16x1xf32>
    %cst_43 = arith.constant 1.000000e-24 : f32
    %163 = vector.broadcast %cst_43 : f32 to vector<8x16x1xf32>
    %164 = arith.maximumf %162, %163 : vector<8x16x1xf32>
    %165 = math.rsqrt %164 : vector<8x16x1xf32>
    %166 = vector.broadcast %165 : vector<8x16x1xf32> to vector<8x16x8xf32>
    %167 = arith.mulf %146, %166 : vector<8x16x8xf32>
    "tpu.trace_start"() <{level = 10 : i32, message = "bnd,bmd->bnm"}> : () -> ()
    %cst_44 = arith.constant dense<0.000000e+00> : vector<8x16x16xf32>
    %168 = tpu.matmul %159, %167, %cst_44 {dimension_numbers = #tpu.dot_dimension_numbers<[2], [2], [1], [1], [0, 0, 0, 1, 1, 1], [0], [0]>} : vector<8x16x8xf32>, vector<8x16x8xf32>, vector<8x16x16xf32> -> vector<8x16x16xf32>
    "tpu.trace_stop"() : () -> ()
    %c3_45 = arith.constant 3 : index
    %c0_46 = arith.constant 0 : index
    %c0_47 = arith.constant 0 : index
    %169 = vector.load %arg5[%c3_45, %c0_46, %c0_47] : memref<4x16x16xf32, #tpu.memory_space<vmem>>, vector<1x16x16xf32>
    %170 = vector.shape_cast %169 : vector<1x16x16xf32> to vector<16x16xf32>
    %171 = vector.shape_cast %170 : vector<16x16xf32> to vector<1x16x16xf32>
    %172 = vector.broadcast %171 : vector<1x16x16xf32> to vector<8x16x16xf32>
    %173 = arith.addf %168, %172 : vector<8x16x16xf32>
    %cst_48 = arith.constant dense<0xFF800000> : vector<8x16xf32>
    %174 = vector.multi_reduction <maximumf>, %173, %cst_48 [2] : vector<8x16x16xf32> to vector<8x16xf32>
    %175 = vector.shape_cast %174 : vector<8x16xf32> to vector<8x16x1xf32>
    %176 = vector.broadcast %175 : vector<8x16x1xf32> to vector<8x16x16xf32>
    %177 = arith.subf %173, %176 : vector<8x16x16xf32>
    %178 = math.exp %177 : vector<8x16x16xf32>
    %cst_49 = arith.constant dense<0.000000e+00> : vector<8x16xf32>
    %179 = vector.multi_reduction <add>, %178, %cst_49 [2] : vector<8x16x16xf32> to vector<8x16xf32>
    %180 = vector.shape_cast %179 : vector<8x16xf32> to vector<8x16x1xf32>
    %181 = tpu.reciprocal %180 {approx = true} : vector<8x16x1xf32> -> vector<8x16x1xf32>
    %182 = vector.broadcast %181 : vector<8x16x1xf32> to vector<8x16x16xf32>
    %183 = arith.mulf %178, %182 : vector<8x16x16xf32>
    %184 = arith.truncf %183 : vector<8x16x16xf32> to vector<8x16x16xbf16>
    %185 = arith.truncf %148 : vector<8x16x8xf32> to vector<8x16x8xbf16>
    "tpu.trace_start"() <{level = 10 : i32, message = "bnm,bmd->bnd"}> : () -> ()
    %cst_50 = arith.constant dense<0.000000e+00> : vector<8x16x8xf32>
    %186 = tpu.matmul %184, %185, %cst_50 {dimension_numbers = #tpu.dot_dimension_numbers<[2], [1], [1], [2], [0, 0, 0, 1, 1, 2], [0], [0]>} : vector<8x16x16xbf16>, vector<8x16x8xbf16>, vector<8x16x8xf32> -> vector<8x16x8xf32>
    "tpu.trace_stop"() : () -> ()
    %187 = vector.shape_cast %186 : vector<8x16x8xf32> to vector<128x8xf32>
    %188 = tpu.concatenate %52, %97, %142, %187 in 1 : vector<128x8xf32>, vector<128x8xf32>, vector<128x8xf32>, vector<128x8xf32> -> vector<128x32xf32>
    %189 = arith.truncf %188 : vector<128x32xf32> to vector<128x32xbf16>
    %c0_51 = arith.constant 0 : index
    %c0_52 = arith.constant 0 : index
    %190 = vector.load %arg6[%c0_51, %c0_52] : memref<32x32xbf16, #tpu.memory_space<vmem>>, vector<32x32xbf16>
    %cst_53 = arith.constant dense<0.000000e+00> : vector<128x32xf32>
    %191 = tpu.matmul %189, %190, %cst_53 {dimension_numbers = #tpu.dot_dimension_numbers<[1], [0], [0], [1], [0, 0, 1, 1], [], []>} : vector<128x32xbf16>, vector<32x32xbf16>, vector<128x32xf32> -> vector<128x32xf32>
    %c0_54 = arith.constant 0 : index
    %c0_55 = arith.constant 0 : index
    %192 = vector.load %arg7[%c0_54, %c0_55] : memref<1x32xf32, #tpu.memory_space<vmem>>, vector<1x32xf32>
    %193 = vector.broadcast %192 : vector<1x32xf32> to vector<128x32xf32>
    %194 = arith.addf %191, %193 : vector<128x32xf32>
    %195 = vector.shape_cast %194 : vector<128x32xf32> to vector<8x16x32xf32>
    %c0_56 = arith.constant 0 : index
    %c0_57 = arith.constant 0 : index
    %c0_58 = arith.constant 0 : index
    %196 = vector.load %arg8[%c0_56, %c0_57, %c0_58] : memref<8x16x32xf32, #tpu.memory_space<vmem>>, vector<8x16x32xf32>
    tpu.vector_store %arg8[%c0_56, %c0_57, %c0_58], %195 {strides = array<i32>} : memref<8x16x32xf32, #tpu.memory_space<vmem>>, vector<8x16x32xf32>,
    return
  }
  func.func @transform_0(%arg0: i32) -> (i32, i32, i32) {
    %c0_i32 = arith.constant 0 : i32
    %c0_i32_0 = arith.constant 0 : i32
    %c0_i32_1 = arith.constant 0 : i32
    return %arg0, %c0_i32, %c0_i32_0 : i32, i32, i32
  }
  func.func @transform_1(%arg0: i32) -> (i32, i32) {
    %c0_i32 = arith.constant 0 : i32
    %c0_i32_0 = arith.constant 0 : i32
    %c0_i32_1 = arith.constant 0 : i32
    return %c0_i32, %c0_i32_0 : i32, i32
  }
  func.func @transform_2(%arg0: i32) -> (i32, i32) {
    %c0_i32 = arith.constant 0 : i32
    %c0_i32_0 = arith.constant 0 : i32
    %c0_i32_1 = arith.constant 0 : i32
    return %c0_i32, %c0_i32_0 : i32, i32
  }
  func.func @transform_3(%arg0: i32) -> i32 {
    %c0_i32 = arith.constant 0 : i32
    %c0_i32_0 = arith.constant 0 : i32
    return %c0_i32 : i32
  }
  func.func @transform_4(%arg0: i32) -> (i32, i32, i32) {
    %c0_i32 = arith.constant 0 : i32
    %c0_i32_0 = arith.constant 0 : i32
    %c0_i32_1 = arith.constant 0 : i32
    %c0_i32_2 = arith.constant 0 : i32
    return %c0_i32, %c0_i32_0, %c0_i32_1 : i32, i32, i32
  }
  func.func @transform_5(%arg0: i32) -> (i32, i32) {
    %c0_i32 = arith.constant 0 : i32
    %c0_i32_0 = arith.constant 0 : i32
    %c0_i32_1 = arith.constant 0 : i32
    return %c0_i32, %c0_i32_0 : i32, i32
  }
  func.func @transform_6(%arg0: i32) -> (i32, i32) {
    %c0_i32 = arith.constant 0 : i32
    %c0_i32_0 = arith.constant 0 : i32
    %c0_i32_1 = arith.constant 0 : i32
    return %c0_i32, %c0_i32_0 : i32, i32
  }
  func.func @transform_7(%arg0: i32) -> (i32, i32, i32) {
    %c0_i32 = arith.constant 0 : i32
    %c0_i32_0 = arith.constant 0 : i32
    %c0_i32_1 = arith.constant 0 : i32
    return %arg0, %c0_i32, %c0_i32_0 : i32, i32, i32
  }
}

</mosaic_0001>

<bundles_post_ra>
// kernel: tpu_custom_call.1
= control target key start
LH: loop header
LB: loop body
LE: loop exit
PB: predicated region body
PF: predicated region fallthrough
CT: control target
= control target key end

     0   :  { %12 = vsyncpa [#allocation3], 0  ;;  %s12017_s0 = inlined_call_operand.hbm [shape: f32[8,16,32], index: 0, kind: input, shape index: {}]   ;;  %s12018_s1 = inlined_call_operand.hbm [shape: bf16[32,96], index: 1, kind: input, shape index: {}]   ;;  %s12019_s2 = inlined_call_operand.vmem [shape: f32[1,96], index: 2, kind: input, shape index: {}]   ;;  %s12020_s3 = inlined_call_operand.vmem [shape: f32[4], index: 3, kind: input, shape index: {}]   ;;  %s12021_s4 = inlined_call_operand.hbm [shape: f32[4,16,16], index: 4, kind: input, shape index: {}]   ;;  %s12022_s5 = inlined_call_operand.vmem [shape: bf16[32,32], index: 5, kind: input, shape index: {}]   ;;  %s12023_s6 = inlined_call_operand.vmem [shape: f32[1,32], index: 6, kind: input, shape index: {}]   ;;  %s12024_s7 = inlined_call_operand.hbm [shape: f32[8,16,32], index: 7, kind: output, shape index: {}]  }
   0x1   :  { %13 = vsyncpa [#allocation7], 0 }
   0x2   :  { %14 = vsyncpa [#allocation5], 0 }
   0x3   :  { %15 = vsyncpa [#allocation4], 0  ;;  %s9142_s24 = smov [#allocation6]   ;;  %s9032_s28 = scalar_lea.hbm %s12018_s1, 256 }
   0x4   :  { %s33_s25 = sshll.u32 %s9142_s24, 4  ;;  %p9033_p0 = scmp.ne.s32.totalorder %s12018_s1, %s9032_s28  ;;  %s34_s25 = int_to_ptr.vmem [resolvable:$true] %s33_s25 }
   0x5   :  { %p9036_p1 = scmp.lt.u32.totalorder %s9032_s28, %s12018_s1 }
   0x7   :  { %p9038_p2 = pnand %p9036_p1, %p9033_p0 }
   0x9   :  { %9041 = shalt.err (!%p9038_p2)
}
   0xa   :  { %s9042_s10 = scalar_lea.vmem %s34_s25, 256  ;;  %p9047_p4 = scmp.lt.s32.totalorder %s34_s25, %s34_s25 }
   0xb   :  { %p9043_p3 = scmp.ne.s32.totalorder %s34_s25, %s9042_s10  ;;  %p9048_p5 = scmp.lt.s32.totalorder %s9042_s10, %s9042_s10 }
   0xd   :  { %p9049_p6 = por %p9048_p5, %p9047_p4 }
   0xf   :  { %p9050_p7 = pnand %p9049_p6, %p9043_p3 }
  0x11   :  { %9053 = shalt.err (!%p9050_p7)
}
  0x12   :  { %s9143_s11 = smov 64   ;;  %s9144_s12 = smov 4  }
  0x13   :  { %39 = dma.hbm_to_vmem [thread:$0]  %s12018_s1, 256, %s34_s25, [#allocation7], %s9143_s11, %s9143_s11, %s9144_s12  }
  0x14   :  { %s9145_s15 = smov [#allocation2]   ;;  %s9054_s19 = scalar_lea.hbm %s12017_s0, 2048 }
  0x15   :  { %s21_s16 = sshll.u32 %s9145_s15, 4  ;;  %p9055_p8 = scmp.ne.s32.totalorder %s12017_s0, %s9054_s19  ;;  %s22_s16 = int_to_ptr.vmem [resolvable:$true] %s21_s16 }
  0x16   :  { %p9058_p9 = scmp.lt.u32.totalorder %s9054_s19, %s12017_s0 }
  0x18   :  { %p9060_p10 = pnand %p9058_p9, %p9055_p8 }
  0x1a   :  { %9063 = shalt.err (!%p9060_p10)
}
  0x1b   :  { %s9064_s24 = scalar_lea.vmem %s22_s16, 2048  ;;  %p9069_p12 = scmp.lt.s32.totalorder %s22_s16, %s22_s16 }
  0x1c   :  { %p9065_p11 = scmp.ne.s32.totalorder %s22_s16, %s9064_s24  ;;  %p9070_p13 = scmp.lt.s32.totalorder %s9064_s24, %s9064_s24 }
  0x1e   :  { %p9071_p0 = por %p9070_p13, %p9069_p12 }
  0x20   :  { %p9072_p1 = pnand %p9071_p0, %p9065_p11 }
  0x22   :  { %9075 = shalt.err (!%p9072_p1)
}
  0x23   :  { %s9146_s1 = smov 128   ;;  %s9147_s25 = smov 8  }
  0x24   :  { %27 = dma.hbm_to_vmem [thread:$0]  %s12017_s0, 2048, %s22_s16, [#allocation3], %s9146_s1, %s9146_s1, %s9147_s25  }
  0x25   :  { %s48_s30 = sshll.u32 %s12020_s3, 4  ;;  %s49_s30 = int_to_ptr.vmem [resolvable:$true] %s48_s30 }
  0x26   :  { %s9076_s8 = scalar_lea.vmem %s49_s30, 16  ;;  %p9081_p3 = scmp.lt.s32.totalorder %s49_s30, %s49_s30 }
  0x27   :  { %p9077_p2 = scmp.ne.s32.totalorder %s49_s30, %s9076_s8  ;;  %p9082_p4 = scmp.lt.s32.totalorder %s9076_s8, %s9076_s8 }
  0x29   :  { %p9083_p5 = por %p9082_p4, %p9081_p3 }
  0x2b   :  { %p9084_p6 = pnand %p9083_p5, %p9077_p2 }
  0x2d   :  { %9087 = shalt.err (!%p9084_p6)
}
  0x2e   :  { %s9148_s9 = smov [#allocation8]   ;;  %s9149_s10 = smov [#allocation9]  }
  0x2f   :  { %51 = dma.vmem_to_smem %s49_s30, 16, %s9148_s9, [#allocation5]  }
  0x30   :  { %s57_s12 = sshll.u32 %s9149_s10, 4  ;;  %s9088_s0 = scalar_lea.hbm %s12021_s4, 1024  ;;  %s58_s12 = int_to_ptr.vmem [resolvable:$true] %s57_s12 }
  0x31   :  { %p9089_p7 = scmp.ne.s32.totalorder %s12021_s4, %s9088_s0  ;;  %p9092_p8 = scmp.lt.u32.totalorder %s9088_s0, %s12021_s4 }
  0x33   :  { %p9094_p9 = pnand %p9092_p8, %p9089_p7 }
  0x35   :  { %9097 = shalt.err (!%p9094_p9)
}
  0x36   :  { %s9098_s18 = scalar_lea.vmem %s58_s12, 1024  ;;  %p9103_p11 = scmp.lt.s32.totalorder %s58_s12, %s58_s12 }
  0x37   :  { %p9099_p10 = scmp.ne.s32.totalorder %s58_s12, %s9098_s18  ;;  %p9104_p12 = scmp.lt.s32.totalorder %s9098_s18, %s9098_s18 }
  0x39   :  { %p9105_p13 = por %p9104_p12, %p9103_p11 }
  0x3b   :  { %p9106_p0 = pnand %p9105_p13, %p9099_p10 }
  0x3d   :  { %9109 = shalt.err (!%p9106_p0)
}
  0x3e   :  { %63 = dma.hbm_to_vmem [thread:$0]  %s12021_s4, 1024, %s58_s12, [#allocation7], %s9146_s1, %s9146_s1, %s9147_s25  }
  0x3f   :  { %9132 = dma.done.wait [#allocation3], 2048  }
  0x40   :  { %9133 = vsyncadd [#allocation3], 4294965248 }
  0x41   :  { %9134 = dma.done.wait [#allocation7], 256  }
  0x42   :  { %9135 = vsyncadd [#allocation7], 4294967040 }
  0x43   :  { %9136 = dma.done.wait [#allocation5], 16  }
  0x44   :  { %9137 = vsyncadd [#allocation5], 4294967280 }
  0x45   :  { %9138 = dma.done.wait [#allocation7], 1024  }
  0x46   :  { %9139 = vsyncadd [#allocation7], 4294966272 }
  0x47   :  { %80 = sfence }
  0x48   :  { %v8516_v0 = vld [vmem:[#allocation6] sm:$0xff]   ;;  %v8517_v1 = vld [vmem:[#allocation6 + $0x8] sm:$0xff]   ;;  %vm129_vm0 = vcmask 261120   ;;  %v84_v7 = vld [vmem:[#allocation2 + $0x10] sm:$0xff]  ;;  %vm268_vm1 = vcmask 64512   ;;  %s251_s22 = sld [smem:[#allocation8]] }
  0x49   :  { %7561 = vmatprep.subr.bf16.mxu0 %v8516_v0  ;;  %8209 = vmatprep.subr.bf16.mxu1 %v8516_v0  ;;  %v82_v2 = vld [vmem:[#allocation2] sm:$0xff]  ;;  %v83_v3 = vld [vmem:[#allocation2 + $0x8] sm:$0xff]  ;;  %v85_v8 = vld [vmem:[#allocation2 + $0x18] sm:$0xff]  ;;  %s9151_s23 = smov 88   ;;  %s9152_s24 = smov 120   ;;  %vm1272_vm3 = vcmask 130048  }
  0x4a   :  { %v90_v4 = vld [vmem:[#allocation2 + $0x40] sm:$0xff]  ;;  %7562 = vmatpush3.bf16.msra.mxu0 %v8516_v0  ;;  %8211 = vmatpush3.bf16.msra.mxu1 %v8516_v0  ;;  %v98_v5 = vpack.c.bf16 %v83_v3, %v82_v2  ;;  %v91_v6 = vld [vmem:[#allocation2 + $0x48] sm:$0xff]  ;;  %v92_v10 = vld [vmem:[#allocation2 + $0x50] sm:$0xff]  ;;  %v99_v14 = vpack.c.bf16 %v85_v8, %v84_v7  ;;  %s7215_s26 = sld [smem:[#allocation8 + $0x1]]  ;;  %vm9154_vm4 = vmmov 0   ;;  %s9156_s27 = smov 112  }
  0x4b   :  { %7563 = vmatprep.subr.bf16.mxu0 %v8517_v1  ;;  %8210 = vmatprep.subr.bf16.mxu1 %v8517_v1  ;;  %v102_v9 = vpack.c.bf16 %v91_v6, %v90_v4  ;;  %v93_v11 = vld [vmem:[#allocation2 + $0x58] sm:$0xff]  ;;  %v86_v12 = vld [vmem:[#allocation2 + $0x20] sm:$0xff]  ;;  %v87_v13 = vld [vmem:[#allocation2 + $0x28] sm:$0xff]  ;;  %s9157_s28 = smov 56   ;;  %s7256_s29 = sld [smem:[#allocation8 + $0x2]]  ;;  %vm6960_vm5 = vcmask 195584  }
  0x4c   :  { %7565 = vmatprep.mubr.msk.bf16.mxu0 %vm129_vm0, %v98_v5  ;;  %v103_v15 = vpack.c.bf16 %v93_v11, %v92_v10  ;;  %v94_v16 = vld [vmem:[#allocation2 + $0x60] sm:$0xff]  ;;  %v95_v17 = vld [vmem:[#allocation2 + $0x68] sm:$0xff]  ;;  %v100_v18 = vpack.c.bf16 %v87_v13, %v86_v12  ;;  %v88_v20 = vld [vmem:[#allocation2 + $0x30] sm:$0xff]  ;;  %s9158_s30 = smov 72   ;;  %s9159_s8 = smov 104  }
  0x4d   :  { %7573 = vmatprep.mubr.msk.bf16.mxu1 %vm129_vm0, %v102_v9  ;;  %v104_v19 = vpack.c.bf16 %v95_v17, %v94_v16  ;;  %v89_v21 = vld [vmem:[#allocation2 + $0x38] sm:$0xff]  ;;  %v96_v22 = vld [vmem:[#allocation2 + $0x70] sm:$0xff]  ;;  %v7164_v26 = vld [vmem:[%s12019_s2] ss:$0 sm:$0xff]  ;;  %s9150_s2 = smov 96   ;;  %s9160_s9 = smov 48  }
  0x4e   :  { %7564 = vmatpush3.bf16.msra.mxu0 %v8517_v1  ;;  %8212 = vmatpush3.bf16.msra.mxu1 %v8517_v1  ;;  %v97_v23 = vld [vmem:[#allocation2 + $0x78] sm:$0xff]  ;;  %v101_v24 = vpack.c.bf16 %v89_v21, %v88_v20  ;;  %vm9575_vm2 = vmpackc.low %vm268_vm1, %vm268_vm1  ;;  %s7297_s10 = sld [smem:[#allocation8 + $0x3]]  ;;  %s9161_s12 = smov 40  }
  0x4f   :  { %v105_v25 = vpack.c.bf16 %v97_v23, %v96_v22  ;;  %s9162_s13 = smov 16   ;;  %s9163_s15 = smov 24  }
  0x51   :  { %7566 = vmatmul.mubr.msk.bf16.vlgmr.msra.gmra.mrb[0].mxu0 %vm129_vm0, %v99_v14  ;;  %7574 = vmatmul.mubr.msk.bf16.vlgmr.msra.gmra.mrb[0].mxu1 %vm129_vm0, %v103_v15 }
  0x52   :  { %7569 = vmatprep.mubr.msk.bf16.mxu0 %vm129_vm0, %v100_v18  ;;  %7577 = vmatprep.mubr.msk.bf16.mxu1 %vm129_vm0, %v104_v19 }
  0x59   :  { %7570 = vmatmul.mubr.msk.bf16.gmra.mrb[4].mxu0 %vm129_vm0, %v101_v24  ;;  %7578 = vmatmul.mubr.msk.bf16.gmra.mrb[4].mxu1 %vm129_vm0, %v105_v25 }
 0x124   :  { %v7567_v27 = vpop.f32.mrb[0].mxu0  ;;  %v7575_v28 = vpop.f32.mrb[0].mxu1 }
 0x125   :  { %v9263_v29 = vadd.f32 %v7567_v27, %v7164_v26  ;;  %v9265_v30 = vadd.f32 %v7575_v28, %v7164_v26  ;;  %v188_v31 = vpop.f32.mrb[1].mxu0  ;;  %v220_v32 = vpop.f32.mrb[1].mxu1 }
 0x126   :  { %v7568_v33 = vpop.f32.mrb[2].mxu0  ;;  %v7576_v34 = vpop.f32.mrb[2].mxu1  ;;  %v9267_v35 = vadd.f32 %v7164_v26, %v188_v31  ;;  %v9281_v40 = vadd.f32 %v7164_v26, %v220_v32 }
 0x127   :  { %12131 = vst [vmem:[#allocation16_spill] sm:$0xff] %v9263_v29  ;;  %v191_v36 = vpop.f32.mrb[3].mxu0  ;;  %v9271_v37 = vmul.f32 %v9265_v30, %v9265_v30  ;;  %v9275_v38 = vmul.f32 %v9263_v29, %v9263_v29  ;;  %v223_v39 = vpop.f32.mrb[3].mxu1  ;;  %v9319_v61 = vadd.f32 %v7568_v33, %v7164_v26  ;;  %v9341_v6 = vadd.f32 %v7576_v34, %v7164_v26 }
 0x128   :  { %12132 = vst [vmem:[#allocation17_spill] sm:$0xff] %v9267_v35  ;;  %12135 = vst [vmem:[#allocation20_spill] sm:$0xff] %v9281_v40  ;;  %v9285_v41 = vmul.f32 %v9267_v35, %v9267_v35  ;;  %v9291_v44 = vmul.f32 %v9281_v40, %v9281_v40  ;;  %v9301_v53 = vadd.f32 %v7164_v26, %v191_v36 }
 0x129   :  { %12133 = vst [vmem:[#allocation18_spill] sm:$0xff] %v9271_v37  ;;  %12134 = vst [vmem:[#allocation19_spill] sm:$0xff] %v9275_v38  ;;  %418 = vrot.lane.b32.xlu0 %v9271_v37, %s9150_s2  ;;  %402 = vrot.lane.b32.xlu1 %v9275_v38, %s9150_s2  ;;  %v275_v62 = vsel %vm268_vm1, %v9275_v38, 0.0  ;;  %v299_v63 = vsel %vm268_vm1, %v9271_v37, 0.0  ;;  %v9327_v0 = vmul.f32 %v9319_v61, %v9319_v61 }
 0x12a   :  { %12136 = vst [vmem:[#allocation21_spill] sm:$0xff] %v9285_v41  ;;  %12137 = vst [vmem:[#allocation22_spill] sm:$0xff] %v9291_v44  ;;  %v9315_v60 = vmul.f32 %v9301_v53, %v9301_v53  ;;  %v9329_v1 = vadd.f32 %v7164_v26, %v223_v39  ;;  %v9347_v7 = vmul.f32 %v9341_v6, %v9341_v6  ;;  %v269_v12 = vsel %vm268_vm1, %v9285_v41, 0.0 }
 0x12b   :  { %12142 = vst [vmem:[#allocation27_spill] sm:$0xff] %v9301_v53  ;;  %12147 = vst [vmem:[#allocation32_spill] sm:$0xff] %v9319_v61  ;;  %v278_v2 = vsel %vm268_vm1, %v9327_v0, 0.0  ;;  %v293_v13 = vsel %vm268_vm1, %v9291_v44, 0.0 }
 0x12c   :  { %v7571_v42 = vpop.f32.mrb[4].mxu0  ;;  %v7579_v43 = vpop.f32.mrb[4].mxu1  ;;  %12148 = vst [vmem:[#allocation33_spill] sm:$0xff] %v9329_v1  ;;  %v272_v3 = vsel %vm268_vm1, %v9315_v60, 0.0  ;;  %v9337_v4 = vmul.f32 %v9329_v1, %v9329_v1  ;;  %v302_v28 = vsel %vm268_vm1, %v9347_v7, 0.0 }
 0x12d   :  { %398 = vrot.lane.b32.xlu0 %v9285_v41, %s9150_s2  ;;  %v9293_v45 = vadd.f32 %v7571_v42, %v7164_v26  ;;  %v9295_v46 = vadd.f32 %v7579_v43, %v7164_v26  ;;  %v204_v47 = vpop.f32.mrb[5].mxu0  ;;  %v236_v48 = vpop.f32.mrb[5].mxu1 }
 0x12e   :  { %v9297_v49 = vadd.f32 %v7164_v26, %v204_v47  ;;  %v9299_v50 = vadd.f32 %v7164_v26, %v236_v48  ;;  %v7572_v51 = vpop.f32.mrb[6].mxu0  ;;  %v7580_v52 = vpop.f32.mrb[6].mxu1  ;;  %v296_v5 = vsel %vm268_vm1, %v9337_v4, 0.0 }
 0x12f   :  { %12138 = vst [vmem:[#allocation23_spill] sm:$0xff] %v9293_v45  ;;  %12139 = vst [vmem:[#allocation24_spill] sm:$0xff] %v9295_v46  ;;  %v9303_v54 = vadd.f32 %v7572_v51, %v7164_v26  ;;  %v207_v55 = vpop.f32.mrb[7].mxu0  ;;  %v9305_v56 = vadd.f32 %v7580_v52, %v7164_v26  ;;  %v239_v57 = vpop.f32.mrb[7].mxu1  ;;  %v9353_v8 = vmul.f32 %v9293_v45, %v9293_v45 }
 0x130   :  { %12140 = vst [vmem:[#allocation25_spill] sm:$0xff] %v9297_v49  ;;  %12141 = vst [vmem:[#allocation26_spill] sm:$0xff] %v9299_v50  ;;  %v9307_v58 = vadd.f32 %v7164_v26, %v207_v55  ;;  %v9309_v59 = vadd.f32 %v7164_v26, %v239_v57  ;;  %v9359_v9 = vmul.f32 %v9295_v46, %v9295_v46 }
 0x131   :  { %12143 = vst [vmem:[#allocation28_spill] sm:$0xff] %v9303_v54  ;;  %12144 = vst [vmem:[#allocation29_spill] sm:$0xff] %v9305_v56  ;;  %414 = vrot.lane.b32.xlu0 %v9291_v44, %s9150_s2  ;;  %v9365_v10 = vmul.f32 %v9297_v49, %v9297_v49  ;;  %v9371_v11 = vmul.f32 %v9299_v50, %v9299_v50  ;;  %v287_v14 = vsel %vm268_vm1, %v9353_v8, 0.0 }
 0x132   :  { %12145 = vst [vmem:[#allocation30_spill] sm:$0xff] %v9307_v58  ;;  %12146 = vst [vmem:[#allocation31_spill] sm:$0xff] %v9309_v59  ;;  %v311_v15 = vsel %vm268_vm1, %v9359_v9, 0.0  ;;  %v9389_v17 = vmul.f32 %v9303_v54, %v9303_v54  ;;  %v9395_v19 = vmul.f32 %v9307_v58, %v9307_v58  ;;  %v9401_v21 = vmul.f32 %v9309_v59, %v9309_v59 }
 0x133   :  { %12149 = vst [vmem:[#allocation34_spill] sm:$0xff] %v9353_v8  ;;  %12150 = vst [vmem:[#allocation35_spill] sm:$0xff] %v9359_v9  ;;  %v305_v16 = vsel %vm268_vm1, %v9371_v11, 0.0  ;;  %v9413_v31 = vmul.f32 %v9305_v56, %v9305_v56  ;;  %v281_v43 = vsel %vm268_vm1, %v9365_v10, 0.0 }
 0x134   :  { %12151 = vst [vmem:[#allocation36_spill] sm:$0xff] %v9365_v10  ;;  %12152 = vst [vmem:[#allocation37_spill] sm:$0xff] %v9371_v11  ;;  %v290_v18 = vsel %vm268_vm1, %v9389_v17, 0.0  ;;  %v284_v20 = vsel %vm268_vm1, %v9395_v19, 0.0  ;;  %v308_v22 = vsel %vm268_vm1, %v9401_v21, 0.0 }
 0x135   :  { %400 = vrot.lane.b32.xlu0 %v9315_v60, %s9150_s2  ;;  %12153 = vst [vmem:[#allocation38_spill] sm:$0xff] %v9401_v21 }
 0x14d   :  { %276 = vadd.xlane.f32.xlu1 %v275_v62 }
 0x151   :  { %300 = vadd.xlane.f32.xlu1 %v299_v63 }
 0x154   :  { %279 = vadd.xlane.f32.xlu0 %v278_v2  ;;  %v9430_v2 = vstv %s251_s22 }
 0x158   :  { %273 = vadd.xlane.f32.xlu0 %v272_v3 }
 0x15c   :  { %297 = vadd.xlane.f32.xlu0 %v296_v5 }
 0x162   :  { %404 = vrot.lane.b32.xlu1 %v9327_v0, %s9150_s2 }
 0x166   :  { %420 = vrot.lane.b32.xlu1 %v9347_v7, %s9150_s2 }
 0x172   :  { %410 = vrot.lane.b32.xlu0 %v9353_v8, %s9150_s2 }
 0x176   :  { %426 = vrot.lane.b32.xlu0 %v9359_v9, %s9150_s2 }
 0x17a   :  { %406 = vrot.lane.b32.xlu0 %v9365_v10, %s9150_s2 }
 0x17e   :  { %422 = vrot.lane.b32.xlu0 %v9371_v11, %s9150_s2 }
 0x18a   :  { %270 = vadd.xlane.f32.xlu1 %v269_v12 }
 0x18e   :  { %294 = vadd.xlane.f32.xlu1 %v293_v13 }
 0x19b   :  { %v419_v23 = vpop.permute.xlu0 %418  ;;  %v403_v24 = vpop.permute.xlu1 %402 }
 0x19c   :  { %v452_v25 = vsel %vm268_vm1, %v403_v24, 0.0 }
 0x19d   :  { %288 = vadd.xlane.f32.xlu0 %v287_v14 }
 0x19f   :  { %416 = vrot.lane.b32.xlu1 %v9337_v4, %s9150_s2  ;;  %v399_v26 = vpop.permute.xlu0 %398 }
 0x1a0   :  { %v446_v27 = vsel %vm268_vm1, %v399_v26, 0.0 }
 0x1a1   :  { %312 = vadd.xlane.f32.xlu0 %v311_v15 }
 0x1a3   :  { %v415_v55 = vpop.permute.xlu0 %414 }
 0x1a4   :  { %v470_v24 = vsel %vm268_vm1, %v415_v55, 0.0 }
 0x1a5   :  { %306 = vadd.xlane.f32.xlu0 %v305_v16 }
 0x1a7   :  { %v401_v3 = vpop.permute.xlu0 %400 }
 0x1a8   :  { %v449_v26 = vsel %vm268_vm1, %v401_v3, 0.0 }
 0x1a9   :  { %291 = vadd.xlane.f32.xlu0 %v290_v18 }
 0x1ad   :  { %285 = vadd.xlane.f32.xlu0 %v284_v20  ;;  %v476_v20 = vsel %vm268_vm1, %v419_v23, 0.0 }
 0x1b1   :  { %309 = vadd.xlane.f32.xlu0 %v308_v22 }
 0x1b5   :  { %453 = vadd.xlane.f32.xlu0 %v452_v25 }
 0x1b9   :  { %447 = vadd.xlane.f32.xlu0 %v446_v27 }
 0x1c3   :  { %303 = vadd.xlane.f32.xlu1 %v302_v28 }
 0x1d4   :  { %412 = vrot.lane.b32.xlu1 %v9389_v17, %s9150_s2 }
 0x1d8   :  { %428 = vrot.lane.b32.xlu1 %v9413_v31, %s9150_s2 }
 0x1da   :  { %v9417_v32 = vpop.xlane.xlu1 %276 }
 0x1de   :  { %v9419_v33 = vpop.xlane.xlu1 %300 }
 0x1e1   :  { %v9434_v14 = vpop.xlane.xlu0 %279 }
 0x1e2   :  { %v405_v34 = vpop.permute.xlu1 %404 }
 0x1e3   :  { %v455_v36 = vsel %vm268_vm1, %v405_v34, 0.0 }
 0x1e4   :  { %456 = vadd.xlane.f32.xlu0 %v455_v36 }
 0x1e5   :  { %v9440_v18 = vpop.xlane.xlu0 %273 }
 0x1e6   :  { %v421_v39 = vpop.permute.xlu1 %420 }
 0x1e7   :  { %v479_v42 = vsel %vm268_vm1, %v421_v39, 0.0 }
 0x1e8   :  { %480 = vadd.xlane.f32.xlu0 %v479_v42 }
 0x1e9   :  { %v9443_v22 = vpop.xlane.xlu0 %297 }
 0x1ed   :  { %v411_v25 = vpop.permute.xlu0 %410 }
 0x1ee   :  { %v464_v28 = vsel %vm268_vm1, %v411_v25, 0.0 }
 0x1f1   :  { %v427_v27 = vpop.permute.xlu0 %426 }
 0x1f2   :  { %v488_v34 = vsel %vm268_vm1, %v427_v27, 0.0 }
 0x1f5   :  { %v407_v36 = vpop.permute.xlu0 %406 }
 0x1f6   :  { %v458_v23 = vsel %vm268_vm1, %v407_v36, 0.0 }
 0x1f9   :  { %v423_v39 = vpop.permute.xlu0 %422 }
 0x1fa   :  { %v482_v42 = vsel %vm268_vm1, %v423_v39, 0.0 }
 0x1fc   :  { %282 = vadd.xlane.f32.xlu1 %v281_v43 }
 0x20d   :  { %408 = vrot.lane.b32.xlu1 %v9395_v19, %s9150_s2 }
 0x211   :  { %424 = vrot.lane.b32.xlu1 %v9401_v21, %s9150_s2 }
 0x217   :  { %v271_v47 = vpop.xlane.xlu1 %270 }
 0x218   :  { %v317_v48 = vmax.f32 %v271_v47, 1e-24 }
 0x21a   :  { %8520 = vrsqrt.f32 %v317_v48 }
 0x21b   :  { %v295_v51 = vpop.xlane.xlu1 %294 }
 0x21c   :  { %v325_v52 = vmax.f32 %v295_v51, 1e-24 }
 0x21e   :  { %8522 = vrsqrt.f32 %v325_v52 }
 0x21f   :  { %v417_v57 = vpop.permute.xlu1 %416 }
 0x220   :  { %v473_v62 = vsel %vm268_vm1, %v417_v57, 0.0 }
 0x221   :  { %474 = vadd.xlane.f32.xlu0 %v473_v62 }
 0x224   :  { %v8521_v63 = vpop.eup %8520 }
 0x225   :  { %v350_v5 = vmul.f32 %v8521_v63, %v9430_v2 }
 0x227   :  { %v366_v12 = vmul.f32 %v350_v5, %v9267_v35 }
 0x228   :  { %v8523_v13 = vpop.eup %8522 }
 0x229   :  { %7585 = vmatprep.mubr.msk.f32.mxu1 %vm268_vm1, %v366_v12  ;;  %v358_v15 = vmul.f32 %v8523_v13, %v9430_v2 }
 0x22a   :  { %v9457_v55 = vpop.xlane.xlu0 %288 }
 0x22b   :  { %v374_v16 = vmul.f32 %v358_v15, %v9281_v40 }
 0x22d   :  { %7613 = vmatprep.mubr.msk.f32.mxu0 %vm268_vm1, %v374_v16 }
 0x22e   :  { %v9463_v57 = vpop.xlane.xlu0 %312 }
 0x232   :  { %v9467_v62 = vpop.xlane.xlu0 %306 }
 0x235   :  { %477 = vadd.xlane.f32.xlu1 %v476_v20 }
 0x236   :  { %v9469_v63 = vpop.xlane.xlu0 %291 }
 0x239   :  { %471 = vadd.xlane.f32.xlu1 %v470_v24 }
 0x23a   :  { %v9471_v3 = vpop.xlane.xlu0 %285 }
 0x23d   :  { %450 = vadd.xlane.f32.xlu1 %v449_v26 }
 0x23e   :  { %v9473_v5 = vpop.xlane.xlu0 %309 }
 0x241   :  { %465 = vadd.xlane.f32.xlu1 %v464_v28 }
 0x242   :  { %v454_v12 = vpop.xlane.xlu0 %453 }
 0x243   :  { %v496_v28 = vmax.f32 %v454_v12, 1e-24  ;;  %v314_v12 = vsel %vm268_vm1, %v9413_v31, 0.0 }
 0x245   :  { %489 = vadd.xlane.f32.xlu1 %v488_v34 }
 0x246   :  { %v448_v15 = vpop.xlane.xlu0 %447 }
 0x249   :  { %459 = vadd.xlane.f32.xlu1 %v458_v23 }
 0x24d   :  { %483 = vadd.xlane.f32.xlu1 %v482_v42 }
 0x250   :  { %v9451_v43 = vpop.xlane.xlu1 %303 }
 0x254   :  { %v413_v47 = vpop.permute.xlu1 %412 }
 0x255   :  { %v467_v48 = vsel %vm268_vm1, %v413_v47, 0.0 }
 0x256   :  { %468 = vadd.xlane.f32.xlu0 %v467_v48 }
 0x258   :  { %v429_v51 = vpop.permute.xlu1 %428 }
 0x259   :  { %v491_v52 = vsel %vm268_vm1, %v429_v51, 0.0 }
 0x25a   :  { %492 = vadd.xlane.f32.xlu0 %v491_v52 }
 0x25e   :  { %2011 = vrot.lane.b32.xlu1 %v9285_v41, %s9151_s23 }
 0x262   :  { %2013 = vrot.lane.b32.xlu1 %v9315_v60, %s9151_s23 }
 0x266   :  { %2017 = vrot.lane.b32.xlu1 %v9327_v0, %s9151_s23 }
 0x26a   :  { %1852 = vrot.lane.b32.xlu1 %v9315_v60, %s9152_s24 }
 0x271   :  { %v457_v24 = vpop.xlane.xlu0 %456 }
 0x272   :  { %v497_v26 = vmax.f32 %v457_v24, 1e-24 }
 0x274   :  { %8524 = vrsqrt.f32 %v497_v26 }
 0x275   :  { %8526 = vrsqrt.f32 %v496_v28  ;;  %v481_v47 = vpop.xlane.xlu0 %480 }
 0x276   :  { %v505_v48 = vmax.f32 %v481_v47, 1e-24 }
 0x278   :  { %8528 = vrsqrt.f32 %v505_v48 }
 0x27e   :  { %v8525_v34 = vpop.eup %8524 }
 0x27f   :  { %v8527_v36 = vpop.eup %8526  ;;  %v529_v23 = vmul.f32 %v8525_v34, %v9319_v61 }
 0x280   :  { %v528_v39 = vmul.f32 %v8527_v36, %v9263_v29 }
 0x282   :  { %v8236_v42 = vpack.i.bf16 %v529_v23, %v528_v39  ;;  %v8529_v26 = vpop.eup %8528 }
 0x283   :  { %v537_v34 = vmul.f32 %v8529_v26, %v9341_v6 }
 0x289   :  { %v9475_v13 = vpop.xlane.xlu1 %282 }
 0x28d   :  { %v409_v16 = vpop.permute.xlu1 %408 }
 0x28e   :  { %v461_v20 = vsel %vm268_vm1, %v409_v16, 0.0 }
 0x28f   :  { %462 = vadd.xlane.f32.xlu0 %v461_v20  ;;  %v494_v20 = vmax.f32 %v448_v15, 1e-24 }
 0x291   :  { %v425_v25 = vpop.permute.xlu1 %424 }
 0x292   :  { %v485_v27 = vsel %vm268_vm1, %v425_v25, 0.0 }
 0x293   :  { %486 = vadd.xlane.f32.xlu0 %v485_v27 }
 0x2a9   :  { %8237 = vrot.lane.b32.xlu0 %v8236_v42, %s9150_s2 }
 0x2ae   :  { %v475_v39 = vpop.xlane.xlu0 %474 }
 0x2c2   :  { %v478_v51 = vpop.xlane.xlu1 %477 }
 0x2c3   :  { %v504_v52 = vmax.f32 %v478_v51, 1e-24  ;;  %v503_v51 = vmax.f32 %v475_v39, 1e-24 }
 0x2c5   :  { %8530 = vrsqrt.f32 %v504_v52 }
 0x2c6   :  { %v472_v16 = vpop.xlane.xlu1 %471  ;;  %8532 = vrsqrt.f32 %v494_v20 }
 0x2c7   :  { %v502_v42 = vmax.f32 %v472_v16, 1e-24 }
 0x2c8   :  { %315 = vadd.xlane.f32.xlu0 %v314_v12 }
 0x2ca   :  { %v451_v24 = vpop.xlane.xlu1 %450 }
 0x2cb   :  { %v495_v25 = vmax.f32 %v451_v24, 1e-24 }
 0x2cd   :  { %8534 = vrsqrt.f32 %v495_v25 }
 0x2ce   :  { %8536 = vrsqrt.f32 %v502_v42  ;;  %v9527_v26 = vpop.xlane.xlu1 %465 }
 0x2cf   :  { %v8531_v27 = vpop.eup %8530  ;;  %8538 = vrsqrt.f32 %v503_v51  ;;  %v318_v51 = vmax.f32 %v9440_v18, 1e-24 }
 0x2d0   :  { %v536_v28 = vmul.f32 %v8531_v27, %v9265_v30  ;;  %v8533_v23 = vpop.eup %8532 }
 0x2d1   :  { %v526_v47 = vmul.f32 %v8533_v23, %v9267_v35  ;;  %8540 = vrsqrt.f32 %v318_v51  ;;  %v12154_v51 = vmov 0 }
 0x2d2   :  { %v8241_v36 = vpack.i.bf16 %v537_v34, %v536_v28  ;;  %v9533_v27 = vpop.xlane.xlu1 %489  ;;  %v12155_v51 = vsel %vm9575_vm2, 4294967295, %v12154_v51 }
 0x2d3   :  { %12156 = vst [vmem:[#allocation39_spill] sm:$0xff] %v12155_v51 }
 0x2d4   :  { %8242 = vrot.lane.b32.xlu1 %v8241_v36, %s9150_s2 }
 0x2d6   :  { %v9537_v28 = vpop.xlane.xlu1 %459 }
 0x2d7   :  { %v8535_v15 = vpop.eup %8534 }
 0x2d8   :  { %v527_v48 = vmul.f32 %v8535_v15, %v9301_v53  ;;  %v8537_v16 = vpop.eup %8536 }
 0x2d9   :  { %v8539_v20 = vpop.eup %8538  ;;  %v534_v12 = vmul.f32 %v8537_v16, %v9281_v40 }
 0x2da   :  { %v8246_v52 = vpack.i.bf16 %v527_v48, %v526_v47  ;;  %v535_v24 = vmul.f32 %v8539_v20, %v9329_v1  ;;  %v9543_v34 = vpop.xlane.xlu1 %483 }
 0x2dc   :  { %8247 = vrot.lane.b32.xlu1 %v8246_v52, %s9150_s2  ;;  %v8251_v25 = vpack.i.bf16 %v535_v24, %v534_v12  ;;  %v319_v52 = vmax.f32 %v9417_v32, 1e-24 }
 0x2de   :  { %2015 = vrot.lane.b32.xlu0 %v9275_v38, %s9151_s23  ;;  %v2012_v36 = vpop.permute.xlu1 %2011  ;;  %8542 = vrsqrt.f32 %v319_v52  ;;  %v8541_v52 = vpop.eup %8540 }
 0x2df   :  { %v2059_v12 = vsel %vm268_vm1, %v2012_v36, 0.0 }
 0x2e0   :  { %1856 = vrot.lane.b32.xlu1 %v9327_v0, %s9152_s24 }
 0x2e2   :  { %1850 = vrot.lane.b32.xlu0 %v9285_v41, %s9152_s24  ;;  %v2014_v23 = vpop.permute.xlu1 %2013 }
 0x2e3   :  { %v2062_v39 = vsel %vm268_vm1, %v2014_v23, 0.0  ;;  %v9558_v15 = vpop.xlane.xlu0 %468  ;;  %v320_v23 = vmax.f32 %v9434_v14, 1e-24 }
 0x2e4   :  { %2025 = vrot.lane.b32.xlu1 %v9389_v17, %s9151_s23 }
 0x2e5   :  { %8544 = vrsqrt.f32 %v320_v23 }
 0x2e6   :  { %1854 = vrot.lane.b32.xlu0 %v9275_v38, %s9152_s24  ;;  %v2018_v47 = vpop.permute.xlu1 %2017 }
 0x2e7   :  { %v9560_v42 = vpop.xlane.xlu0 %492 }
 0x2e8   :  { %1860 = vrot.lane.b32.xlu1 %v9395_v19, %s9152_s24 }
 0x2ea   :  { %2019 = vrot.lane.b32.xlu0 %v9365_v10, %s9151_s23  ;;  %v1853_v16 = vpop.permute.xlu1 %1852 }
 0x2ec   :  { %1864 = vrot.lane.b32.xlu1 %v9389_v17, %s9152_s24 }
 0x2ee   :  { %8252 = vrot.lane.b32.xlu0 %v8251_v25, %s9150_s2 }
 0x2f0   :  { %2033 = vrot.lane.b32.xlu1 %v9347_v7, %s9151_s23 }
 0x2f2   :  { %2021 = vrot.lane.b32.xlu0 %v9395_v19, %s9151_s23 }
 0x2f4   :  { %1868 = vrot.lane.b32.xlu1 %v9337_v4, %s9152_s24 }
 0x2f6   :  { %2023 = vrot.lane.b32.xlu0 %v9353_v8, %s9151_s23 }
 0x2f8   :  { %1872 = vrot.lane.b32.xlu1 %v9347_v7, %s9152_s24 }
 0x2fa   :  { %1858 = vrot.lane.b32.xlu0 %v9365_v10, %s9152_s24 }
 0x2fc   :  { %2041 = vrot.lane.b32.xlu1 %v9413_v31, %s9151_s23 }
 0x2fe   :  { %1862 = vrot.lane.b32.xlu0 %v9353_v8, %s9152_s24 }
 0x300   :  { %1876 = vrot.lane.b32.xlu1 %v9401_v21, %s9152_s24 }
 0x302   :  { %2027 = vrot.lane.b32.xlu0 %v9291_v44, %s9151_s23 }
 0x306   :  { %2029 = vrot.lane.b32.xlu0 %v9337_v4, %s9151_s23 }
 0x30a   :  { %2031 = vrot.lane.b32.xlu0 %v9271_v37, %s9151_s23 }
 0x30e   :  { %1866 = vrot.lane.b32.xlu0 %v9291_v44, %s9152_s24 }
 0x312   :  { %1870 = vrot.lane.b32.xlu0 %v9271_v37, %s9152_s24 }
 0x316   :  { %2035 = vrot.lane.b32.xlu0 %v9371_v11, %s9151_s23 }
 0x31a   :  { %2037 = vrot.lane.b32.xlu0 %v9401_v21, %s9151_s23 }
 0x31c   :  { %v9562_v48 = vpop.xlane.xlu0 %462 }
 0x31e   :  { %2039 = vrot.lane.b32.xlu0 %v9359_v9, %s9151_s23 }
 0x320   :  { %v9566_v20 = vpop.xlane.xlu0 %486 }
 0x322   :  { %1874 = vrot.lane.b32.xlu0 %v9371_v11, %s9152_s24 }
 0x324   :  { %2063 = vadd.xlane.f32.xlu1 %v2062_v39  ;;  %v8238_v25 = vpop.permute.xlu0 %8237  ;;  %v321_v39 = vmax.f32 %v9475_v13, 1e-24 }
 0x325   :  { %v8240_v11 = vunpack.i.h.bf16 %v8238_v25  ;;  %v8239_v18 = vunpack.i.l.bf16 %v8238_v25 }
 0x326   :  { %1878 = vrot.lane.b32.xlu0 %v9359_v9, %s9152_s24  ;;  %8546 = vrsqrt.f32 %v321_v39 }
 0x327   :  { %v8023_v44 = vpack.c.bf16 %v8240_v11, %v8239_v18 }
 0x32a   :  { %1880 = vrot.lane.b32.xlu0 %v9413_v31, %s9152_s24 }
 0x346   :  { %v9569_v24 = vpop.permute.xlu1 %8242 }
 0x349   :  { %2060 = vadd.xlane.f32.xlu0 %v2059_v12  ;;  %v8543_v12 = vpop.eup %8542 }
 0x34a   :  { %v352_v13 = vmul.f32 %v8543_v12, %v9430_v2  ;;  %v8545_v39 = vpop.eup %8544  ;;  %v2068_v12 = vsel %vm268_vm1, %v2018_v47, 0.0 }
 0x34b   :  { %v8547_v18 = vpop.eup %8546 }
 0x34c   :  { %v368_v23 = vmul.f32 %v352_v13, %v9263_v29  ;;  %v354_v13 = vmul.f32 %v8547_v18, %v9430_v2 }
 0x34e   :  { %v8248_v9 = vpop.permute.xlu1 %8247  ;;  %v370_v47 = vmul.f32 %v354_v13, %v9297_v49 }
 0x34f   :  { %v8250_v37 = vunpack.i.h.bf16 %v8248_v9  ;;  %v8249_v32 = vunpack.i.l.bf16 %v8248_v9  ;;  %v351_v9 = vmul.f32 %v8541_v52, %v9430_v2 }
 0x351   :  { %v8017_v36 = vpack.c.bf16 %v8250_v37, %v8249_v32  ;;  %v367_v37 = vmul.f32 %v351_v9, %v9301_v53  ;;  %v326_v9 = vmax.f32 %v9443_v22, 1e-24 }
 0x352   :  { %v1857_v22 = vpop.permute.xlu1 %1856 }
 0x353   :  { %8019 = vmatprep.subr.msk.bf16.mxu1 %vm9575_vm2, %v8017_v36  ;;  %8548 = vrsqrt.f32 %v326_v9 }
 0x354   :  { %8022 = vmatpush3.bf16.xpose.msk.msra.mxu1 %vm9575_vm2, %v8017_v36  ;;  %v353_v36 = vmul.f32 %v8545_v39, %v9430_v2 }
 0x355   :  { %v9584_v14 = vpop.xlane.xlu0 %315  ;;  %8025 = vmatprep.subr.msk.bf16.mxu1 %vm9575_vm2, %v8023_v44 }
 0x359   :  { %v2016_v25 = vpop.permute.xlu0 %2015 }
 0x35a   :  { %v2065_v11 = vsel %vm268_vm1, %v2016_v25, 0.0 }
 0x35b   :  { %2066 = vadd.xlane.f32.xlu0 %v2065_v11  ;;  %7586 = vmatmul.mubr.msk.f32.vlgmr.msra.gmra.mrb[8].mxu1 %vm268_vm1, %v367_v37  ;;  %v329_v37 = vmax.f32 %v9467_v62, 1e-24  ;;  %v1901_v11 = vsel %vm268_vm1, %v1853_v16, 0.0 }
 0x35c   :  { %8028 = vmatpush3.bf16.xpose.msk.msra.mxu1 %vm9575_vm2, %v8023_v44  ;;  %7592 = vmatprep.mubr.msk.f32.mxu1 %vm268_vm1, %v368_v23  ;;  %v369_v23 = vmul.f32 %v353_v36, %v9319_v61  ;;  %v1907_v36 = vsel %vm268_vm1, %v1857_v22, 0.0 }
 0x35d   :  { %v1851_v32 = vpop.permute.xlu0 %1850  ;;  %8550 = vrsqrt.f32 %v329_v37  ;;  %v8549_v9 = vpop.eup %8548 }
 0x35e   :  { %v1898_v52 = vsel %vm268_vm1, %v1851_v32, 0.0  ;;  %v2026_v32 = vpop.permute.xlu1 %2025 }
 0x35f   :  { %1899 = vadd.xlane.f32.xlu1 %v1898_v52  ;;  %2069 = vadd.xlane.f32.xlu0 %v2068_v12 }
 0x361   :  { %v1855_v25 = vpop.permute.xlu0 %1854 }
 0x362   :  { %v1904_v44 = vsel %vm268_vm1, %v1855_v25, 0.0 }
 0x363   :  { %1905 = vadd.xlane.f32.xlu1 %v1904_v44  ;;  %1902 = vadd.xlane.f32.xlu0 %v1901_v11  ;;  %v2080_v44 = vsel %vm268_vm1, %v2026_v32, 0.0  ;;  %v359_v11 = vmul.f32 %v8549_v9, %v9430_v2 }
 0x364   :  { %7593 = vmatmul.mubr.msk.f32.vlgmr.msra.gmra.mrb[10].mxu1 %vm268_vm1, %v369_v23  ;;  %v1861_v23 = vpop.permute.xlu1 %1860 }
 0x365   :  { %7599 = vmatprep.mubr.msk.f32.mxu1 %vm268_vm1, %v370_v47  ;;  %v2020_v39 = vpop.permute.xlu0 %2019 }
 0x366   :  { %v2071_v62 = vsel %vm268_vm1, %v2020_v39, 0.0 }
 0x367   :  { %2072 = vadd.xlane.f32.xlu0 %v2071_v62  ;;  %v8551_v37 = vpop.eup %8550  ;;  %v1913_v62 = vsel %vm268_vm1, %v1861_v23, 0.0 }
 0x368   :  { %v362_v22 = vmul.f32 %v8551_v37, %v9430_v2  ;;  %v1865_v9 = vpop.permute.xlu1 %1864 }
 0x369   :  { %v8253_v18 = vpop.permute.xlu0 %8252  ;;  %v1919_v23 = vsel %vm268_vm1, %v1865_v9, 0.0 }
 0x36a   :  { %v8255_v16 = vunpack.i.h.bf16 %v8253_v18  ;;  %v8254_v52 = vunpack.i.l.bf16 %v8253_v18  ;;  %v375_v18 = vmul.f32 %v359_v11, %v9329_v1 }
 0x36b   :  { %1908 = vadd.xlane.f32.xlu0 %v1907_v36 }
 0x36c   :  { %v8041_v12 = vpack.c.bf16 %v8255_v16, %v8254_v52  ;;  %v378_v52 = vmul.f32 %v362_v22, %v9299_v50 }
 0x36d   :  { %v2022_v13 = vpop.permute.xlu0 %2021 }
 0x36e   :  { %8043 = vmatprep.subr.msk.bf16.mxu0 %vm9575_vm2, %v8041_v12  ;;  %v2074_v25 = vsel %vm268_vm1, %v2022_v13, 0.0 }
 0x36f   :  { %8046 = vmatpush3.bf16.xpose.msk.msra.mxu0 %vm9575_vm2, %v8041_v12  ;;  %2075 = vadd.xlane.f32.xlu1 %v2074_v25  ;;  %v2034_v25 = vpop.permute.xlu1 %2033 }
 0x370   :  { %2081 = vadd.xlane.f32.xlu0 %v2080_v44 }
 0x371   :  { %v2024_v47 = vpop.permute.xlu0 %2023 }
 0x372   :  { %v2077_v39 = vsel %vm268_vm1, %v2024_v47, 0.0 }
 0x373   :  { %2078 = vadd.xlane.f32.xlu1 %v2077_v39  ;;  %v2092_v39 = vsel %vm268_vm1, %v2034_v25, 0.0 }
 0x374   :  { %1914 = vadd.xlane.f32.xlu0 %v1913_v62  ;;  %v1869_v62 = vpop.permute.xlu1 %1868 }
 0x375   :  { %v1859_v16 = vpop.permute.xlu0 %1858 }
 0x376   :  { %7614 = vmatmul.mubr.msk.f32.vlgmr.msra.gmra.mrb[8].mxu0 %vm268_vm1, %v375_v18  ;;  %v1910_v32 = vsel %vm268_vm1, %v1859_v16, 0.0 }
 0x377   :  { %7627 = vmatprep.mubr.msk.f32.mxu0 %vm268_vm1, %v378_v52  ;;  %1911 = vadd.xlane.f32.xlu1 %v1910_v32  ;;  %v1925_v52 = vsel %vm268_vm1, %v1869_v62, 0.0  ;;  %v500_v62 = vmax.f32 %v9527_v26, 1e-24 }
 0x379   :  { %v1863_v36 = vpop.permute.xlu0 %1862 }
 0x37a   :  { %v1916_v12 = vsel %vm268_vm1, %v1863_v36, 0.0 }
 0x37b   :  { %1917 = vadd.xlane.f32.xlu1 %v1916_v12  ;;  %v1873_v12 = vpop.permute.xlu1 %1872 }
 0x37d   :  { %v2028_v13 = vpop.permute.xlu0 %2027 }
 0x37e   :  { %v2083_v37 = vsel %vm268_vm1, %v2028_v13, 0.0 }
 0x37f   :  { %2084 = vadd.xlane.f32.xlu0 %v2083_v37  ;;  %v2042_v37 = vpop.permute.xlu1 %2041 }
 0x381   :  { %v2030_v44 = vpop.permute.xlu0 %2029 }
 0x382   :  { %v2086_v11 = vsel %vm268_vm1, %v2030_v44, 0.0 }
 0x383   :  { %2087 = vadd.xlane.f32.xlu1 %v2086_v11  ;;  %1920 = vadd.xlane.f32.xlu0 %v1919_v23  ;;  %v1931_v11 = vsel %vm268_vm1, %v1873_v12, 0.0  ;;  %v501_v23 = vmax.f32 %v9558_v15, 1e-24  ;;  %v508_v15 = vmax.f32 %v9533_v27, 1e-24 }
 0x384   :  { %v499_v12 = vmax.f32 %v9562_v48, 1e-24 }
 0x385   :  { %v2032_v47 = vpop.permute.xlu0 %2031  ;;  %8552 = vrsqrt.f32 %v501_v23 }
 0x386   :  { %v2089_v22 = vsel %vm268_vm1, %v2032_v47, 0.0  ;;  %8554 = vrsqrt.f32 %v500_v62 }
 0x387   :  { %2090 = vadd.xlane.f32.xlu1 %v2089_v22  ;;  %2093 = vadd.xlane.f32.xlu0 %v2092_v39  ;;  %v2104_v39 = vsel %vm268_vm1, %v2042_v37, 0.0 }
 0x389   :  { %v1867_v18 = vpop.permute.xlu0 %1866 }
 0x38a   :  { %v1922_v16 = vsel %vm268_vm1, %v1867_v18, 0.0  ;;  %v1877_v18 = vpop.permute.xlu1 %1876 }
 0x38b   :  { %1923 = vadd.xlane.f32.xlu1 %v1922_v16  ;;  %1926 = vadd.xlane.f32.xlu0 %v1925_v52  ;;  %v509_v16 = vmax.f32 %v9560_v42, 1e-24 }
 0x38d   :  { %v1871_v32 = vpop.permute.xlu0 %1870  ;;  %8556 = vrsqrt.f32 %v509_v16 }
 0x38e   :  { %v1928_v36 = vsel %vm268_vm1, %v1871_v32, 0.0  ;;  %8558 = vrsqrt.f32 %v508_v15  ;;  %v9671_v15 = vpack.c.bf16 %v9309_v59, %v9299_v50 }
 0x38f   :  { %1929 = vadd.xlane.f32.xlu1 %v1928_v36  ;;  %v1937_v36 = vsel %vm268_vm1, %v1877_v18, 0.0  ;;  %8560 = vrsqrt.f32 %v499_v12  ;;  %v8553_v37 = vpop.eup %8552 }
 0x390   :  { %12159 = vst [vmem:[#allocation42_spill] sm:$0xff] %v9671_v15 }
 0x391   :  { %v2036_v9 = vpop.permute.xlu0 %2035 }
 0x392   :  { %v2095_v13 = vsel %vm268_vm1, %v2036_v9, 0.0  ;;  %v498_v9 = vmax.f32 %v9537_v28, 1e-24 }
 0x393   :  { %2096 = vadd.xlane.f32.xlu0 %v2095_v13 }
 0x394   :  { %8562 = vrsqrt.f32 %v498_v9 }
 0x395   :  { %v2038_v25 = vpop.permute.xlu0 %2037 }
 0x396   :  { %v2098_v44 = vsel %vm268_vm1, %v2038_v25, 0.0  ;;  %v8555_v25 = vpop.eup %8554 }
 0x397   :  { %2099 = vadd.xlane.f32.xlu1 %v2098_v44  ;;  %1932 = vadd.xlane.f32.xlu0 %v1931_v11  ;;  %v533_v44 = vmul.f32 %v8553_v37, %v9303_v54  ;;  %v8557_v27 = vpop.eup %8556  ;;  %v532_v11 = vmul.f32 %v8555_v25, %v9293_v45  ;;  %v507_v25 = vmax.f32 %v9566_v20, 1e-24 }
 0x398   :  { %v8559_v23 = vpop.eup %8558  ;;  %v541_v48 = vmul.f32 %v8557_v27, %v9305_v56 }
 0x399   :  { %v2040_v47 = vpop.permute.xlu0 %2039  ;;  %v540_v28 = vmul.f32 %v8559_v23, %v9295_v46 }
 0x39a   :  { %v2101_v22 = vsel %vm268_vm1, %v2040_v47, 0.0  ;;  %v8256_v47 = vpack.i.bf16 %v533_v44, %v532_v11  ;;  %v506_v44 = vmax.f32 %v9543_v34, 1e-24 }
 0x39b   :  { %2102 = vadd.xlane.f32.xlu1 %v2101_v22  ;;  %2105 = vadd.xlane.f32.xlu0 %v2104_v39  ;;  %v8561_v22 = vpop.eup %8560  ;;  %v8261_v62 = vpack.i.bf16 %v541_v48, %v540_v28 }
 0x39c   :  { %v531_v18 = vmul.f32 %v8561_v22, %v9307_v58 }
 0x39d   :  { %v1875_v52 = vpop.permute.xlu0 %1874 }
 0x39e   :  { %v1934_v32 = vsel %vm268_vm1, %v1875_v52, 0.0  ;;  %v8563_v39 = vpop.eup %8562 }
 0x39f   :  { %1935 = vadd.xlane.f32.xlu1 %v1934_v32  ;;  %1938 = vadd.xlane.f32.xlu0 %v1937_v36  ;;  %v530_v16 = vmul.f32 %v8563_v39, %v9297_v49  ;;  %v9659_v32 = vpack.c.bf16 %v9319_v61, %v9263_v29  ;;  %v9665_v36 = vpack.c.bf16 %v9329_v1, %v9281_v40 }
 0x3a1   :  { %v1879_v26 = vpop.permute.xlu0 %1878  ;;  %v8266_v52 = vpack.i.bf16 %v531_v18, %v530_v16  ;;  %12157 = vst [vmem:[#allocation40_spill] sm:$0xff] %v9659_v32  ;;  %12158 = vst [vmem:[#allocation41_spill] sm:$0xff] %v9665_v36  ;;  %v9689_v18 = vpack.c.bf16 %v9307_v58, %v9297_v49 }
 0x3a2   :  { %v1940_v37 = vsel %vm268_vm1, %v1879_v26, 0.0  ;;  %v9683_v26 = vpack.c.bf16 %v9301_v53, %v9267_v35 }
 0x3a3   :  { %12161 = vst [vmem:[#allocation44_spill] sm:$0xff] %v9689_v18 }
 0x3a4   :  { %12160 = vst [vmem:[#allocation43_spill] sm:$0xff] %v9683_v26 }
 0x3a5   :  { %v1881_v13 = vpop.permute.xlu0 %1880 }
 0x3a6   :  { %v1943_v42 = vsel %vm268_vm1, %v1881_v13, 0.0 }
 0x3a7   :  { %1944 = vadd.xlane.f32.xlu0 %v1943_v42 }
 0x3b0   :  { %8257 = vrot.lane.b32.xlu1 %v8256_v47, %s9150_s2 }
 0x3b1   :  { %v2064_v12 = vpop.xlane.xlu1 %2063 }
 0x3b2   :  { %v2108_v9 = vmax.f32 %v2064_v12, 1e-24 }
 0x3b4   :  { %8262 = vrot.lane.b32.xlu1 %v8261_v62, %s9150_s2  ;;  %8564 = vrsqrt.f32 %v2108_v9 }
 0x3b8   :  { %8267 = vrot.lane.b32.xlu1 %v8266_v52, %s9150_s2 }
 0x3bd   :  { %1514 = vrot.lane.b32.xlu0 %v9659_v32, %s9143_s11 }
 0x3be   :  { %v8565_v27 = vpop.eup %8564 }
 0x3bf   :  { %v2140_v47 = vmul.f32 %v8565_v27, %v9301_v53 }
 0x3c1   :  { %1658 = vrot.lane.b32.xlu0 %v9665_v36, %s9143_s11 }
 0x3c5   :  { %1754 = vrot.lane.b32.xlu0 %v9671_v15, %s9143_s11 }
 0x3d6   :  { %v2061_v13 = vpop.xlane.xlu0 %2060 }
 0x3d7   :  { %v2107_v42 = vmax.f32 %v2061_v13, 1e-24 }
 0x3d9   :  { %8566 = vrsqrt.f32 %v2107_v42 }
 0x3da   :  { %8568 = vrsqrt.f32 %v507_v25 }
 0x3db   :  { %8570 = vrsqrt.f32 %v506_v44  ;;  %v9700_v44 = vpack.c.bf16 %v9303_v54, %v9293_v45 }
 0x3dc   :  { %1941 = vadd.xlane.f32.xlu1 %v1940_v37 }
 0x3dd   :  { %12162 = vst [vmem:[#allocation45_spill] sm:$0xff] %v9700_v44 }
 0x3e3   :  { %v8567_v11 = vpop.eup %8566 }
 0x3e4   :  { %v2139_v23 = vmul.f32 %v8567_v11, %v9267_v35  ;;  %v8569_v28 = vpop.eup %8568 }
 0x3e5   :  { %v8571_v34 = vpop.eup %8570  ;;  %v539_v16 = vmul.f32 %v8569_v28, %v9309_v59 }
 0x3e6   :  { %v8276_v48 = vpack.i.bf16 %v2140_v47, %v2139_v23  ;;  %v538_v9 = vmul.f32 %v8571_v34, %v9299_v50  ;;  %v9706_v47 = vpack.c.bf16 %v9341_v6, %v9265_v30 }
 0x3e8   :  { %v2067_v22 = vpop.xlane.xlu0 %2066  ;;  %8277 = vrot.lane.b32.xlu0 %v8276_v48, %s9151_s23  ;;  %v8271_v42 = vpack.i.bf16 %v539_v16, %v538_v9  ;;  %12163 = vst [vmem:[#allocation46_spill] sm:$0xff] %v9706_v47  ;;  %v9717_v9 = vstv %s7215_s26 }
 0x3e9   :  { %v2109_v52 = vmax.f32 %v2067_v22, 1e-24 }
 0x3ec   :  { %v2070_v20 = vpop.xlane.xlu0 %2069  ;;  %v1900_v62 = vpop.xlane.xlu1 %1899 }
 0x3ed   :  { %1466 = vrot.lane.b32.xlu1 %v9683_v26, %s9143_s11  ;;  %v2110_v39 = vmax.f32 %v2070_v20, 1e-24  ;;  %v1946_v13 = vmax.f32 %v1900_v62, 1e-24  ;;  %v9714_v62 = vpack.c.bf16 %v9305_v56, %v9295_v46 }
 0x3ef   :  { %8572 = vrsqrt.f32 %v2110_v39  ;;  %12164 = vst [vmem:[#allocation47_spill] sm:$0xff] %v9714_v62 }
 0x3f0   :  { %v1903_v12 = vpop.xlane.xlu0 %1902  ;;  %8574 = vrsqrt.f32 %v2109_v52  ;;  %v1906_v27 = vpop.xlane.xlu1 %1905 }
 0x3f1   :  { %1562 = vrot.lane.b32.xlu1 %v9689_v18, %s9143_s11  ;;  %8576 = vrsqrt.f32 %v1946_v13  ;;  %v1947_v25 = vmax.f32 %v1903_v12, 1e-24  ;;  %v1948_v34 = vmax.f32 %v1906_v27, 1e-24 }
 0x3f3   :  { %8578 = vrsqrt.f32 %v1947_v25 }
 0x3f4   :  { %v9695_v37 = vpop.xlane.xlu0 %2072 }
 0x3f5   :  { %8272 = vrot.lane.b32.xlu1 %v8271_v42, %s9150_s2 }
 0x3f8   :  { %v1909_v11 = vpop.xlane.xlu0 %1908 }
 0x3f9   :  { %1610 = vrot.lane.b32.xlu1 %v9700_v44, %s9143_s11  ;;  %v1949_v23 = vmax.f32 %v1909_v11, 1e-24  ;;  %v8573_v48 = vpop.eup %8572 }
 0x3fa   :  { %v8575_v20 = vpop.eup %8574  ;;  %v2142_v16 = vmul.f32 %v8573_v48, %v9319_v61 }
 0x3fb   :  { %8580 = vrsqrt.f32 %v1949_v23  ;;  %v8577_v52 = vpop.eup %8576  ;;  %v2141_v42 = vmul.f32 %v8575_v20, %v9263_v29 }
 0x3fc   :  { %v9708_v22 = vpop.xlane.xlu1 %2075  ;;  %v1979_v27 = vmul.f32 %v8577_v52, %v9717_v9 }
 0x3fd   :  { %v2082_v28 = vpop.xlane.xlu0 %2081  ;;  %1706 = vrot.lane.b32.xlu1 %v9706_v47, %s9143_s11  ;;  %v8281_v25 = vpack.i.bf16 %v2142_v16, %v2141_v42  ;;  %v8579_v11 = vpop.eup %8578 }
 0x3fe   :  { %v2114_v39 = vmax.f32 %v2082_v28, 1e-24  ;;  %v1995_v48 = vmul.f32 %v1979_v27, %v9267_v35  ;;  %v1980_v28 = vmul.f32 %v8579_v11, %v9717_v9 }
 0x400   :  { %v2079_v12 = vpop.xlane.xlu1 %2078  ;;  %8582 = vrsqrt.f32 %v2114_v39  ;;  %v1996_v20 = vmul.f32 %v1980_v28, %v9301_v53 }
 0x401   :  { %v2113_v13 = vmax.f32 %v2079_v12, 1e-24  ;;  %1802 = vrot.lane.b32.xlu1 %v9714_v62, %s9143_s11  ;;  %8584 = vrsqrt.f32 %v1948_v34  ;;  %v1915_v12 = vpop.xlane.xlu0 %1914  ;;  %s9155_s11 = smov 80  }
 0x403   :  { %8586 = vrsqrt.f32 %v2113_v13 }
 0x404   :  { %v1912_v23 = vpop.xlane.xlu1 %1911 }
 0x405   :  { %8282 = vrot.lane.b32.xlu1 %v8281_v25, %s9151_s23  ;;  %v8581_v39 = vpop.eup %8580 }
 0x406   :  { %v1982_v34 = vmul.f32 %v8581_v39, %v9717_v9 }
 0x408   :  { %v1918_v13 = vpop.xlane.xlu1 %1917  ;;  %v1998_v35 = vmul.f32 %v1982_v34, %v9319_v61  ;;  %v2112_v34 = vmax.f32 %v9708_v22, 1e-24 }
 0x409   :  { %2160 = vrot.lane.b32.xlu1 %v1995_v48, %s9152_s24  ;;  %v1952_v39 = vmax.f32 %v1918_v13, 1e-24 }
 0x40a   :  { %v8583_v15 = vpop.eup %8582 }
 0x40b   :  { %v8585_v16 = vpop.eup %8584  ;;  %v2146_v11 = vmul.f32 %v8583_v15, %v9303_v54 }
 0x40c   :  { %v2085_v52 = vpop.xlane.xlu0 %2084  ;;  %v1981_v28 = vmul.f32 %v8585_v16, %v9717_v9  ;;  %v1950_v16 = vmax.f32 %v1912_v23, 1e-24 }
 0x40d   :  { %v8587_v42 = vpop.eup %8586  ;;  %2162 = vrot.lane.b32.xlu1 %v1996_v20, %s9152_s24  ;;  %v2115_v25 = vmax.f32 %v2085_v52, 1e-24 }
 0x40e   :  { %v2145_v27 = vmul.f32 %v8587_v42, %v9293_v45  ;;  %v1997_v42 = vmul.f32 %v1981_v28, %v9263_v29  ;;  %v1951_v28 = vmax.f32 %v1915_v12, 1e-24 }
 0x40f   :  { %8588 = vrsqrt.f32 %v2115_v25  ;;  %v2111_v25 = vmax.f32 %v9695_v37, 1e-24 }
 0x410   :  { %v1921_v62 = vpop.xlane.xlu0 %1920  ;;  %v2088_v48 = vpop.xlane.xlu1 %2087  ;;  %v8286_v36 = vpack.i.bf16 %v2146_v11, %v2145_v27 }
 0x411   :  { %v2116_v53 = vmax.f32 %v2088_v48, 1e-24  ;;  %2257 = vrot.lane.b32.xlu1 %v1998_v35, %s9152_s24 }
 0x412   :  { %8287 = vrot.lane.b32.xlu0 %v8286_v36, %s9151_s23  ;;  %v1953_v36 = vmax.f32 %v1921_v62, 1e-24 }
 0x413   :  { %8590 = vrsqrt.f32 %v2116_v53 }
 0x414   :  { %v2094_v20 = vpop.xlane.xlu0 %2093  ;;  %v2091_v52 = vpop.xlane.xlu1 %2090  ;;  %8592 = vrsqrt.f32 %v1952_v39 }
 0x415   :  { %v2118_v15 = vmax.f32 %v2094_v20, 1e-24  ;;  %v2117_v47 = vmax.f32 %v2091_v52, 1e-24 }
 0x416   :  { %2255 = vrot.lane.b32.xlu0 %v1997_v42, %s9152_s24 }
 0x417   :  { %8594 = vrsqrt.f32 %v2118_v15 }
 0x418   :  { %8596 = vrsqrt.f32 %v2117_v47  ;;  %v1924_v35 = vpop.xlane.xlu1 %1923  ;;  %v9740_v27 = vpop.xlane.xlu0 %1926 }
 0x419   :  { %v1954_v13 = vmax.f32 %v1924_v35, 1e-24  ;;  %8598 = vrsqrt.f32 %v2112_v34  ;;  %v8589_v53 = vpop.eup %8588 }
 0x41a   :  { %8600 = vrsqrt.f32 %v1950_v16  ;;  %v2147_v22 = vmul.f32 %v8589_v53, %v9281_v40 }
 0x41b   :  { %8602 = vrsqrt.f32 %v1954_v13 }
 0x41c   :  { %8604 = vrsqrt.f32 %v2111_v25  ;;  %v9744_v47 = vpop.xlane.xlu1 %1929 }
 0x41d   :  { %v8591_v11 = vpop.eup %8590  ;;  %8606 = vrsqrt.f32 %v1953_v36 }
 0x41e   :  { %v2148_v48 = vmul.f32 %v8591_v11, %v9329_v1  ;;  %v8593_v23 = vpop.eup %8592  ;;  %8608 = vrsqrt.f32 %v1951_v28 }
 0x41f   :  { %v1985_v25 = vmul.f32 %v8593_v23, %v9717_v9 }
 0x420   :  { %v2097_v39 = vpop.xlane.xlu0 %2096  ;;  %v8291_v20 = vpack.i.bf16 %v2148_v48, %v2147_v22 }
 0x421   :  { %v8595_v37 = vpop.eup %8594  ;;  %v2119_v42 = vmax.f32 %v2097_v39, 1e-24  ;;  %v2001_v48 = vmul.f32 %v1985_v25, %v9293_v45  ;;  %v323_v25 = vmax.f32 %v9457_v55, 1e-24  ;;  %v324_v55 = vmax.f32 %v9469_v63, 1e-24 }
 0x422   :  { %v8597_v52 = vpop.eup %8596  ;;  %v2150_v62 = vmul.f32 %v8595_v37, %v9341_v6  ;;  %8292 = vrot.lane.b32.xlu0 %v8291_v20, %s9151_s23 }
 0x423   :  { %v2149_v15 = vmul.f32 %v8597_v52, %v9265_v30  ;;  %v8599_v34 = vpop.eup %8598  ;;  %8610 = vrsqrt.f32 %v2119_v42 }
 0x424   :  { %v2100_v16 = vpop.xlane.xlu1 %2099  ;;  %v8601_v35 = vpop.eup %8600  ;;  %v2144_v39 = vmul.f32 %v8599_v34, %v9307_v58  ;;  %v322_v34 = vmax.f32 %v9471_v3, 1e-24 }
 0x425   :  { %v2120_v13 = vmax.f32 %v2100_v16, 1e-24  ;;  %v8296_v12 = vpack.i.bf16 %v2150_v62, %v2149_v15  ;;  %v8603_v53 = vpop.eup %8602  ;;  %v1983_v37 = vmul.f32 %v8601_v35, %v9717_v9 }
 0x426   :  { %v1987_v36 = vmul.f32 %v8603_v53, %v9717_v9  ;;  %v8605_v11 = vpop.eup %8604 }
 0x427   :  { %8297 = vrot.lane.b32.xlu0 %v8296_v12, %s9151_s23  ;;  %8612 = vrsqrt.f32 %v2120_v13  ;;  %v8607_v20 = vpop.eup %8606  ;;  %v2143_v23 = vmul.f32 %v8605_v11, %v9297_v49  ;;  %v1999_v62 = vmul.f32 %v1983_v37, %v9297_v49 }
 0x428   :  { %v9752_v22 = vpop.xlane.xlu1 %2102  ;;  %v2003_v28 = vmul.f32 %v1987_v36, %v9281_v40  ;;  %v1986_v15 = vmul.f32 %v8607_v20, %v9717_v9  ;;  %v8609_v16 = vpop.eup %8608  ;;  %8614 = vrsqrt.f32 %v322_v34 }
 0x429   :  { %v8301_v42 = vpack.i.bf16 %v2144_v39, %v2143_v23  ;;  %v1984_v11 = vmul.f32 %v8609_v16, %v9717_v9  ;;  %8616 = vrsqrt.f32 %v323_v25 }
 0x42a   :  { %2540 = vrot.lane.b32.xlu1 %v2003_v28, %s9152_s24  ;;  %v2002_v36 = vmul.f32 %v1986_v15, %v9303_v54  ;;  %8618 = vrsqrt.f32 %v324_v55 }
 0x42b   :  { %2445 = vrot.lane.b32.xlu0 %v2001_v48, %s9152_s24  ;;  %v2000_v37 = vmul.f32 %v1984_v11, %v9307_v58 }
 0x42c   :  { %v9761_v52 = vpop.xlane.xlu1 %1935 }
 0x42d   :  { %v8611_v12 = vpop.eup %8610 }
 0x42e   :  { %v9765_v13 = vpop.f32.mrb[8].mxu1  ;;  %2350 = vrot.lane.b32.xlu1 %v1999_v62, %s9152_s24  ;;  %v2151_v3 = vmul.f32 %v8611_v12, %v9299_v50 }
 0x42f   :  { %8302 = vrot.lane.b32.xlu0 %v8301_v42, %s9151_s23  ;;  %v9770_v35 = vpop.f32.mrb[9].mxu1  ;;  %v327_v42 = vmax.f32 %v9419_v33, 1e-24  ;;  %v331_v33 = vmax.f32 %v9463_v57, 1e-24 }
 0x430   :  { %v8258_v53 = vpop.permute.xlu1 %8257 }
 0x431   :  { %v8613_v48 = vpop.eup %8612  ;;  %v8260_v16 = vunpack.i.h.bf16 %v8258_v53  ;;  %v8259_v34 = vunpack.i.l.bf16 %v8258_v53  ;;  %8620 = vrsqrt.f32 %v327_v42 }
 0x432   :  { %2447 = vrot.lane.b32.xlu1 %v2002_v36, %s9152_s24  ;;  %v2152_v28 = vmul.f32 %v8613_v48, %v9309_v59  ;;  %v8615_v11 = vpop.eup %8614 }
 0x433   :  { %v8617_v63 = vpop.eup %8616  ;;  %v8035_v48 = vpack.c.bf16 %v8260_v16, %v8259_v34  ;;  %v355_v53 = vmul.f32 %v8615_v11, %v9430_v2  ;;  %v332_v16 = vmax.f32 %v9584_v14, 1e-24  ;;  %v9807_v34 = vpop.xlane.xlu0 %1932 }
 0x434   :  { %v8263_v39 = vpop.permute.xlu1 %8262  ;;  %v8306_v20 = vpack.i.bf16 %v2152_v28, %v2151_v3  ;;  %v328_v3 = vmax.f32 %v9451_v43, 1e-24  ;;  %v356_v28 = vmul.f32 %v8617_v63, %v9430_v2  ;;  %v8619_v55 = vpop.eup %8618 }
 0x435   :  { %v371_v43 = vmul.f32 %v355_v53, %v9307_v58  ;;  %v8264_v11 = vunpack.i.l.bf16 %v8263_v39 }
 0x436   :  { %2352 = vrot.lane.b32.xlu1 %v2000_v37, %s9152_s24  ;;  %8307 = vrot.lane.b32.xlu0 %v8306_v20, %s9151_s23  ;;  %v8245_v37 = vunpack.i.h.bf16 %v9569_v24  ;;  %v8244_v20 = vunpack.i.l.bf16 %v9569_v24  ;;  %8622 = vrsqrt.f32 %v328_v3  ;;  %v372_v42 = vmul.f32 %v356_v28, %v9293_v45  ;;  %v9816_v28 = vld [vmem:[#allocation9] sm:$0xff] }
 0x437   :  { %v9782_v23 = vpop.f32.mrb[10].mxu1  ;;  %8624 = vrsqrt.f32 %v331_v33  ;;  %v357_v24 = vmul.f32 %v8619_v55, %v9430_v2  ;;  %v9814_v53 = vpop.xlane.xlu0 %2105  ;;  %v9830_v55 = vld [vmem:[#allocation9 + $0x8] sm:$0xff] }
 0x438   :  { %v9785_v62 = vpop.f32.mrb[11].mxu1  ;;  %v8268_v15 = vpop.permute.xlu1 %8267  ;;  %v8047_v57 = vpack.c.bf16 %v8245_v37, %v8244_v20  ;;  %8626 = vrsqrt.f32 %v332_v16  ;;  %v9827_v20 = vadd.f32 %v9770_v35, %v9816_v28  ;;  %v9843_v35 = vadd.f32 %v9765_v13, %v9830_v55 }
 0x439   :  { %v8270_v12 = vunpack.i.h.bf16 %v8268_v15  ;;  %v8269_v25 = vunpack.i.l.bf16 %v8268_v15  ;;  %v373_v14 = vmul.f32 %v357_v24, %v9303_v54  ;;  %v9917_v49 = vadd.f32 %v9785_v62, %v9816_v28 }
 0x43a   :  { %v1273_v24 = vsel %vm1272_vm3, %v9827_v20, -inf }
 0x43b   :  { %v8029_v36 = vpack.c.bf16 %v8270_v12, %v8269_v25  ;;  %v8621_v15 = vpop.eup %8620  ;;  %v1279_v18 = vsel %vm1272_vm3, %v9917_v49, -inf }
 0x43c   :  { %v360_v25 = vmul.f32 %v8621_v15, %v9430_v2 }
 0x43d   :  { %8031 = vmatprep.subr.msk.bf16.mxu1 %vm9575_vm2, %v8029_v36 }
 0x43e   :  { %8034 = vmatpush3.bf16.xpose.msk.msra.mxu1 %vm9575_vm2, %v8029_v36  ;;  %v8265_v36 = vunpack.i.h.bf16 %v8263_v39 }
 0x43f   :  { %8037 = vmatprep.subr.msk.bf16.mxu1 %vm9575_vm2, %v8035_v48 }
 0x440   :  { %v8623_v3 = vpop.eup %8622  ;;  %v8059_v37 = vpack.c.bf16 %v8265_v36, %v8264_v11 }
 0x441   :  { %v8625_v33 = vpop.eup %8624  ;;  %v361_v39 = vmul.f32 %v8623_v3, %v9430_v2  ;;  %v1276_v3 = vsel %vm1272_vm3, %v9843_v35, -inf }
 0x443   :  { %v377_v15 = vmul.f32 %v361_v39, %v9341_v6 }
 0x445   :  { %7600 = vmatmul.mubr.msk.f32.vlgmr.msra.gmra.mrb[12].mxu1 %vm268_vm1, %v371_v43  ;;  %v364_v43 = vmul.f32 %v8625_v33, %v9430_v2  ;;  %v9863_v33 = vadd.f32 %v9782_v23, %v9830_v55 }
 0x446   :  { %8040 = vmatpush3.bf16.xpose.msk.msra.mxu1 %vm9575_vm2, %v8035_v48  ;;  %7606 = vmatprep.mubr.msk.f32.mxu1 %vm268_vm1, %v372_v42  ;;  %v376_v48 = vmul.f32 %v360_v25, %v9265_v30  ;;  %v9832_v42 = vpop.xlane.xlu0 %1938 }
 0x447   :  { %8049 = vmatprep.subr.msk.bf16.mxu1 %vm9575_vm2, %v8047_v57  ;;  %v380_v25 = vmul.f32 %v364_v43, %v9295_v46 }
 0x449   :  { %v7615_v12 = vpop.f32.mrb[8].mxu0 }
 0x44a   :  { %v990_v63 = vpop.f32.mrb[9].mxu0  ;;  %v9850_v11 = vpop.xlane.xlu0 %1944  ;;  %v9856_v13 = vadd.f32 %v7615_v12, %v9830_v55  ;;  %v1282_v12 = vsel %vm1272_vm3, %v9863_v33, -inf }
 0x44b   :  { %v9836_v16 = vadd.f32 %v990_v63, %v9816_v28  ;;  %v12045_v63 = vmov 0.0  }
 0x44c   :  { %v1300_v39 = vsel %vm1272_vm3, %v9856_v13, -inf }
 0x44d   :  { %7607 = vmatmul.mubr.msk.f32.vlgmr.msra.gmra.mrb[14].mxu1 %vm268_vm1, %v373_v14  ;;  %v1297_v14 = vsel %vm1272_vm3, %v9836_v16, -inf }
 0x44e   :  { %8052 = vmatpush3.bf16.xpose.msk.msra.mxu1 %vm9575_vm2, %v8047_v57  ;;  %7620 = vmatprep.mubr.msk.f32.mxu1 %vm268_vm1, %v376_v48  ;;  %v8627_v57 = vpop.eup %8626 }
 0x44f   :  { %8061 = vmatprep.subr.msk.bf16.mxu1 %vm9575_vm2, %v8059_v37  ;;  %v365_v36 = vmul.f32 %v8627_v57, %v9430_v2 }
 0x451   :  { %v381_v48 = vmul.f32 %v365_v36, %v9305_v56 }
 0x455   :  { %1274 = vmax.xlane.f32.xlu0 %v1273_v24  ;;  %7621 = vmatmul.mubr.msk.f32.vlgmr.msra.gmra.mrb[16].mxu1 %vm268_vm1, %v377_v15  ;;  %v330_v15 = vmax.f32 %v9473_v5, 1e-24 }
 0x456   :  { %8064 = vmatpush3.bf16.xpose.msk.msra.mxu1 %vm9575_vm2, %v8059_v37  ;;  %7634 = vmatprep.mubr.msk.f32.mxu1 %vm268_vm1, %v380_v25  ;;  %v1515_v37 = vpop.permute.xlu0 %1514 }
 0x457   :  { %7643 = vmatprep.subr.bf16.mxu1 %v12045_v63  ;;  %8628 = vrsqrt.f32 %v330_v15 }
 0x459   :  { %1298 = vmax.xlane.f32.xlu0 %v1297_v14 }
 0x45a   :  { %1277 = vmax.xlane.f32.xlu1 %v1276_v3 }
 0x45d   :  { %7635 = vmatmul.mubr.msk.f32.vlgmr.msra.gmra.mrb[18].mxu1 %vm268_vm1, %v381_v48 }
 0x45e   :  { %1301 = vmax.xlane.f32.xlu1 %v1300_v39  ;;  %7644 = vmatpush3.bf16.msra.mxu1 %v1515_v37 }
 0x45f   :  { %7655 = vmatprep.subr.bf16.mxu1 %v12045_v63 }
 0x461   :  { %v8629_v3 = vpop.eup %8628 }
 0x462   :  { %1283 = vmax.xlane.f32.xlu1 %v1282_v12  ;;  %v363_v48 = vmul.f32 %v8629_v3, %v9430_v2 }
 0x464   :  { %v379_v5 = vmul.f32 %v363_v48, %v9309_v59 }
 0x469   :  { %v9871_v43 = vpop.xlane.xlu1 %1941 }
 0x46d   :  { %v1467_v23 = vpop.permute.xlu1 %1466 }
 0x471   :  { %v9874_v57 = vpop.permute.xlu1 %1562 }
 0x475   :  { %v8273_v24 = vpop.permute.xlu1 %8272 }
 0x476   :  { %v8275_v25 = vunpack.i.h.bf16 %v8273_v24  ;;  %v8274_v36 = vunpack.i.l.bf16 %v8273_v24 }
 0x478   :  { %v8053_v14 = vpack.c.bf16 %v8275_v25, %v8274_v36 }
 0x47a   :  { %8055 = vmatprep.subr.msk.bf16.mxu0 %vm9575_vm2, %v8053_v14 }
 0x47b   :  { %8058 = vmatpush3.bf16.xpose.msk.msra.mxu0 %vm9575_vm2, %v8053_v14  ;;  %v9897_v14 = vpop.permute.xlu1 %1610 }
 0x47c   :  { %7637 = vmatprep.subr.bf16.mxu0 %v12045_v63 }
 0x47f   :  { %v9899_v3 = vpop.permute.xlu1 %1706 }
 0x480   :  { %12165 = vst [vmem:[#allocation48_spill] sm:$0xff] %v9899_v3 }
 0x482   :  { %7628 = vmatmul.mubr.msk.f32.vlgmr.msra.gmra.mrb[10].mxu0 %vm268_vm1, %v379_v5 }
 0x483   :  { %7638 = vmatpush3.bf16.msra.mxu0 %v1467_v23  ;;  %v9901_v23 = vpop.permute.xlu1 %1802 }
 0x484   :  { %7649 = vmatprep.subr.bf16.mxu0 %v12045_v63  ;;  %12166 = vst [vmem:[#allocation49_spill] sm:$0xff] %v9901_v23 }
 0x487   :  { %v9903_v48 = vpop.permute.xlu1 %8282 }
 0x488   :  { %12167 = vst [vmem:[#allocation50_spill] sm:$0xff] %v9903_v48 }
 0x48b   :  { %v9905_v5 = vpop.permute.xlu1 %2160 }
 0x48f   :  { %v9907_v40 = vpop.permute.xlu1 %2162 }
 0x490   :  { %12168 = vst [vmem:[#allocation51_spill] sm:$0xff] %v9907_v40 }
 0x493   :  { %v9928_v44 = vpop.permute.xlu1 %2257 }
 0x494   :  { %12169 = vst [vmem:[#allocation52_spill] sm:$0xff] %v9928_v44 }
 0x518   :  { %v7601_v37 = vpop.f32.mrb[12].mxu1 }
 0x519   :  { %v808_v39 = vpop.f32.mrb[13].mxu1  ;;  %v9931_v62 = vadd.f32 %v7601_v37, %v9830_v55 }
 0x51a   :  { %v9922_v29 = vadd.f32 %v808_v39, %v9816_v28  ;;  %v2121_v39 = vmax.f32 %v9752_v22, 1e-24 }
 0x520   :  { %v9885_v12 = vpop.f32.mrb[14].mxu1 }
 0x521   :  { %v9887_v15 = vpop.f32.mrb[15].mxu1 }
 0x528   :  { %v9889_v24 = vpop.f32.mrb[16].mxu1 }
 0x529   :  { %v9891_v25 = vpop.f32.mrb[17].mxu1 }
 0x530   :  { %v9893_v2 = vpop.f32.mrb[18].mxu1 }
 0x531   :  { %v9895_v36 = vpop.f32.mrb[19].mxu1 }
 0x555   :  { %v7629_v63 = vpop.f32.mrb[10].mxu0 }
 0x556   :  { %v9910_v45 = vadd.f32 %v7629_v63, %v9830_v55  ;;  %v1172_v54 = vpop.f32.mrb[11].mxu0  ;;  %v1955_v63 = vmax.f32 %v9740_v27, 1e-24  ;;  %v1288_v27 = vsel %vm1272_vm3, %v9931_v62, -inf }
 0x557   :  { %v9913_v58 = vadd.f32 %v1172_v54, %v9816_v28  ;;  %v2122_v54 = vmax.f32 %v9814_v53, 1e-24  ;;  %v9942_v53 = vpop.permute.xlu0 %1658 }
 0x558   :  { %v1312_v61 = vsel %vm1272_vm3, %v9910_v45, -inf  ;;  %8630 = vrsqrt.f32 %v1955_v63 }
 0x559   :  { %1313 = vmax.xlane.f32.xlu1 %v1312_v61  ;;  %v1309_v32 = vsel %vm1272_vm3, %v9913_v58, -inf  ;;  %v1285_v61 = vsel %vm1272_vm3, %v9922_v29, -inf  ;;  %8632 = vrsqrt.f32 %v2122_v54 }
 0x55a   :  { %1310 = vmax.xlane.f32.xlu0 %v1309_v32  ;;  %v9938_v32 = vpop.permute.xlu1 %2540  ;;  %8634 = vrsqrt.f32 %v2121_v39 }
 0x55b   :  { %12170 = vst [vmem:[#allocation53_spill] sm:$0xff] %v9938_v32  ;;  %v9946_v44 = vpop.permute.xlu0 %1754 }
 0x55d   :  { %1280 = vmax.xlane.f32.xlu1 %v1279_v18 }
 0x55e   :  { %1286 = vmax.xlane.f32.xlu0 %v1285_v61  ;;  %v9944_v37 = vpop.permute.xlu1 %2350 }
 0x55f   :  { %12171 = vst [vmem:[#allocation54_spill] sm:$0xff] %v9944_v37  ;;  %v9948_v23 = vpop.permute.xlu0 %8277 }
 0x561   :  { %1289 = vmax.xlane.f32.xlu1 %v1288_v27 }
 0x562   :  { %v8631_v18 = vpop.eup %8630  ;;  %v9950_v63 = vpop.permute.xlu1 %2447 }
 0x563   :  { %v8633_v22 = vpop.eup %8632  ;;  %12172 = vst [vmem:[#allocation55_spill] sm:$0xff] %v9950_v63  ;;  %v1988_v54 = vmul.f32 %v8631_v18, %v9717_v9  ;;  %v9955_v48 = vpop.permute.xlu0 %8287 }
 0x564   :  { %v8635_v26 = vpop.eup %8634  ;;  %v2154_v39 = vmul.f32 %v8633_v22, %v9305_v56  ;;  %12173 = vst [vmem:[#allocation56_spill] sm:$0xff] %v9955_v48 }
 0x565   :  { %v2153_v61 = vmul.f32 %v8635_v26, %v9295_v46  ;;  %v2004_v27 = vmul.f32 %v1988_v54, %v9329_v1 }
 0x566   :  { %v9958_v3 = vpop.permute.xlu1 %2352 }
 0x567   :  { %12174 = vst [vmem:[#allocation57_spill] sm:$0xff] %v9958_v3  ;;  %v8311_v32 = vpack.i.bf16 %v2154_v39, %v2153_v61  ;;  %v9962_v37 = vpop.permute.xlu0 %2255 }
 0x568   :  { %12175 = vst [vmem:[#allocation58_spill] sm:$0xff] %v9962_v37 }
 0x56a   :  { %v1278_v63 = vpop.xlane.xlu1 %1277 }
 0x56b   :  { %v9964_v40 = vpop.permute.xlu0 %8292  ;;  %v1322_v26 = vsub.f32 %v9843_v35, %v1278_v63  ;;  %v9981_v63 = vadd.f32 %v9885_v12, %v9830_v55 }
 0x56d   :  { %v1339_v48 = vmul.f32 1.442695, %v1322_v26 }
 0x56e   :  { %v1302_v18 = vpop.xlane.xlu1 %1301 }
 0x56f   :  { %v9967_v22 = vpop.permute.xlu0 %8297  ;;  %v1330_v54 = vsub.f32 %v9856_v13, %v1302_v18  ;;  %8636 = vpow2.f32 %v1339_v48 }
 0x570   :  { %12176 = vst [vmem:[#allocation59_spill] sm:$0xff] %v9967_v22 }
 0x571   :  { %v1355_v61 = vmul.f32 1.442695, %v1330_v54 }
 0x572   :  { %2542 = vrot.lane.b32.xlu1 %v2004_v27, %s9152_s24  ;;  %v1284_v1 = vpop.xlane.xlu1 %1283 }
 0x573   :  { %v9970_v3 = vpop.permute.xlu0 %2445  ;;  %8638 = vpow2.f32 %v1355_v61 }
 0x574   :  { %8312 = vrot.lane.b32.xlu0 %v8311_v32, %s9151_s23  ;;  %12177 = vst [vmem:[#allocation60_spill] sm:$0xff] %v9970_v3  ;;  %v1324_v32 = vsub.f32 %v9863_v33, %v1284_v1  ;;  %v9989_v1 = vadd.f32 %v9887_v15, %v9816_v28  ;;  %v1294_v33 = vsel %vm1272_vm3, %v9981_v63, -inf }
 0x576   :  { %v1343_v39 = vmul.f32 1.442695, %v1324_v32  ;;  %v10000_v32 = vadd.f32 %v9889_v24, %v9830_v55  ;;  %v1291_v15 = vsel %vm1272_vm3, %v9989_v1, -inf }
 0x577   :  { %v9973_v27 = vpop.permute.xlu0 %8302 }
 0x578   :  { %8640 = vpow2.f32 %v1343_v39 }
 0x579   :  { %v9975_v37 = vpop.eup %8636 }
 0x57a   :  { %v1372_v13 = vsel %vm1272_vm3, %v9975_v37, 0.0 }
 0x57b   :  { %v9977_v35 = vpop.permute.xlu0 %8307 }
 0x57c   :  { %12178 = vst [vmem:[#allocation61_spill] sm:$0xff] %v9977_v35 }
 0x57d   :  { %v9985_v48 = vpop.eup %8638 }
 0x57e   :  { %v1396_v26 = vsel %vm1272_vm3, %v9985_v48, 0.0 }
 0x57f   :  { %v1275_v18 = vpop.xlane.xlu0 %1274 }
 0x580   :  { %v1321_v54 = vsub.f32 %v9827_v20, %v1275_v18  ;;  %v1306_v20 = vsel %vm1272_vm3, %v10000_v32, -inf  ;;  %v10015_v18 = vadd.f32 %v9893_v2, %v9830_v55 }
 0x582   :  { %v9995_v12 = vpop.eup %8640 }
 0x583   :  { %v1299_v61 = vpop.xlane.xlu0 %1298  ;;  %v1378_v39 = vsel %vm1272_vm3, %v9995_v12, 0.0 }
 0x593   :  { %1373 = vadd.xlane.f32.xlu0 %v1372_v13  ;;  %v1337_v13 = vmul.f32 1.442695, %v1321_v54 }
 0x595   :  { %8642 = vpow2.f32 %v1337_v13 }
 0x596   :  { %1295 = vmax.xlane.f32.xlu1 %v1294_v33  ;;  %v1329_v33 = vsub.f32 %v9836_v16, %v1299_v61  ;;  %v10021_v16 = vadd.f32 %v9895_v36, %v9816_v28  ;;  %v12180_v36 = vmov 0.0  }
 0x597   :  { %1397 = vadd.xlane.f32.xlu0 %v1396_v26  ;;  %v10009_v26 = vadd.f32 %v9891_v25, %v9816_v28  ;;  %v1318_v25 = vsel %vm1272_vm3, %v10015_v18, -inf  ;;  %7639 = vmatprep.mubr.msk.bf16.mxu0 %vm9154_vm4, %v12180_v36 }
 0x598   :  { %v1353_v24 = vmul.f32 1.442695, %v1329_v33  ;;  %12179 = vst [vmem:[#allocation62_spill] sm:$0xff] %v10021_v16  ;;  %v1315_v54 = vsel %vm1272_vm3, %v10021_v16, -inf  ;;  %7645 = vmatprep.mubr.msk.bf16.mxu1 %vm9154_vm4, %v12180_v36 }
 0x59a   :  { %1292 = vmax.xlane.f32.xlu1 %v1291_v15  ;;  %v1303_v15 = vsel %vm1272_vm3, %v10009_v26, -inf  ;;  %8644 = vpow2.f32 %v1353_v24 }
 0x59b   :  { %1379 = vadd.xlane.f32.xlu0 %v1378_v39 }
 0x59e   :  { %1307 = vmax.xlane.f32.xlu1 %v1306_v20 }
 0x59f   :  { %v10027_v61 = vpop.eup %8642 }
 0x5a0   :  { %v1369_v55 = vsel %vm1272_vm3, %v10027_v61, 0.0 }
 0x5a2   :  { %1304 = vmax.xlane.f32.xlu1 %v1303_v15 }
 0x5a4   :  { %v10031_v2 = vpop.eup %8644 }
 0x5a5   :  { %v1393_v28 = vsel %vm1272_vm3, %v10031_v2, 0.0 }
 0x5a6   :  { %1319 = vmax.xlane.f32.xlu1 %v1318_v25 }
 0x5aa   :  { %1316 = vmax.xlane.f32.xlu1 %v1315_v54 }
 0x5ae   :  { %1370 = vadd.xlane.f32.xlu1 %v1369_v55 }
 0x5b2   :  { %1394 = vadd.xlane.f32.xlu1 %v1393_v28 }
 0x5e6   :  { %v1314_v39 = vpop.xlane.xlu1 %1313 }
 0x5e7   :  { %v1334_v13 = vsub.f32 %v9910_v45, %v1314_v39  ;;  %v1311_v33 = vpop.xlane.xlu0 %1310 }
 0x5e8   :  { %v1333_v24 = vsub.f32 %v9913_v58, %v1311_v33 }
 0x5e9   :  { %v1363_v20 = vmul.f32 1.442695, %v1334_v13 }
 0x5ea   :  { %v1281_v15 = vpop.xlane.xlu1 %1280  ;;  %v1361_v55 = vmul.f32 1.442695, %v1333_v24 }
 0x5eb   :  { %8646 = vpow2.f32 %v1363_v20  ;;  %v1323_v25 = vsub.f32 %v9917_v49, %v1281_v15  ;;  %v1287_v54 = vpop.xlane.xlu0 %1286 }
 0x5ec   :  { %v1325_v3 = vsub.f32 %v9922_v29, %v1287_v54 }
 0x5ed   :  { %v1341_v28 = vmul.f32 1.442695, %v1323_v25 }
 0x5ee   :  { %v1290_v22 = vpop.xlane.xlu1 %1289  ;;  %v1345_v35 = vmul.f32 1.442695, %v1325_v3 }
 0x5ef   :  { %8648 = vpow2.f32 %v1341_v28  ;;  %v1326_v16 = vsub.f32 %v9931_v62, %v1290_v22 }
 0x5f0   :  { %8650 = vpow2.f32 %v1361_v55 }
 0x5f1   :  { %v1347_v45 = vmul.f32 1.442695, %v1326_v16 }
 0x5f2   :  { %v10064_v33 = vpop.permute.xlu1 %2542 }
 0x5f3   :  { %8652 = vpow2.f32 %v1347_v45 }
 0x5f4   :  { %8654 = vpow2.f32 %v1345_v35 }
 0x5f5   :  { %v10044_v39 = vpop.eup %8646 }
 0x5f6   :  { %v1408_v58 = vsel %vm1272_vm3, %v10044_v39, 0.0 }
 0x5f7   :  { %1409 = vadd.xlane.f32.xlu0 %v1408_v58 }
 0x5f9   :  { %v10048_v49 = vpop.eup %8648 }
 0x5fa   :  { %v1375_v29 = vsel %vm1272_vm3, %v10048_v49, 0.0  ;;  %v10052_v13 = vpop.eup %8650 }
 0x5fb   :  { %1376 = vadd.xlane.f32.xlu1 %v1375_v29  ;;  %v1405_v22 = vsel %vm1272_vm3, %v10052_v13, 0.0 }
 0x5fd   :  { %v10054_v62 = vpop.eup %8652 }
 0x5fe   :  { %v1384_v3 = vsel %vm1272_vm3, %v10054_v62, 0.0  ;;  %v10060_v35 = vpop.eup %8654 }
 0x5ff   :  { %1385 = vadd.xlane.f32.xlu0 %v1384_v3  ;;  %1406 = vadd.xlane.f32.xlu1 %v1405_v22  ;;  %v1381_v16 = vsel %vm1272_vm3, %v10060_v35, 0.0  ;;  %v1957_v22 = vmax.f32 %v9807_v34, 1e-24  ;;  %v1956_v34 = vmax.f32 %v9744_v47, 1e-24 }
 0x603   :  { %1382 = vadd.xlane.f32.xlu1 %v1381_v16 }
 0x623   :  { %v1296_v20 = vpop.xlane.xlu1 %1295 }
 0x624   :  { %v1328_v24 = vsub.f32 %v9981_v63, %v1296_v20  ;;  %v10074_v20 = vpop.permute.xlu0 %8312 }
 0x625   :  { %12181 = vst [vmem:[#allocation63_spill] sm:$0xff] %v10074_v20 }
 0x626   :  { %v1351_v15 = vmul.f32 1.442695, %v1328_v24 }
 0x627   :  { %v1293_v25 = vpop.xlane.xlu1 %1292 }
 0x628   :  { %8656 = vpow2.f32 %v1351_v15  ;;  %v1327_v54 = vsub.f32 %v9989_v1, %v1293_v25  ;;  %v1374_v15 = vpop.xlane.xlu0 %1373 }
 0x62a   :  { %v1349_v55 = vmul.f32 1.442695, %v1327_v54 }
 0x62b   :  { %v1308_v28 = vpop.xlane.xlu1 %1307 }
 0x62c   :  { %8658 = vpow2.f32 %v1349_v55  ;;  %v1332_v45 = vsub.f32 %v10000_v32, %v1308_v28 }
 0x62e   :  { %v1359_v58 = vmul.f32 1.442695, %v1332_v45 }
 0x62f   :  { %v1305_v29 = vpop.xlane.xlu1 %1304 }
 0x630   :  { %8660 = vpow2.f32 %v1359_v58 }
 0x631   :  { %8662 = vrsqrt.f32 %v1957_v22 }
 0x632   :  { %v10069_v3 = vpop.eup %8656  ;;  %8664 = vrcp.f32 %v1374_v15 }
 0x633   :  { %v1320_v16 = vpop.xlane.xlu1 %1319  ;;  %v1390_v63 = vsel %vm1272_vm3, %v10069_v3, 0.0 }
 0x634   :  { %1391 = vadd.xlane.f32.xlu0 %v1390_v63 }
 0x636   :  { %v10076_v1 = vpop.eup %8658 }
 0x637   :  { %v10078_v24 = vpop.xlane.xlu1 %1316  ;;  %v1387_v32 = vsel %vm1272_vm3, %v10076_v1, 0.0 }
 0x638   :  { %1388 = vadd.xlane.f32.xlu1 %v1387_v32 }
 0x63a   :  { %v10082_v25 = vpop.eup %8660 }
 0x63b   :  { %v1371_v54 = vpop.xlane.xlu1 %1370  ;;  %v1402_v55 = vsel %vm1272_vm3, %v10082_v25, 0.0  ;;  %v8663_v28 = vpop.eup %8662 }
 0x63c   :  { %1403 = vadd.xlane.f32.xlu0 %v1402_v55  ;;  %8666 = vrcp.f32 %v1371_v54  ;;  %v1990_v45 = vmul.f32 %v8663_v28, %v9717_v9  ;;  %v8665_v58 = vpop.eup %8664  ;;  %v1959_v28 = vmax.f32 %v9832_v42, 1e-24  ;;  %v1960_v42 = vmax.f32 %v9871_v43, 1e-24 }
 0x63d   :  { %8668 = vrsqrt.f32 %v1956_v34  ;;  %v1434_v32 = vmul.f32 %v8665_v58, %v9975_v37  ;;  %v1331_v37 = vsub.f32 %v10009_v26, %v1305_v29  ;;  %v1958_v26 = vmax.f32 %v9761_v52, 1e-24 }
 0x63e   :  { %v2006_v63 = vmul.f32 %v1990_v45, %v9341_v6  ;;  %v1961_v45 = vmax.f32 %v9850_v11, 1e-24 }
 0x646   :  { %v8667_v22 = vpop.eup %8666 }
 0x647   :  { %v1433_v20 = vmul.f32 %v8667_v22, %v10027_v61  ;;  %v8669_v47 = vpop.eup %8668  ;;  %v1357_v61 = vmul.f32 1.442695, %v1331_v37  ;;  %v1395_v37 = vpop.xlane.xlu1 %1394 }
 0x648   :  { %v1989_v54 = vmul.f32 %v8669_v47, %v9717_v9 }
 0x649   :  { %2637 = vrot.lane.b32.xlu1 %v2006_v63, %s9152_s24  ;;  %v1449_v15 = vpack.c.bf16 %v1434_v32, %v1433_v20  ;;  %v1336_v20 = vsub.f32 %v10015_v18, %v1320_v16  ;;  %8670 = vpow2.f32 %v1357_v61 }
 0x64a   :  { %v2005_v34 = vmul.f32 %v1989_v54, %v9265_v30 }
 0x64b   :  { %7640 = vmatmul.mubr.msk.bf16.vlgmr.msra.gmra.mrb[12].mxu0 %vm1272_vm3, %v1449_v15  ;;  %v1367_v55 = vmul.f32 1.442695, %v1336_v20  ;;  %v1398_v15 = vpop.xlane.xlu0 %1397 }
 0x64c   :  { %7650 = vmatpush3.bf16.msra.mxu0 %v9874_v57  ;;  %7651 = vmatprep.mubr.msk.bf16.mxu0 %vm9154_vm4, %v12180_v36 }
 0x64d   :  { %7661 = vmatprep.subr.bf16.mxu0 %v12180_v36  ;;  %8672 = vpow2.f32 %v1367_v55 }
 0x64e   :  { %8674 = vrsqrt.f32 %v1959_v28 }
 0x64f   :  { %8676 = vrsqrt.f32 %v1961_v45  ;;  %v1380_v43 = vpop.xlane.xlu0 %1379 }
 0x650   :  { %8678 = vrsqrt.f32 %v1958_v26 }
 0x651   :  { %8680 = vrsqrt.f32 %v1960_v42 }
 0x652   :  { %2635 = vrot.lane.b32.xlu0 %v2005_v34, %s9152_s24  ;;  %8682 = vrcp.f32 %v1380_v43 }
 0x653   :  { %v10103_v57 = vpop.eup %8670 }
 0x654   :  { %v1399_v58 = vsel %vm1272_vm3, %v10103_v57, 0.0 }
 0x657   :  { %v10108_v22 = vpop.eup %8672 }
 0x658   :  { %v1414_v18 = vsel %vm1272_vm3, %v10108_v22, 0.0  ;;  %v8675_v29 = vpop.eup %8674 }
 0x659   :  { %v1992_v11 = vmul.f32 %v8675_v29, %v9717_v9  ;;  %v8677_v16 = vpop.eup %8676 }
 0x65a   :  { %v1994_v32 = vmul.f32 %v8677_v16, %v9717_v9  ;;  %v8679_v47 = vpop.eup %8678 }
 0x65b   :  { %v2008_v63 = vmul.f32 %v1992_v11, %v9309_v59  ;;  %v1991_v54 = vmul.f32 %v8679_v47, %v9717_v9  ;;  %v8681_v34 = vpop.eup %8680 }
 0x65c   :  { %v2010_v52 = vmul.f32 %v1994_v32, %v9305_v56  ;;  %v1993_v20 = vmul.f32 %v8681_v34, %v9717_v9 }
 0x65d   :  { %v2007_v61 = vmul.f32 %v1991_v54, %v9299_v50 }
 0x65e   :  { %v2009_v45 = vmul.f32 %v1993_v20, %v9295_v46  ;;  %v8294_v20 = vunpack.i.l.bf16 %v9964_v40  ;;  %v12229_v46 = vld [vmem:[#allocation60_spill] sm:$0xff] }
 0x66d   :  { %1400 = vadd.xlane.f32.xlu1 %v1399_v58 }
 0x671   :  { %1415 = vadd.xlane.f32.xlu0 %v1414_v18  ;;  %v8683_v18 = vpop.eup %8682 }
 0x672   :  { %v1436_v29 = vmul.f32 %v8683_v18, %v9995_v12  ;;  %v12187_v18 = vld [vmem:[#allocation57_spill] sm:$0xff] }
 0x67e   :  { %2732 = vrot.lane.b32.xlu1 %v2008_v63, %s9152_s24 }
 0x682   :  { %2827 = vrot.lane.b32.xlu1 %v2010_v52, %s9152_s24  ;;  %v8279_v52 = vunpack.i.l.bf16 %v9948_v23 }
 0x684   :  { %v1410_v55 = vpop.xlane.xlu0 %1409 }
 0x686   :  { %3642 = vrot.lane.b32.xlu1 %v9315_v60, %s9155_s11 }
 0x687   :  { %2730 = vrot.lane.b32.xlu0 %v2007_v61, %s9152_s24 }
 0x688   :  { %v1377_v28 = vpop.xlane.xlu1 %1376 }
 0x689   :  { %8684 = vrcp.f32 %v1377_v28  ;;  %v12184_v28 = vld [vmem:[#allocation54_spill] sm:$0xff] }
 0x68a   :  { %3646 = vrot.lane.b32.xlu1 %v9327_v0, %s9155_s11 }
 0x68b   :  { %2825 = vrot.lane.b32.xlu0 %v2009_v45, %s9152_s24  ;;  %v12185_v45 = vld [vmem:[#allocation18_spill] sm:$0xff] }
 0x68c   :  { %v1386_v58 = vpop.xlane.xlu0 %1385  ;;  %v1407_v26 = vpop.xlane.xlu1 %1406 }
 0x68d   :  { %8686 = vrcp.f32 %v1386_v58 }
 0x68e   :  { %3481 = vrot.lane.b32.xlu1 %v9315_v60, %s9156_s27 }
 0x68f   :  { %3640 = vrot.lane.b32.xlu0 %v9285_v41, %s9155_s11 }
 0x690   :  { %v1383_v9 = vpop.xlane.xlu1 %1382 }
 0x691   :  { %8688 = vrcp.f32 %v1383_v9 }
 0x692   :  { %3485 = vrot.lane.b32.xlu1 %v9327_v0, %s9156_s27  ;;  %8690 = vrcp.f32 %v1395_v37  ;;  %v8305_v37 = vunpack.i.h.bf16 %v9973_v27 }
 0x693   :  { %v8685_v42 = vpop.eup %8684  ;;  %3644 = vrot.lane.b32.xlu0 %v9275_v38, %s9155_s11  ;;  %8692 = vrcp.f32 %v1398_v15 }
 0x694   :  { %v1435_v11 = vmul.f32 %v8685_v42, %v10048_v49  ;;  %8694 = vrcp.f32 %v1407_v26 }
 0x695   :  { %8696 = vrcp.f32 %v1410_v55  ;;  %v12183_v55 = vld [vmem:[#allocation51_spill] sm:$0xff] }
 0x696   :  { %3654 = vrot.lane.b32.xlu1 %v9389_v17, %s9155_s11  ;;  %v1450_v16 = vpack.c.bf16 %v1436_v29, %v1435_v11  ;;  %v12188_v29 = vld [vmem:[#allocation53_spill] sm:$0xff] }
 0x697   :  { %3479 = vrot.lane.b32.xlu0 %v9285_v41, %s9156_s27  ;;  %v8687_v63 = vpop.eup %8686 }
 0x698   :  { %7646 = vmatmul.mubr.msk.bf16.vlgmr.msra.gmra.mrb[20].mxu1 %vm1272_vm3, %v1450_v16  ;;  %v1438_v49 = vmul.f32 %v8687_v63, %v10054_v62  ;;  %v12189_v16 = vld [vmem:[#allocation37_spill] sm:$0xff] }
 0x699   :  { %7656 = vmatpush3.bf16.msra.mxu1 %v9897_v14  ;;  %7657 = vmatprep.mubr.msk.bf16.mxu1 %vm9154_vm4, %v12180_v36 }
 0x69a   :  { %3489 = vrot.lane.b32.xlu1 %v9395_v19, %s9156_s27  ;;  %7667 = vmatprep.subr.bf16.mxu1 %v12180_v36 }
 0x69b   :  { %v8689_v12 = vpop.eup %8688  ;;  %3483 = vrot.lane.b32.xlu0 %v9275_v38, %s9156_s27 }
 0x69c   :  { %v1437_v32 = vmul.f32 %v8689_v12, %v10060_v35  ;;  %v8691_v47 = vpop.eup %8690  ;;  %v8280_v35 = vunpack.i.h.bf16 %v9948_v23  ;;  %v12190_v12 = vld [vmem:[#allocation35_spill] sm:$0xff] }
 0x69d   :  { %v8693_v15 = vpop.eup %8692  ;;  %v1441_v62 = vmul.f32 %v8691_v47, %v10031_v2  ;;  %v12191_v47 = vld [vmem:[#allocation48_spill] sm:$0xff] }
 0x69e   :  { %3493 = vrot.lane.b32.xlu1 %v9389_v17, %s9156_s27  ;;  %v1451_v14 = vpack.c.bf16 %v1438_v49, %v1437_v32  ;;  %v1442_v54 = vmul.f32 %v8693_v15, %v9985_v48  ;;  %v8695_v34 = vpop.eup %8694  ;;  %v8065_v2 = vpack.c.bf16 %v8280_v35, %v8279_v52 }
 0x69f   :  { %3648 = vrot.lane.b32.xlu0 %v9365_v10, %s9155_s11  ;;  %v8697_v43 = vpop.eup %8696  ;;  %v1445_v23 = vmul.f32 %v8695_v34, %v10052_v13 }
 0x6a0   :  { %7652 = vmatmul.mubr.msk.bf16.vlgmr.msra.gmra.mrb[16].mxu0 %vm1272_vm3, %v1451_v14  ;;  %v1446_v48 = vmul.f32 %v8697_v43, %v10044_v39  ;;  %v8295_v39 = vunpack.i.h.bf16 %v9964_v40  ;;  %v12186_v40 = vld [vmem:[#allocation61_spill] sm:$0xff]  ;;  %v12192_v43 = vld [vmem:[#allocation50_spill] sm:$0xff] }
 0x6a1   :  { %7662 = vmatpush3.bf16.msra.mxu0 %v9942_v53  ;;  %7663 = vmatprep.mubr.msk.bf16.mxu0 %vm9154_vm4, %v12180_v36  ;;  %v1453_v53 = vpack.c.bf16 %v1442_v54, %v1441_v62  ;;  %v8310_v58 = vunpack.i.h.bf16 %v12186_v40  ;;  %v8309_v26 = vunpack.i.l.bf16 %v12186_v40 }
 0x6a2   :  { %3662 = vrot.lane.b32.xlu1 %v9347_v7, %s9155_s11  ;;  %7673 = vmatprep.subr.bf16.mxu0 %v12180_v36  ;;  %v1455_v61 = vpack.c.bf16 %v1446_v48, %v1445_v23  ;;  %v8285_v23 = vunpack.i.h.bf16 %v12192_v43  ;;  %v8284_v48 = vunpack.i.l.bf16 %v12192_v43 }
 0x6a3   :  { %3650 = vrot.lane.b32.xlu0 %v9395_v19, %s9155_s11  ;;  %v8101_v9 = vpack.c.bf16 %v8310_v58, %v8309_v26 }
 0x6a6   :  { %3497 = vrot.lane.b32.xlu1 %v9337_v4, %s9156_s27 }
 0x6a7   :  { %3652 = vrot.lane.b32.xlu0 %v9353_v8, %s9155_s11 }
 0x6a8   :  { %7664 = vmatmul.mubr.msk.bf16.vlgmr.msra.gmra.mrb[20].mxu0 %vm1272_vm3, %v1453_v53 }
 0x6a9   :  { %7674 = vmatpush3.bf16.msra.mxu0 %v9946_v44  ;;  %7675 = vmatprep.mubr.msk.bf16.mxu0 %vm9154_vm4, %v12180_v36  ;;  %v8304_v44 = vunpack.i.l.bf16 %v9973_v27  ;;  %v12182_v27 = vld [vmem:[#allocation22_spill] sm:$0xff] }
 0x6aa   :  { %8067 = vmatprep.subr.msk.bf16.mxu0 %vm9575_vm2, %v8065_v2  ;;  %3501 = vrot.lane.b32.xlu1 %v9347_v7, %s9156_s27 }
 0x6ab   :  { %3487 = vrot.lane.b32.xlu0 %v9365_v10, %s9156_s27  ;;  %v8077_v13 = vpack.c.bf16 %v8305_v37, %v8304_v44 }
 0x6ae   :  { %3670 = vrot.lane.b32.xlu1 %v9413_v31, %s9155_s11 }
 0x6af   :  { %3491 = vrot.lane.b32.xlu0 %v9353_v8, %s9156_s27 }
 0x6b0   :  { %7676 = vmatmul.mubr.msk.bf16.vlgmr.msra.gmra.mrb[24].mxu0 %vm1272_vm3, %v1455_v61 }
 0x6b1   :  { %7689 = vmatprep.mubr.msk.f32.mxu0 %vm268_vm1, %v9905_v5  ;;  %v8089_v5 = vpack.c.bf16 %v8295_v39, %v8294_v20 }
 0x6b2   :  { %8070 = vmatpush3.bf16.xpose.msk.msra.mxu0 %vm9575_vm2, %v8065_v2  ;;  %3505 = vrot.lane.b32.xlu1 %v9401_v21, %s9156_s27 }
 0x6b3   :  { %8079 = vmatprep.subr.msk.bf16.mxu0 %vm9575_vm2, %v8077_v13  ;;  %3656 = vrot.lane.b32.xlu0 %v12182_v27, %s9155_s11 }
 0x6b7   :  { %3658 = vrot.lane.b32.xlu0 %v9337_v4, %s9155_s11 }
 0x6b9   :  { %7690 = vmatmul.mubr.msk.f32.vlgmr.msra.gmra.mrb[28].mxu0 %vm268_vm1, %v12183_v55 }
 0x6ba   :  { %8082 = vmatpush3.bf16.xpose.msk.msra.mxu0 %vm9575_vm2, %v8077_v13  ;;  %7703 = vmatprep.mubr.msk.f32.mxu0 %vm268_vm1, %v12184_v28  ;;  %v12193_v28 = vld [vmem:[#allocation49_spill] sm:$0xff] }
 0x6bb   :  { %8091 = vmatprep.subr.msk.bf16.mxu0 %vm9575_vm2, %v8089_v5  ;;  %3660 = vrot.lane.b32.xlu0 %v12185_v45, %s9155_s11 }
 0x6bf   :  { %3495 = vrot.lane.b32.xlu0 %v12182_v27, %s9156_s27 }
 0x6c1   :  { %7704 = vmatmul.mubr.msk.f32.vlgmr.msra.gmra.mrb[30].mxu0 %vm268_vm1, %v12187_v18  ;;  %v1392_v42 = vpop.xlane.xlu0 %1391 }
 0x6c2   :  { %8094 = vmatpush3.bf16.xpose.msk.msra.mxu0 %vm9575_vm2, %v8089_v5  ;;  %7717 = vmatprep.mubr.msk.f32.mxu0 %vm268_vm1, %v12188_v29  ;;  %8698 = vrcp.f32 %v1392_v42  ;;  %v10276_v5 = vpack.c.bf16 %v8285_v23, %v8284_v48 }
 0x6c3   :  { %8103 = vmatprep.subr.msk.bf16.mxu0 %vm9575_vm2, %v8101_v9  ;;  %3499 = vrot.lane.b32.xlu0 %v12185_v45, %s9156_s27 }
 0x6c5   :  { %v1389_v11 = vpop.xlane.xlu1 %1388 }
 0x6c6   :  { %8700 = vrcp.f32 %v1389_v11 }
 0x6c7   :  { %3664 = vrot.lane.b32.xlu0 %v12189_v16, %s9155_s11 }
 0x6c9   :  { %7718 = vmatmul.mubr.msk.f32.vlgmr.msra.gmra.mrb[32].mxu0 %vm268_vm1, %v10064_v33 }
 0x6ca   :  { %8106 = vmatpush3.bf16.xpose.msk.msra.mxu0 %vm9575_vm2, %v8101_v9 }
 0x6cb   :  { %3666 = vrot.lane.b32.xlu0 %v9401_v21, %s9155_s11  ;;  %7741 = vmatprep.subr.bf16.mxu0 %v12180_v36 }
 0x6cc   :  { %v8699_v63 = vpop.eup %8698 }
 0x6cd   :  { %v1440_v32 = vmul.f32 %v8699_v63, %v10069_v3  ;;  %v1404_v3 = vpop.xlane.xlu0 %1403 }
 0x6ce   :  { %8702 = vrcp.f32 %v1404_v3 }
 0x6cf   :  { %3668 = vrot.lane.b32.xlu0 %v12190_v12, %s9155_s11 }
 0x6d0   :  { %v8701_v49 = vpop.eup %8700 }
 0x6d1   :  { %v1439_v14 = vmul.f32 %v8701_v49, %v10076_v1  ;;  %v10257_v1 = vpop.permute.xlu1 %2637  ;;  %v10259_v15 = vpop.permute.xlu0 %2635 }
 0x6d3   :  { %3503 = vrot.lane.b32.xlu0 %v12189_v16, %s9156_s27  ;;  %v1452_v33 = vpack.c.bf16 %v1440_v32, %v1439_v14 }
 0x6d5   :  { %7658 = vmatmul.mubr.msk.bf16.vlgmr.msra.gmra.mrb[24].mxu1 %vm1272_vm3, %v1452_v33 }
 0x6d6   :  { %7668 = vmatpush3.bf16.msra.mxu1 %v12191_v47  ;;  %7669 = vmatprep.mubr.msk.bf16.mxu1 %vm9154_vm4, %v12180_v36 }
 0x6d7   :  { %3507 = vrot.lane.b32.xlu0 %v12190_v12, %s9156_s27  ;;  %7679 = vmatprep.subr.bf16.mxu1 %v12180_v36 }
 0x6d8   :  { %v8703_v34 = vpop.eup %8702 }
 0x6d9   :  { %v1444_v37 = vmul.f32 %v8703_v34, %v10082_v25 }
 0x6db   :  { %3509 = vrot.lane.b32.xlu0 %v9413_v31, %s9156_s27 }
 0x6fa   :  { %v1401_v62 = vpop.xlane.xlu1 %1400 }
 0x6fb   :  { %8704 = vrcp.f32 %v1401_v62 }
 0x6fe   :  { %v10261_v35 = vpop.xlane.xlu0 %1415  ;;  %v2733_v52 = vpop.permute.xlu1 %2732 }
 0x702   :  { %v2731_v54 = vpop.permute.xlu0 %2730  ;;  %v10263_v53 = vpop.permute.xlu1 %2827 }
 0x703   :  { %7731 = vmatprep.mubr.msk.f32.mxu0 %vm268_vm1, %v2731_v54 }
 0x704   :  { %7732 = vmatmul.mubr.msk.f32.vlgmr.msra.gmra.mrb[34].mxu0 %vm268_vm1, %v2733_v52 }
 0x705   :  { %v8705_v2 = vpop.eup %8704  ;;  %7743 = vmatprep.mubr.msk.bf16.mxu0 %vm9154_vm4, %v12180_v36 }
 0x706   :  { %v1443_v44 = vmul.f32 %v8705_v2, %v10103_v57  ;;  %v10273_v61 = vpop.permute.xlu0 %2825  ;;  %v3643_v13 = vpop.permute.xlu1 %3642 }
 0x707   :  { %v3691_v39 = vsel %vm268_vm1, %v3643_v13, 0.0 }
 0x708   :  { %3692 = vadd.xlane.f32.xlu1 %v3691_v39  ;;  %v1454_v20 = vpack.c.bf16 %v1444_v37, %v1443_v44  ;;  %v12196_v44 = vld [vmem:[#allocation62_spill] sm:$0xff] }
 0x709   :  { %v1335_v13 = vsub.f32 %v12196_v44, %v10078_v24 }
 0x70a   :  { %v3641_v55 = vpop.permute.xlu0 %3640  ;;  %7670 = vmatmul.mubr.msk.bf16.vlgmr.msra.gmra.mrb[28].mxu1 %vm1272_vm3, %v1454_v20  ;;  %v3647_v25 = vpop.permute.xlu1 %3646 }
 0x70b   :  { %7680 = vmatpush3.bf16.msra.mxu1 %v12193_v28  ;;  %v3688_v40 = vsel %vm268_vm1, %v3641_v55, 0.0  ;;  %7681 = vmatprep.mubr.msk.bf16.mxu1 %vm9154_vm4, %v12180_v36  ;;  %v3697_v42 = vsel %vm268_vm1, %v3647_v25, 0.0  ;;  %v1365_v28 = vmul.f32 1.442695, %v1335_v13 }
 0x70c   :  { %8073 = vmatprep.subr.msk.bf16.mxu1 %vm9575_vm2, %v10276_v5  ;;  %3689 = vadd.xlane.f32.xlu0 %v3688_v40 }
 0x70d   :  { %8706 = vpow2.f32 %v1365_v28 }
 0x70e   :  { %v3645_v57 = vpop.permute.xlu0 %3644  ;;  %v3482_v26 = vpop.permute.xlu1 %3481 }
 0x70f   :  { %v3694_v58 = vsel %vm268_vm1, %v3645_v57, 0.0  ;;  %v3530_v63 = vsel %vm268_vm1, %v3482_v26, 0.0 }
 0x710   :  { %3695 = vadd.xlane.f32.xlu0 %v3694_v58 }
 0x712   :  { %v3480_v9 = vpop.permute.xlu0 %3479  ;;  %v3486_v49 = vpop.permute.xlu1 %3485 }
 0x713   :  { %v3527_v18 = vsel %vm268_vm1, %v3480_v9, 0.0  ;;  %v3536_v52 = vsel %vm268_vm1, %v3486_v49, 0.0 }
 0x714   :  { %3528 = vadd.xlane.f32.xlu1 %v3527_v18  ;;  %3698 = vadd.xlane.f32.xlu0 %v3697_v42 }
 0x716   :  { %v3484_v29 = vpop.permute.xlu0 %3483  ;;  %v3655_v33 = vpop.permute.xlu1 %3654 }
 0x717   :  { %v3533_v11 = vsel %vm268_vm1, %v3484_v29, 0.0  ;;  %v3709_v48 = vsel %vm268_vm1, %v3655_v33, 0.0  ;;  %v10310_v49 = vpop.eup %8706 }
 0x718   :  { %3534 = vadd.xlane.f32.xlu1 %v3533_v11  ;;  %3531 = vadd.xlane.f32.xlu0 %v3530_v63  ;;  %v1411_v33 = vsel %vm1272_vm3, %v10310_v49, 0.0 }
 0x71a   :  { %v3649_v32 = vpop.permute.xlu0 %3648  ;;  %v3490_v37 = vpop.permute.xlu1 %3489 }
 0x71b   :  { %v3700_v14 = vsel %vm268_vm1, %v3649_v32, 0.0  ;;  %v3542_v55 = vsel %vm268_vm1, %v3490_v37, 0.0 }
 0x71c   :  { %3701 = vadd.xlane.f32.xlu0 %v3700_v14 }
 0x71e   :  { %v3651_v47 = vpop.permute.xlu0 %3650  ;;  %v10292_v3 = vpop.f32.mrb[12].mxu0 }
 0x71f   :  { %12194 = vst [vmem:[#allocation51_spill] sm:$0xff] %v10292_v3  ;;  %v3703_v62 = vsel %vm268_vm1, %v3651_v47, 0.0  ;;  %v7641_v54 = vpop.f32.mrb[13].mxu0  ;;  %v3494_v57 = vpop.permute.xlu1 %3493 }
 0x720   :  { %3704 = vadd.xlane.f32.xlu1 %v3703_v62  ;;  %3537 = vadd.xlane.f32.xlu0 %v3536_v52  ;;  %v10296_v34 = vpop.f32.mrb[14].mxu0  ;;  %v3548_v42 = vsel %vm268_vm1, %v3494_v57, 0.0 }
 0x721   :  { %12195 = vst [vmem:[#allocation54_spill] sm:$0xff] %v10296_v34  ;;  %v7642_v2 = vpop.f32.mrb[15].mxu0 }
 0x722   :  { %v3653_v43 = vpop.permute.xlu0 %3652 }
 0x723   :  { %v3706_v23 = vsel %vm268_vm1, %v3653_v43, 0.0  ;;  %v3663_v9 = vpop.permute.xlu1 %3662 }
 0x724   :  { %3707 = vadd.xlane.f32.xlu1 %v3706_v23  ;;  %3710 = vadd.xlane.f32.xlu0 %v3709_v48  ;;  %v3721_v63 = vsel %vm268_vm1, %v3663_v9, 0.0 }
 0x726   :  { %v3488_v39 = vpop.permute.xlu0 %3487 }
 0x727   :  { %v3539_v20 = vsel %vm268_vm1, %v3488_v39, 0.0  ;;  %v3498_v32 = vpop.permute.xlu1 %3497 }
 0x728   :  { %3540 = vadd.xlane.f32.xlu1 %v3539_v20  ;;  %3543 = vadd.xlane.f32.xlu0 %v3542_v55  ;;  %v3554_v47 = vsel %vm268_vm1, %v3498_v32, 0.0  ;;  %v12201_v32 = vld [vmem:[#allocation45_spill] sm:$0xff] }
 0x72a   :  { %v3492_v40 = vpop.permute.xlu0 %3491 }
 0x72b   :  { %v3545_v25 = vsel %vm268_vm1, %v3492_v40, 0.0  ;;  %v3502_v54 = vpop.permute.xlu1 %3501 }
 0x72c   :  { %3546 = vadd.xlane.f32.xlu1 %v3545_v25  ;;  %v3560_v13 = vsel %vm268_vm1, %v3502_v54, 0.0 }
 0x72e   :  { %v3657_v58 = vpop.permute.xlu0 %3656 }
 0x72f   :  { %v3712_v26 = vsel %vm268_vm1, %v3657_v58, 0.0  ;;  %v3671_v48 = vpop.permute.xlu1 %3670 }
 0x730   :  { %3713 = vadd.xlane.f32.xlu0 %v3712_v26  ;;  %v3733_v55 = vsel %vm268_vm1, %v3671_v48, 0.0  ;;  %v12208_v48 = vld [vmem:[#allocation42_spill] sm:$0xff] }
 0x732   :  { %v3659_v24 = vpop.permute.xlu0 %3658 }
 0x733   :  { %v3715_v18 = vsel %vm268_vm1, %v3659_v24, 0.0  ;;  %v3506_v28 = vpop.permute.xlu1 %3505 }
 0x734   :  { %3716 = vadd.xlane.f32.xlu1 %v3715_v18  ;;  %3549 = vadd.xlane.f32.xlu0 %v3548_v42  ;;  %v3566_v57 = vsel %vm268_vm1, %v3506_v28, 0.0  ;;  %v12197_v18 = vld [vmem:[#allocation43_spill] sm:$0xff]  ;;  %v12198_v42 = vld [vmem:[#allocation44_spill] sm:$0xff] }
 0x736   :  { %v3661_v29 = vpop.permute.xlu0 %3660 }
 0x737   :  { %v3718_v11 = vsel %vm268_vm1, %v3661_v29, 0.0 }
 0x738   :  { %3719 = vadd.xlane.f32.xlu1 %v3718_v11  ;;  %3722 = vadd.xlane.f32.xlu0 %v3721_v63 }
 0x73a   :  { %v3496_v14 = vpop.permute.xlu0 %3495 }
 0x73b   :  { %v3551_v52 = vsel %vm268_vm1, %v3496_v14, 0.0 }
 0x73c   :  { %1412 = vadd.xlane.f32.xlu1 %v1411_v33  ;;  %3555 = vadd.xlane.f32.xlu0 %v3554_v47  ;;  %v12202_v33 = vld [vmem:[#allocation40_spill] sm:$0xff]  ;;  %v12203_v47 = vld [vmem:[#allocation46_spill] sm:$0xff] }
 0x73e   :  { %v3500_v62 = vpop.permute.xlu0 %3499 }
 0x73f   :  { %v3557_v43 = vsel %vm268_vm1, %v3500_v62, 0.0  ;;  %v12204_v62 = vld [vmem:[#allocation41_spill] sm:$0xff] }
 0x740   :  { %3552 = vadd.xlane.f32.xlu1 %v3551_v52 }
 0x742   :  { %v3665_v2 = vpop.permute.xlu0 %3664 }
 0x743   :  { %v3724_v23 = vsel %vm268_vm1, %v3665_v2, 0.0 }
 0x744   :  { %3558 = vadd.xlane.f32.xlu1 %v3557_v43  ;;  %3725 = vadd.xlane.f32.xlu0 %v3724_v23  ;;  %v12207_v43 = vld [vmem:[#allocation47_spill] sm:$0xff] }
 0x746   :  { %v3667_v37 = vpop.permute.xlu0 %3666 }
 0x747   :  { %v3727_v44 = vsel %vm268_vm1, %v3667_v37, 0.0 }
 0x748   :  { %3728 = vadd.xlane.f32.xlu1 %v3727_v44  ;;  %3561 = vadd.xlane.f32.xlu0 %v3560_v13 }
 0x74a   :  { %v3669_v39 = vpop.permute.xlu0 %3668 }
 0x74b   :  { %v3730_v20 = vsel %vm268_vm1, %v3669_v39, 0.0 }
 0x74c   :  { %3731 = vadd.xlane.f32.xlu1 %v3730_v20  ;;  %3734 = vadd.xlane.f32.xlu0 %v3733_v55 }
 0x74e   :  { %v3504_v40 = vpop.permute.xlu0 %3503 }
 0x74f   :  { %v3563_v25 = vsel %vm268_vm1, %v3504_v40, 0.0 }
 0x750   :  { %3564 = vadd.xlane.f32.xlu1 %v3563_v25  ;;  %3567 = vadd.xlane.f32.xlu0 %v3566_v57 }
 0x752   :  { %v3508_v58 = vpop.permute.xlu0 %3507 }
 0x753   :  { %v3569_v26 = vsel %vm268_vm1, %v3508_v58, 0.0 }
 0x754   :  { %3570 = vadd.xlane.f32.xlu1 %v3569_v26 }
 0x756   :  { %v3510_v9 = vpop.permute.xlu0 %3509 }
 0x757   :  { %v3572_v24 = vsel %vm268_vm1, %v3510_v9, 0.0 }
 0x758   :  { %3573 = vadd.xlane.f32.xlu0 %v3572_v24 }
 0x765   :  { %3102 = vrot.lane.b32.xlu1 %v12197_v18, %s9157_s28 }
 0x769   :  { %3196 = vrot.lane.b32.xlu1 %v12198_v42, %s9157_s28 }
 0x76b   :  { %v10328_v29 = vpop.f32.mrb[20].mxu1 }
 0x76c   :  { %12199 = vst [vmem:[#allocation61_spill] sm:$0xff] %v10328_v29  ;;  %v7647_v11 = vpop.f32.mrb[21].mxu1 }
 0x76d   :  { %v10330_v63 = vpop.f32.mrb[22].mxu1  ;;  %3243 = vrot.lane.b32.xlu1 %v12201_v32, %s9157_s28 }
 0x76e   :  { %12200 = vst [vmem:[#allocation57_spill] sm:$0xff] %v10330_v63  ;;  %v7648_v14 = vpop.f32.mrb[23].mxu1  ;;  %3149 = vrot.lane.b32.xlu0 %v12202_v33, %s9157_s28 }
 0x771   :  { %3337 = vrot.lane.b32.xlu1 %v12203_v47, %s9157_s28 }
 0x772   :  { %3290 = vrot.lane.b32.xlu0 %v12204_v62, %s9157_s28 }
 0x773   :  { %v10336_v52 = vpop.f32.mrb[16].mxu0 }
 0x774   :  { %12205 = vst [vmem:[#allocation53_spill] sm:$0xff] %v10336_v52  ;;  %v7653_v54 = vpop.f32.mrb[17].mxu0 }
 0x775   :  { %v10338_v2 = vpop.f32.mrb[18].mxu0  ;;  %3431 = vrot.lane.b32.xlu1 %v12207_v43, %s9157_s28 }
 0x776   :  { %12206 = vst [vmem:[#allocation48_spill] sm:$0xff] %v10338_v2  ;;  %v7654_v23 = vpop.f32.mrb[19].mxu0  ;;  %3384 = vrot.lane.b32.xlu0 %v12208_v48, %s9157_s28  ;;  %v12218_v48 = vld [vmem:[#allocation32_spill] sm:$0xff] }
 0x77b   :  { %v10342_v37 = vpop.f32.mrb[20].mxu0 }
 0x77c   :  { %12209 = vst [vmem:[#allocation50_spill] sm:$0xff] %v10342_v37  ;;  %v7665_v44 = vpop.f32.mrb[21].mxu0 }
 0x77d   :  { %v10344_v13 = vpop.f32.mrb[22].mxu0 }
 0x77e   :  { %12210 = vst [vmem:[#allocation49_spill] sm:$0xff] %v10344_v13  ;;  %v7666_v39 = vpop.f32.mrb[23].mxu0 }
 0x783   :  { %v10346_v20 = vpop.f32.mrb[24].mxu0 }
 0x784   :  { %12211 = vst [vmem:[#allocation62_spill] sm:$0xff] %v10346_v20  ;;  %v7677_v55 = vpop.f32.mrb[25].mxu0 }
 0x785   :  { %v10348_v28 = vpop.f32.mrb[26].mxu0 }
 0x786   :  { %12212 = vst [vmem:[#allocation64_spill] sm:$0xff] %v10348_v28  ;;  %v7678_v40 = vpop.f32.mrb[27].mxu0 }
 0x78c   :  { %v10350_v25 = vpop.f32.mrb[28].mxu0 }
 0x78d   :  { %v10352_v57 = vpop.f32.mrb[29].mxu0 }
 0x794   :  { %v10354_v58 = vpop.f32.mrb[30].mxu0 }
 0x795   :  { %v10356_v26 = vpop.f32.mrb[31].mxu0  ;;  %v3693_v9 = vpop.xlane.xlu1 %3692 }
 0x796   :  { %v3737_v24 = vmax.f32 %v3693_v9, 1e-24 }
 0x798   :  { %8708 = vrsqrt.f32 %v3737_v24  ;;  %v12213_v24 = vld [vmem:[#allocation17_spill] sm:$0xff] }
 0x799   :  { %v3690_v11 = vpop.xlane.xlu0 %3689 }
 0x79a   :  { %v3736_v14 = vmax.f32 %v3690_v11, 1e-24 }
 0x79c   :  { %8710 = vrsqrt.f32 %v3736_v14  ;;  %v10358_v54 = vpop.f32.mrb[32].mxu0  ;;  %v12214_v14 = vld [vmem:[#allocation27_spill] sm:$0xff] }
 0x79d   :  { %v10360_v23 = vpop.f32.mrb[33].mxu0  ;;  %v3696_v44 = vpop.xlane.xlu0 %3695 }
 0x79e   :  { %v3738_v39 = vmax.f32 %v3696_v44, 1e-24 }
 0x7a0   :  { %8712 = vrsqrt.f32 %v3738_v39 }
 0x7a1   :  { %v3699_v55 = vpop.xlane.xlu0 %3698  ;;  %v3529_v40 = vpop.xlane.xlu1 %3528 }
 0x7a2   :  { %v3739_v20 = vmax.f32 %v3699_v55, 1e-24  ;;  %v3575_v28 = vmax.f32 %v3529_v40, 1e-24  ;;  %v8709_v37 = vpop.eup %8708 }
 0x7a3   :  { %v3769_v2 = vmul.f32 %v8709_v37, %v12214_v14 }
 0x7a4   :  { %8714 = vrsqrt.f32 %v3739_v20 }
 0x7a5   :  { %8716 = vrsqrt.f32 %v3575_v28  ;;  %v3532_v13 = vpop.xlane.xlu0 %3531  ;;  %v10364_v29 = vpop.xlane.xlu1 %3534 }
 0x7a6   :  { %v8711_v9 = vpop.eup %8710  ;;  %v3576_v52 = vmax.f32 %v3532_v13, 1e-24 }
 0x7a7   :  { %v3768_v11 = vmul.f32 %v8711_v9, %v12213_v24 }
 0x7a8   :  { %8718 = vrsqrt.f32 %v3576_v52  ;;  %v10366_v44 = vpop.f32.mrb[24].mxu1  ;;  %v10373_v52 = vstv %s7256_s29 }
 0x7a9   :  { %12215 = vst [vmem:[#allocation65_spill] sm:$0xff] %v10366_v44  ;;  %v7659_v63 = vpop.f32.mrb[25].mxu1  ;;  %v3702_v39 = vpop.xlane.xlu0 %3701  ;;  %v8316_v55 = vpack.i.bf16 %v3769_v2, %v3768_v11  ;;  %v12217_v44 = vld [vmem:[#allocation16_spill] sm:$0xff] }
 0x7aa   :  { %v10368_v40 = vpop.f32.mrb[26].mxu1  ;;  %v3740_v20 = vmax.f32 %v3702_v39, 1e-24  ;;  %v8713_v13 = vpop.eup %8712 }
 0x7ab   :  { %12216 = vst [vmem:[#allocation66_spill] sm:$0xff] %v10368_v40  ;;  %v7660_v28 = vpop.f32.mrb[27].mxu1  ;;  %8317 = vrot.lane.b32.xlu0 %v8316_v55, %s9155_s11  ;;  %v3770_v63 = vmul.f32 %v8713_v13, %v12217_v44 }
 0x7ac   :  { %8720 = vrsqrt.f32 %v3740_v20 }
 0x7ad   :  { %v10371_v3 = vpop.xlane.xlu0 %3537  ;;  %v3705_v9 = vpop.xlane.xlu1 %3704 }
 0x7ae   :  { %v8715_v34 = vpop.eup %8714  ;;  %v3741_v37 = vmax.f32 %v3705_v9, 1e-24 }
 0x7af   :  { %v8717_v43 = vpop.eup %8716  ;;  %v3771_v2 = vmul.f32 %v8715_v34, %v12218_v48 }
 0x7b0   :  { %8722 = vrsqrt.f32 %v3741_v37  ;;  %v3608_v55 = vmul.f32 %v8717_v43, %v10373_v52  ;;  %v12219_v43 = vld [vmem:[#allocation25_spill] sm:$0xff] }
 0x7b1   :  { %v3711_v11 = vpop.xlane.xlu0 %3710  ;;  %v3708_v39 = vpop.xlane.xlu1 %3707  ;;  %v8321_v28 = vpack.i.bf16 %v3771_v2, %v3770_v63 }
 0x7b2   :  { %v8719_v40 = vpop.eup %8718  ;;  %v3743_v62 = vmax.f32 %v3711_v11, 1e-24  ;;  %v3742_v47 = vmax.f32 %v3708_v39, 1e-24  ;;  %v3624_v9 = vmul.f32 %v3608_v55, %v12213_v24  ;;  %v12220_v11 = vld [vmem:[#allocation30_spill] sm:$0xff] }
 0x7b3   :  { %8322 = vrot.lane.b32.xlu1 %v8321_v28, %s9155_s11  ;;  %v3609_v20 = vmul.f32 %v8719_v40, %v10373_v52  ;;  %v12221_v40 = vld [vmem:[#allocation28_spill] sm:$0xff] }
 0x7b4   :  { %8724 = vrsqrt.f32 %v3743_v62 }
 0x7b5   :  { %8726 = vrsqrt.f32 %v3742_v47  ;;  %v10381_v13 = vpop.xlane.xlu1 %3540  ;;  %v3625_v37 = vmul.f32 %v3609_v20, %v12214_v14  ;;  %v10395_v14 = vpop.xlane.xlu0 %3543 }
 0x7b6   :  { %v8721_v34 = vpop.eup %8720  ;;  %8728 = vrcp.f32 %v10261_v35 }
 0x7b7   :  { %3789 = vrot.lane.b32.xlu1 %v3624_v9, %s9156_s27  ;;  %v3772_v2 = vmul.f32 %v8721_v34, %v12219_v43  ;;  %v12222_v9 = vld [vmem:[#allocation23_spill] sm:$0xff] }
 0x7b9   :  { %v10388_v62 = vpop.xlane.xlu1 %3546 }
 0x7ba   :  { %v8723_v63 = vpop.eup %8722 }
 0x7bb   :  { %3791 = vrot.lane.b32.xlu1 %v3625_v37, %s9156_s27  ;;  %v3773_v39 = vmul.f32 %v8723_v63, %v12220_v11 }
 0x7bd   :  { %v8326_v28 = vpack.i.bf16 %v3773_v39, %v3772_v2  ;;  %v10400_v37 = vpop.xlane.xlu0 %3713 }
 0x7be   :  { %v8725_v47 = vpop.eup %8724 }
 0x7bf   :  { %v8727_v55 = vpop.eup %8726  ;;  %v3775_v24 = vmul.f32 %v8725_v47, %v12221_v40  ;;  %8327 = vrot.lane.b32.xlu0 %v8326_v28, %s9155_s11 }
 0x7c0   :  { %v3774_v33 = vmul.f32 %v8727_v55, %v12222_v9  ;;  %v8729_v28 = vpop.eup %8728  ;;  %v12223_v55 = vld [vmem:[#allocation56_spill] sm:$0xff] }
 0x7c1   :  { %v10393_v32 = vpop.xlane.xlu1 %3716  ;;  %v10403_v2 = vpop.xlane.xlu0 %3549  ;;  %v8289_v42 = vunpack.i.l.bf16 %v12223_v55  ;;  %v1448_v18 = vmul.f32 %v8729_v28, %v10108_v22 }
 0x7c2   :  { %v8331_v20 = vpack.i.bf16 %v3775_v24, %v3774_v33 }
 0x7c4   :  { %8332 = vrot.lane.b32.xlu0 %v8331_v20, %s9155_s11  ;;  %v8290_v20 = vunpack.i.h.bf16 %v12223_v55 }
 0x7c5   :  { %v10398_v34 = vpop.xlane.xlu1 %3719  ;;  %v10409_v33 = vpop.xlane.xlu0 %3722 }
 0x7c6   :  { %v8083_v21 = vpack.c.bf16 %v8290_v20, %v8289_v42  ;;  %v12225_v42 = vld [vmem:[#allocation59_spill] sm:$0xff] }
 0x7c7   :  { %v8299_v28 = vunpack.i.l.bf16 %v12225_v42 }
 0x7c9   :  { %v1413_v63 = vpop.xlane.xlu1 %1412  ;;  %v10423_v8 = vpop.xlane.xlu0 %3555 }
 0x7ca   :  { %8730 = vrcp.f32 %v1413_v63  ;;  %v10417_v63 = vld [vmem:[#allocation9 + $0x18] sm:$0xff] }
 0x7cb   :  { %v10430_v22 = vadd.f32 %v10350_v25, %v10417_v63 }
 0x7cd   :  { %v10405_v39 = vpop.xlane.xlu1 %3552 }
 0x7d1   :  { %v10407_v47 = vpop.xlane.xlu1 %3558 }
 0x7d4   :  { %v8731_v24 = vpop.eup %8730 }
 0x7d5   :  { %v1447_v35 = vmul.f32 %v8731_v24, %v10310_v49  ;;  %v10415_v12 = vpop.xlane.xlu1 %3728  ;;  %v12224_v49 = vld [vmem:[#allocation58_spill] sm:$0xff]  ;;  %v10443_v24 = vpop.xlane.xlu0 %3725 }
 0x7d7   :  { %v10419_v16 = vpop.f32.mrb[34].mxu0  ;;  %v1456_v45 = vpack.c.bf16 %v1448_v18, %v1447_v35  ;;  %v10437_v18 = vld [vmem:[#allocation9 + $0x10] sm:$0xff]  ;;  %v2921_v35 = vsel %vm1272_vm3, %v10430_v22, -inf }
 0x7d8   :  { %v10421_v27 = vpop.f32.mrb[35].mxu0  ;;  %v10449_v55 = vadd.f32 %v10352_v57, %v10437_v18 }
 0x7d9   :  { %7682 = vmatmul.mubr.msk.bf16.vlgmr.msra.gmra.mrb[32].mxu1 %vm1272_vm3, %v1456_v45  ;;  %v10426_v10 = vpop.xlane.xlu1 %3731  ;;  %v8300_v45 = vunpack.i.h.bf16 %v12225_v42  ;;  %v12228_v42 = vld [vmem:[#allocation52_spill] sm:$0xff] }
 0x7da   :  { %8076 = vmatpush3.bf16.xpose.msk.msra.mxu1 %vm9575_vm2, %v10276_v5  ;;  %7696 = vmatprep.mubr.msk.f32.mxu1 %vm268_vm1, %v12224_v49 }
 0x7db   :  { %8085 = vmatprep.subr.msk.bf16.mxu1 %vm9575_vm2, %v8083_v21  ;;  %v8095_v41 = vpack.c.bf16 %v8300_v45, %v8299_v28  ;;  %v12230_v45 = vld [vmem:[#allocation63_spill] sm:$0xff] }
 0x7dc   :  { %v8314_v28 = vunpack.i.l.bf16 %v12230_v45 }
 0x7dd   :  { %v10445_v25 = vpop.f32.mrb[28].mxu1  ;;  %v10451_v5 = vpop.xlane.xlu1 %3564 }
 0x7de   :  { %12226 = vst [vmem:[#allocation56_spill] sm:$0xff] %v10445_v25  ;;  %v7671_v20 = vpop.f32.mrb[29].mxu1  ;;  %v10461_v25 = vadd.f32 %v10356_v26, %v10437_v18  ;;  %v8315_v26 = vunpack.i.h.bf16 %v12230_v45  ;;  %v3577_v45 = vmax.f32 %v10364_v29, 1e-24 }
 0x7df   :  { %v10455_v49 = vpop.f32.mrb[30].mxu1  ;;  %2922 = vmax.xlane.f32.xlu1 %v2921_v35  ;;  %v2918_v20 = vsel %vm1272_vm3, %v10449_v55, -inf }
 0x7e0   :  { %12227 = vst [vmem:[#allocation58_spill] sm:$0xff] %v10455_v49  ;;  %v7672_v38 = vpop.f32.mrb[31].mxu1  ;;  %v12231_v49 = vld [vmem:[#allocation55_spill] sm:$0xff]  ;;  %8732 = vrsqrt.f32 %v3577_v45  ;;  %v3581_v45 = vmax.f32 %v10388_v62, 1e-24 }
 0x7e1   :  { %7697 = vmatmul.mubr.msk.f32.vlgmr.msra.gmra.mrb[36].mxu1 %vm268_vm1, %v12228_v42  ;;  %v10465_v57 = vpop.xlane.xlu1 %3570  ;;  %v10471_v38 = vpop.xlane.xlu0 %3561  ;;  %v2930_v42 = vsel %vm1272_vm3, %v10461_v25, -inf }
 0x7e2   :  { %8088 = vmatpush3.bf16.xpose.msk.msra.mxu1 %vm9575_vm2, %v8083_v21  ;;  %7710 = vmatprep.mubr.msk.f32.mxu1 %vm268_vm1, %v12229_v46  ;;  %v10479_v21 = vadd.f32 %v10360_v23, %v10437_v18  ;;  %v8107_v46 = vpack.c.bf16 %v8315_v26, %v8314_v28  ;;  %v3745_v28 = vmax.f32 %v10393_v32, 1e-24 }
 0x7e3   :  { %2919 = vmax.xlane.f32.xlu0 %v2918_v20  ;;  %8097 = vmatprep.subr.msk.bf16.mxu1 %vm9575_vm2, %v8095_v41 }
 0x7e4   :  { %v2942_v23 = vsel %vm1272_vm3, %v10479_v21, -inf  ;;  %8734 = vrsqrt.f32 %v3745_v28 }
 0x7e5   :  { %v3103_v35 = vpop.permute.xlu1 %3102  ;;  %v10484_v20 = vpop.xlane.xlu0 %3734 }
 0x7e6   :  { %7742 = vmatpush3.bf16.msra.mxu0 %v3103_v35  ;;  %v3744_v35 = vmax.f32 %v10400_v37, 1e-24 }
 0x7e7   :  { %2931 = vmax.xlane.f32.xlu0 %v2930_v42  ;;  %7753 = vmatprep.subr.bf16.mxu0 %v12180_v36  ;;  %v3747_v42 = vmax.f32 %v10409_v33, 1e-24 }
 0x7e8   :  { %8736 = vrsqrt.f32 %v3744_v35 }
 0x7e9   :  { %7711 = vmatmul.mubr.msk.f32.vlgmr.msra.gmra.mrb[38].mxu1 %vm268_vm1, %v12231_v49  ;;  %v10497_v26 = vpop.xlane.xlu0 %3567  ;;  %8738 = vrsqrt.f32 %v3747_v42 }
 0x7ea   :  { %8100 = vmatpush3.bf16.xpose.msk.msra.mxu1 %vm9575_vm2, %v8095_v41  ;;  %7724 = vmatprep.mubr.msk.f32.mxu1 %vm268_vm1, %v10259_v15  ;;  %v8733_v15 = vpop.eup %8732 }
 0x7eb   :  { %2943 = vmax.xlane.f32.xlu0 %v2942_v23  ;;  %8109 = vmatprep.subr.msk.bf16.mxu1 %vm9575_vm2, %v8107_v46 }
 0x7ed   :  { %v10505_v41 = vpop.xlane.xlu0 %3573 }
 0x7f1   :  { %7725 = vmatmul.mubr.msk.f32.vlgmr.msra.gmra.mrb[40].mxu1 %vm268_vm1, %v10257_v1  ;;  %v3150_v29 = vpop.permute.xlu0 %3149  ;;  %v3610_v1 = vmul.f32 %v8733_v15, %v10373_v52  ;;  %v12232_v15 = vld [vmem:[#allocation33_spill] sm:$0xff] }
 0x7f2   :  { %8112 = vmatpush3.bf16.xpose.msk.msra.mxu1 %vm9575_vm2, %v8107_v46  ;;  %7738 = vmatprep.mubr.msk.f32.mxu1 %vm268_vm1, %v10273_v61  ;;  %v10518_v61 = vadd.f32 %v10421_v27, %v10437_v18  ;;  %v3746_v46 = vmax.f32 %v10398_v34, 1e-24  ;;  %v8735_v27 = vpop.eup %8734 }
 0x7f3   :  { %7747 = vmatprep.subr.bf16.mxu1 %v12180_v36  ;;  %v3626_v49 = vmul.f32 %v3610_v1, %v12217_v44  ;;  %v8737_v23 = vpop.eup %8736 }
 0x7f4   :  { %8740 = vrsqrt.f32 %v3746_v46  ;;  %v8739_v32 = vpop.eup %8738  ;;  %v10536_v46 = vpop.permute.xlu1 %3196 }
 0x7f5   :  { %8742 = vrsqrt.f32 %v3581_v45  ;;  %v3779_v28 = vmul.f32 %v8739_v32, %v9341_v6 }
 0x7f8   :  { %v10538_v45 = vpop.permute.xlu1 %3243 }
 0x7f9   :  { %7739 = vmatmul.mubr.msk.f32.vlgmr.msra.gmra.mrb[42].mxu1 %vm268_vm1, %v10263_v53  ;;  %v2954_v53 = vsel %vm1272_vm3, %v10518_v61, -inf }
 0x7fa   :  { %7748 = vmatpush3.bf16.msra.mxu1 %v3150_v29  ;;  %7749 = vmatprep.mubr.msk.bf16.mxu1 %vm9154_vm4, %v12180_v36  ;;  %v3777_v29 = vmul.f32 %v8735_v27, %v12232_v15 }
 0x7fb   :  { %7759 = vmatprep.subr.bf16.mxu1 %v12180_v36 }
 0x7fc   :  { %v10540_v27 = vpop.permute.xlu1 %3337 }
 0x7fe   :  { %v8741_v1 = vpop.eup %8740 }
 0x7ff   :  { %v3778_v33 = vmul.f32 %v8741_v1, %v9265_v30  ;;  %v8743_v34 = vpop.eup %8742 }
 0x800   :  { %v3614_v62 = vmul.f32 %v8743_v34, %v10373_v52 }
 0x801   :  { %3884 = vrot.lane.b32.xlu0 %v3626_v49, %s9156_s27  ;;  %v12233_v49 = vld [vmem:[#allocation20_spill] sm:$0xff]  ;;  %v8341_v35 = vpack.i.bf16 %v3779_v28, %v3778_v33 }
 0x802   :  { %v3630_v42 = vmul.f32 %v3614_v62, %v12222_v9 }
 0x820   :  { %2955 = vmax.xlane.f32.xlu0 %v2954_v53  ;;  %v3776_v53 = vmul.f32 %v8737_v23, %v12233_v49  ;;  %v10542_v23 = vpop.permute.xlu1 %3431 }
 0x821   :  { %12234 = vst [vmem:[#allocation59_spill] sm:$0xff] %v10542_v23 }
 0x822   :  { %v8336_v37 = vpack.i.bf16 %v3777_v29, %v3776_v53 }
 0x825   :  { %v10544_v32 = vpop.permute.xlu1 %8322 }
 0x826   :  { %12235 = vst [vmem:[#allocation52_spill] sm:$0xff] %v10544_v32 }
 0x829   :  { %v10546_v29 = vpop.permute.xlu1 %3789 }
 0x82a   :  { %12236 = vst [vmem:[#allocation60_spill] sm:$0xff] %v10546_v29 }
 0x82d   :  { %v10548_v1 = vpop.permute.xlu1 %3791 }
 0x82e   :  { %12237 = vst [vmem:[#allocation63_spill] sm:$0xff] %v10548_v1 }
 0x836   :  { %8337 = vrot.lane.b32.xlu0 %v8336_v37, %s9155_s11 }
 0x83a   :  { %8342 = vrot.lane.b32.xlu0 %v8341_v35, %s9155_s11 }
 0x83e   :  { %4074 = vrot.lane.b32.xlu0 %v3630_v42, %s9156_s27 }
 0x86c   :  { %v2923_v53 = vpop.xlane.xlu1 %2922 }
 0x86d   :  { %v2967_v37 = vsub.f32 %v10430_v22, %v2923_v53  ;;  %v10564_v22 = vadd.f32 %v10354_v58, %v10417_v63 }
 0x86f   :  { %v2984_v33 = vmul.f32 1.442695, %v2967_v37 }
 0x871   :  { %8744 = vpow2.f32 %v2984_v33  ;;  %v2933_v33 = vsel %vm1272_vm3, %v10564_v22, -inf }
 0x87b   :  { %v10551_v28 = vpop.eup %8744 }
 0x87c   :  { %v3017_v34 = vsel %vm1272_vm3, %v10551_v28, 0.0 }
 0x87d   :  { %3018 = vadd.xlane.f32.xlu0 %v3017_v34 }
 0x8ac   :  { %v10555_v35 = vpop.f32.mrb[32].mxu1 }
 0x8ad   :  { %12238 = vst [vmem:[#allocation55_spill] sm:$0xff] %v10555_v35  ;;  %v7683_v62 = vpop.f32.mrb[33].mxu1 }
 0x8ae   :  { %v10557_v42 = vpop.f32.mrb[34].mxu1  ;;  %v10580_v62 = vadd.f32 %v10358_v54, %v10417_v63 }
 0x8af   :  { %12239 = vst [vmem:[#allocation33_spill] sm:$0xff] %v10557_v42  ;;  %v7684_v44 = vpop.f32.mrb[35].mxu1 }
 0x8b4   :  { %v7698_v9 = vpop.f32.mrb[36].mxu1 }
 0x8b5   :  { %v10560_v1 = vadd.f32 %v7698_v9, %v10417_v63  ;;  %v2339_v29 = vpop.f32.mrb[37].mxu1 }
 0x8b6   :  { %v10569_v37 = vadd.f32 %v2339_v29, %v10437_v18 }
 0x8b7   :  { %v2927_v53 = vsel %vm1272_vm3, %v10560_v1, -inf }
 0x8b8   :  { %2928 = vmax.xlane.f32.xlu1 %v2927_v53  ;;  %v2924_v58 = vsel %vm1272_vm3, %v10569_v37, -inf }
 0x8bc   :  { %v7712_v44 = vpop.f32.mrb[38].mxu1  ;;  %2934 = vmax.xlane.f32.xlu1 %v2933_v33  ;;  %v3578_v33 = vmax.f32 %v10371_v3, 1e-24 }
 0x8bd   :  { %v2529_v34 = vpop.f32.mrb[39].mxu1  ;;  %v10574_v9 = vadd.f32 %v7712_v44, %v10417_v63  ;;  %v2945_v44 = vsel %vm1272_vm3, %v10580_v62, -inf }
 0x8be   :  { %v10586_v42 = vadd.f32 %v2529_v34, %v10437_v18  ;;  %8746 = vrsqrt.f32 %v3578_v33  ;;  %v10600_v34 = vadd.f32 %v10419_v16, %v10417_v63 }
 0x8bf   :  { %v2939_v29 = vsel %vm1272_vm3, %v10574_v9, -inf }
 0x8c0   :  { %2925 = vmax.xlane.f32.xlu1 %v2924_v58  ;;  %v2936_v54 = vsel %vm1272_vm3, %v10586_v42, -inf }
 0x8c4   :  { %v7726_v53 = vpop.f32.mrb[40].mxu1  ;;  %2940 = vmax.xlane.f32.xlu1 %v2939_v29 }
 0x8c5   :  { %v2719_v35 = vpop.f32.mrb[41].mxu1  ;;  %v10596_v3 = vadd.f32 %v7726_v53, %v10417_v63  ;;  %v3582_v53 = vmax.f32 %v10403_v2, 1e-24 }
 0x8c7   :  { %v2951_v33 = vsel %vm1272_vm3, %v10596_v3, -inf }
 0x8c8   :  { %2946 = vmax.xlane.f32.xlu1 %v2945_v44  ;;  %v8747_v32 = vpop.eup %8746  ;;  %v3579_v44 = vmax.f32 %v10381_v13, 1e-24 }
 0x8c9   :  { %v3611_v29 = vmul.f32 %v8747_v32, %v10373_v52  ;;  %v2957_v32 = vsel %vm1272_vm3, %v10600_v34, -inf }
 0x8ca   :  { %8748 = vrsqrt.f32 %v3579_v44 }
 0x8cb   :  { %v3627_v51 = vmul.f32 %v3611_v29, %v12218_v48 }
 0x8cc   :  { %v7740_v58 = vpop.f32.mrb[42].mxu1  ;;  %2937 = vmax.xlane.f32.xlu1 %v2936_v54  ;;  %v10606_v54 = vadd.f32 %v2719_v35, %v10437_v18 }
 0x8cd   :  { %v2909_v23 = vpop.f32.mrb[43].mxu1 }
 0x8ce   :  { %v2948_v16 = vsel %vm1272_vm3, %v10606_v54, -inf }
 0x8d4   :  { %v8749_v29 = vpop.eup %8748 }
 0x8d5   :  { %v3612_v13 = vmul.f32 %v8749_v29, %v10373_v52 }
 0x8dd   :  { %3886 = vrot.lane.b32.xlu1 %v3627_v51, %s9156_s27  ;;  %v3580_v51 = vmax.f32 %v10395_v14, 1e-24 }
 0x8df   :  { %8750 = vrsqrt.f32 %v3580_v51 }
 0x8e0   :  { %8752 = vrsqrt.f32 %v3582_v53 }
 0x8e9   :  { %v8751_v35 = vpop.eup %8750 }
 0x8ea   :  { %v3613_v48 = vmul.f32 %v8751_v35, %v10373_v52 }
 0x8ec   :  { %v3629_v14 = vmul.f32 %v3613_v48, %v12220_v11 }
 0x901   :  { %2952 = vmax.xlane.f32.xlu1 %v2951_v33  ;;  %v3628_v33 = vmul.f32 %v3612_v13, %v12219_v43 }
 0x905   :  { %2958 = vmax.xlane.f32.xlu1 %v2957_v32  ;;  %v8753_v32 = vpop.eup %8752 }
 0x906   :  { %v3615_v44 = vmul.f32 %v8753_v32, %v10373_v52  ;;  %v10635_v32 = vadd.f32 %v7740_v58, %v10417_v63 }
 0x908   :  { %v3631_v2 = vmul.f32 %v3615_v44, %v12221_v40 }
 0x909   :  { %2949 = vmax.xlane.f32.xlu1 %v2948_v16  ;;  %v10620_v16 = vpop.permute.xlu0 %3290 }
 0x90d   :  { %v10625_v51 = vpop.permute.xlu0 %3384 }
 0x911   :  { %v10627_v53 = vpop.permute.xlu0 %8317 }
 0x915   :  { %v10629_v29 = vpop.permute.xlu0 %8327 }
 0x919   :  { %v10631_v13 = vpop.permute.xlu0 %8332 }
 0x91a   :  { %3979 = vrot.lane.b32.xlu1 %v3628_v33, %s9156_s27  ;;  %12240 = vst [vmem:[#allocation20_spill] sm:$0xff] %v10631_v13 }
 0x91d   :  { %v2920_v35 = vpop.xlane.xlu0 %2919 }
 0x91e   :  { %3981 = vrot.lane.b32.xlu1 %v3629_v14, %s9156_s27  ;;  %v2966_v48 = vsub.f32 %v10449_v55, %v2920_v35  ;;  %v10638_v14 = vadd.f32 %v2909_v23, %v10437_v18 }
 0x920   :  { %v2982_v33 = vmul.f32 1.442695, %v2966_v48  ;;  %v2960_v55 = vsel %vm1272_vm3, %v10638_v14, -inf }
 0x921   :  { %v2932_v11 = vpop.xlane.xlu0 %2931 }
 0x922   :  { %4076 = vrot.lane.b32.xlu1 %v3631_v2, %s9156_s27  ;;  %8754 = vpow2.f32 %v2982_v33  ;;  %v2963_v2 = vsel %vm1272_vm3, %v10635_v32, -inf  ;;  %v2970_v18 = vsub.f32 %v10461_v25, %v2932_v11 }
 0x924   :  { %v2990_v48 = vmul.f32 1.442695, %v2970_v18 }
 0x925   :  { %v2944_v11 = vpop.xlane.xlu0 %2943 }
 0x92c   :  { %v10645_v35 = vpop.eup %8754 }
 0x945   :  { %v2929_v44 = vpop.xlane.xlu1 %2928 }
 0x946   :  { %v2969_v40 = vsub.f32 %v10560_v1, %v2929_v44  ;;  %2964 = vmax.xlane.f32.xlu1 %v2963_v2  ;;  %v3014_v1 = vsel %vm1272_vm3, %v10645_v35, 0.0 }
 0x948   :  { %v2988_v43 = vmul.f32 1.442695, %v2969_v40 }
 0x949   :  { %v2935_v13 = vpop.xlane.xlu1 %2934 }
 0x94a   :  { %8756 = vpow2.f32 %v2988_v43  ;;  %v2971_v63 = vsub.f32 %v10564_v22, %v2935_v13  ;;  %2961 = vmax.xlane.f32.xlu1 %v2960_v55 }
 0x94c   :  { %v2992_v23 = vmul.f32 1.442695, %v2971_v63  ;;  %v2974_v63 = vsub.f32 %v10479_v21, %v2944_v11 }
 0x94d   :  { %v2926_v58 = vpop.xlane.xlu1 %2925 }
 0x94e   :  { %8758 = vpow2.f32 %v2992_v23  ;;  %v2968_v40 = vsub.f32 %v10569_v37, %v2926_v58  ;;  %3015 = vadd.xlane.f32.xlu1 %v3014_v1 }
 0x950   :  { %v2986_v33 = vmul.f32 1.442695, %v2968_v40  ;;  %v2998_v40 = vmul.f32 1.442695, %v2974_v63 }
 0x951   :  { %v2941_v44 = vpop.xlane.xlu1 %2940 }
 0x952   :  { %8760 = vpow2.f32 %v2986_v33  ;;  %v2973_v43 = vsub.f32 %v10574_v9, %v2941_v44 }
 0x953   :  { %8762 = vpow2.f32 %v2990_v48 }
 0x954   :  { %v10653_v2 = vpop.eup %8756  ;;  %v2996_v22 = vmul.f32 1.442695, %v2973_v43 }
 0x955   :  { %v2947_v25 = vpop.xlane.xlu1 %2946  ;;  %v3023_v13 = vsel %vm1272_vm3, %v10653_v2, 0.0 }
 0x956   :  { %8764 = vpow2.f32 %v2996_v22  ;;  %v2975_v55 = vsub.f32 %v10580_v62, %v2947_v25  ;;  %3024 = vadd.xlane.f32.xlu0 %v3023_v13 }
 0x958   :  { %v10658_v37 = vpop.eup %8758  ;;  %v3000_v18 = vmul.f32 1.442695, %v2975_v55 }
 0x959   :  { %v2938_v23 = vpop.xlane.xlu1 %2937  ;;  %v3029_v9 = vsel %vm1272_vm3, %v10658_v37, 0.0 }
 0x95a   :  { %8766 = vpow2.f32 %v3000_v18  ;;  %v2972_v58 = vsub.f32 %v10586_v42, %v2938_v23  ;;  %3030 = vadd.xlane.f32.xlu0 %v3029_v9  ;;  %v10690_v18 = vpop.permute.xlu0 %3884 }
 0x95b   :  { %12242 = vst [vmem:[#allocation68_spill] sm:$0xff] %v10690_v18 }
 0x95c   :  { %v10664_v1 = vpop.eup %8760  ;;  %v2994_v48 = vmul.f32 1.442695, %v2972_v58 }
 0x95d   :  { %v3020_v62 = vsel %vm1272_vm3, %v10664_v1, 0.0  ;;  %v10668_v33 = vpop.eup %8762  ;;  %v10688_v63 = vpop.permute.xlu1 %3886 }
 0x95e   :  { %8768 = vpow2.f32 %v2994_v48  ;;  %3021 = vadd.xlane.f32.xlu1 %v3020_v62  ;;  %v3026_v44 = vsel %vm1272_vm3, %v10668_v33, 0.0  ;;  %12241 = vst [vmem:[#allocation67_spill] sm:$0xff] %v10688_v63 }
 0x95f   :  { %8770 = vpow2.f32 %v2998_v40  ;;  %v2956_v40 = vpop.xlane.xlu0 %2955 }
 0x960   :  { %v10670_v21 = vpop.eup %8764 }
 0x961   :  { %v3035_v42 = vsel %vm1272_vm3, %v10670_v21, 0.0 }
 0x962   :  { %3027 = vadd.xlane.f32.xlu1 %v3026_v44  ;;  %3036 = vadd.xlane.f32.xlu0 %v3035_v42  ;;  %v2978_v44 = vsub.f32 %v10518_v61, %v2956_v40 }
 0x964   :  { %v10676_v43 = vpop.eup %8766 }
 0x965   :  { %v3041_v22 = vsel %vm1272_vm3, %v10676_v43, 0.0 }
 0x966   :  { %3042 = vadd.xlane.f32.xlu0 %v3041_v22 }
 0x968   :  { %v10680_v11 = vpop.eup %8768 }
 0x969   :  { %v3032_v25 = vsel %vm1272_vm3, %v10680_v11, 0.0  ;;  %v10684_v13 = vpop.eup %8770 }
 0x96a   :  { %3033 = vadd.xlane.f32.xlu1 %v3032_v25  ;;  %v3038_v55 = vsel %vm1272_vm3, %v10684_v13, 0.0 }
 0x96e   :  { %3039 = vadd.xlane.f32.xlu1 %v3038_v55  ;;  %v3006_v55 = vmul.f32 1.442695, %v2978_v44  ;;  %v3590_v44 = vmax.f32 %v10505_v41, 1e-24 }
 0x98e   :  { %v2953_v23 = vpop.xlane.xlu1 %2952 }
 0x98f   :  { %v2977_v9 = vsub.f32 %v10596_v3, %v2953_v23 }
 0x991   :  { %v3004_v58 = vmul.f32 1.442695, %v2977_v9 }
 0x992   :  { %v2959_v48 = vpop.xlane.xlu1 %2958 }
 0x993   :  { %8772 = vpow2.f32 %v3004_v58  ;;  %v2979_v62 = vsub.f32 %v10600_v34, %v2959_v48  ;;  %v3584_v58 = vmax.f32 %v10423_v8, 1e-24  ;;  %v3586_v48 = vmax.f32 %v10471_v38, 1e-24 }
 0x995   :  { %v3008_v42 = vmul.f32 1.442695, %v2979_v62  ;;  %v3588_v62 = vmax.f32 %v10497_v26, 1e-24 }
 0x996   :  { %v2950_v22 = vpop.xlane.xlu1 %2949 }
 0x997   :  { %8774 = vpow2.f32 %v3008_v42  ;;  %v2976_v25 = vsub.f32 %v10606_v54, %v2950_v22  ;;  %v3583_v54 = vmax.f32 %v10405_v39, 1e-24 }
 0x999   :  { %v3002_v63 = vmul.f32 1.442695, %v2976_v25 }
 0x99b   :  { %8776 = vpow2.f32 %v3002_v63 }
 0x99c   :  { %8778 = vpow2.f32 %v3006_v55 }
 0x99d   :  { %v10696_v18 = vpop.eup %8772  ;;  %8780 = vrsqrt.f32 %v3583_v54 }
 0x99e   :  { %v3047_v3 = vsel %vm1272_vm3, %v10696_v18, 0.0  ;;  %8782 = vrsqrt.f32 %v3584_v58 }
 0x99f   :  { %3048 = vadd.xlane.f32.xlu0 %v3047_v3  ;;  %8784 = vrsqrt.f32 %v3586_v48  ;;  %v10731_v48 = vpop.permute.xlu0 %8337 }
 0x9a0   :  { %8786 = vrsqrt.f32 %v3588_v62 }
 0x9a1   :  { %v10700_v23 = vpop.eup %8774  ;;  %8788 = vrsqrt.f32 %v3590_v44 }
 0x9a2   :  { %v3053_v61 = vsel %vm1272_vm3, %v10700_v23, 0.0 }
 0x9a3   :  { %3054 = vadd.xlane.f32.xlu0 %v3053_v61  ;;  %v10738_v44 = vpop.permute.xlu0 %8342 }
 0x9a5   :  { %v10704_v34 = vpop.eup %8776 }
 0x9a6   :  { %v3044_v63 = vsel %vm1272_vm3, %v10704_v34, 0.0  ;;  %v10709_v9 = vpop.eup %8778 }
 0x9a7   :  { %3045 = vadd.xlane.f32.xlu1 %v3044_v63  ;;  %v3050_v40 = vsel %vm1272_vm3, %v10709_v9, 0.0  ;;  %v8781_v39 = vpop.eup %8780  ;;  %v10726_v63 = vpop.permute.xlu1 %3979 }
 0x9a8   :  { %v3616_v42 = vmul.f32 %v8781_v39, %v10373_v52  ;;  %v8783_v22 = vpop.eup %8782 }
 0x9a9   :  { %v3617_v25 = vmul.f32 %v8783_v22, %v10373_v52  ;;  %v8785_v55 = vpop.eup %8784 }
 0x9aa   :  { %v3632_v8 = vmul.f32 %v3616_v42, %v12233_v49  ;;  %v3619_v3 = vmul.f32 %v8785_v55, %v10373_v52  ;;  %v8787_v26 = vpop.eup %8786 }
 0x9ab   :  { %3051 = vadd.xlane.f32.xlu1 %v3050_v40  ;;  %v3633_v38 = vmul.f32 %v3617_v25, %v12232_v15  ;;  %v3621_v61 = vmul.f32 %v8787_v26, %v10373_v52  ;;  %v8789_v54 = vpop.eup %8788  ;;  %v10734_v62 = vpop.permute.xlu1 %3981 }
 0x9ac   :  { %v3635_v41 = vmul.f32 %v3619_v3, %v9341_v6  ;;  %v3623_v40 = vmul.f32 %v8789_v54, %v10373_v52  ;;  %v3748_v54 = vmax.f32 %v10443_v24, 1e-24  ;;  %v3585_v24 = vmax.f32 %v10407_v47, 1e-24 }
 0x9ad   :  { %v3637_v58 = vmul.f32 %v3621_v61, %v9309_v59 }
 0x9ae   :  { %v3639_v39 = vmul.f32 %v3623_v40, %v9305_v56 }
 0x9af   :  { %v10740_v42 = vpop.permute.xlu1 %4076 }
 0x9bc   :  { %4169 = vrot.lane.b32.xlu1 %v3632_v8, %s9156_s27  ;;  %v10744_v8 = vpop.permute.xlu0 %4074 }
 0x9c0   :  { %4171 = vrot.lane.b32.xlu1 %v3633_v38, %s9156_s27  ;;  %v3019_v3 = vpop.xlane.xlu0 %3018 }
 0x9c4   :  { %4266 = vrot.lane.b32.xlu1 %v3635_v41, %s9156_s27  ;;  %v3749_v41 = vmax.f32 %v10415_v12, 1e-24 }
 0x9c8   :  { %4361 = vrot.lane.b32.xlu1 %v3637_v58, %s9156_s27 }
 0x9cc   :  { %4456 = vrot.lane.b32.xlu1 %v3639_v39, %s9156_s27  ;;  %v3750_v39 = vmax.f32 %v10426_v10, 1e-24  ;;  %v3587_v10 = vmax.f32 %v10451_v5, 1e-24 }
 0x9d0   :  { %5271 = vrot.lane.b32.xlu1 %v9315_v60, %s9158_s30 }
 0x9d3   :  { %v2965_v22 = vpop.xlane.xlu1 %2964 }
 0x9d4   :  { %v2981_v25 = vsub.f32 %v10635_v32, %v2965_v22  ;;  %5275 = vrot.lane.b32.xlu1 %v9327_v0, %s9158_s30 }
 0x9d6   :  { %v3012_v55 = vmul.f32 1.442695, %v2981_v25 }
 0x9d7   :  { %v10749_v38 = vpop.xlane.xlu1 %2961 }
 0x9d8   :  { %8790 = vpow2.f32 %v3012_v55  ;;  %5110 = vrot.lane.b32.xlu1 %v9315_v60, %s9159_s8 }
 0x9d9   :  { %8792 = vrcp.f32 %v3019_v3 }
 0x9db   :  { %v3016_v26 = vpop.xlane.xlu1 %3015 }
 0x9dc   :  { %5114 = vrot.lane.b32.xlu1 %v9327_v0, %s9159_s8  ;;  %8794 = vrcp.f32 %v3016_v26  ;;  %v3751_v0 = vmax.f32 %v10484_v20, 1e-24 }
 0x9dd   :  { %8796 = vrsqrt.f32 %v3749_v41 }
 0x9de   :  { %8798 = vrsqrt.f32 %v3748_v54 }
 0x9df   :  { %8800 = vrsqrt.f32 %v3751_v0 }
 0x9e0   :  { %5283 = vrot.lane.b32.xlu1 %v9389_v17, %s9158_s30 }
 0x9e2   :  { %v10757_v32 = vpop.eup %8790 }
 0x9e3   :  { %v3059_v61 = vsel %vm1272_vm3, %v10757_v32, 0.0  ;;  %v8793_v60 = vpop.eup %8792  ;;  %v3025_v58 = vpop.xlane.xlu0 %3024 }
 0x9e4   :  { %5118 = vrot.lane.b32.xlu1 %v9395_v19, %s9159_s8  ;;  %3060 = vadd.xlane.f32.xlu0 %v3059_v61  ;;  %v3079_v12 = vmul.f32 %v8793_v60, %v10551_v28  ;;  %8802 = vrcp.f32 %v3025_v58 }
 0x9e5   :  { %8804 = vrsqrt.f32 %v3750_v39 }
 0x9e6   :  { %v8795_v40 = vpop.eup %8794 }
 0x9e7   :  { %v3078_v22 = vmul.f32 %v8795_v40, %v10645_v35  ;;  %v3031_v55 = vpop.xlane.xlu0 %3030  ;;  %v8797_v47 = vpop.eup %8796 }
 0x9e8   :  { %5122 = vrot.lane.b32.xlu1 %v9389_v17, %s9159_s8  ;;  %v8799_v35 = vpop.eup %8798  ;;  %v3781_v41 = vmul.f32 %v8797_v47, %v9309_v59  ;;  %v12296_v59 = vld [vmem:[#allocation16_spill] sm:$0xff] }
 0x9e9   :  { %v3094_v25 = vpack.c.bf16 %v3079_v12, %v3078_v22  ;;  %v8801_v3 = vpop.eup %8800  ;;  %v3780_v54 = vmul.f32 %v8799_v35, %v9299_v50 }
 0x9ea   :  { %v3783_v22 = vmul.f32 %v8801_v3, %v9305_v56 }
 0x9eb   :  { %v3022_v20 = vpop.xlane.xlu1 %3021  ;;  %7744 = vmatmul.mubr.msk.bf16.vlgmr.msra.gmra.mrb[36].mxu0 %vm1272_vm3, %v3094_v25 }
 0x9ec   :  { %8806 = vrcp.f32 %v3022_v20  ;;  %5291 = vrot.lane.b32.xlu1 %v9347_v7, %s9158_s30  ;;  %7754 = vmatpush3.bf16.msra.mxu0 %v10536_v46  ;;  %v3589_v46 = vmax.f32 %v10465_v57, 1e-24  ;;  %v12243_v57 = vld [vmem:[#allocation24_spill] sm:$0xff] }
 0x9ed   :  { %7755 = vmatprep.mubr.msk.bf16.mxu0 %vm9154_vm4, %v12180_v36  ;;  %8808 = vrsqrt.f32 %v3585_v24  ;;  %7765 = vmatprep.subr.bf16.mxu0 %v12180_v36 }
 0x9ee   :  { %8810 = vrcp.f32 %v3031_v55  ;;  %v8803_v26 = vpop.eup %8802 }
 0x9ef   :  { %v3028_v17 = vpop.xlane.xlu1 %3027  ;;  %v3037_v28 = vpop.xlane.xlu0 %3036  ;;  %v3081_v60 = vmul.f32 %v8803_v26, %v10653_v2 }
 0x9f0   :  { %5126 = vrot.lane.b32.xlu1 %v9337_v4, %s9159_s8  ;;  %8812 = vrcp.f32 %v3028_v17  ;;  %v8805_v5 = vpop.eup %8804 }
 0x9f1   :  { %8814 = vrsqrt.f32 %v3587_v10  ;;  %v3782_v12 = vmul.f32 %v8805_v5, %v12243_v57 }
 0x9f2   :  { %8816 = vrcp.f32 %v3037_v28 }
 0x9f3   :  { %8818 = vrsqrt.f32 %v3589_v46  ;;  %v3043_v58 = vpop.xlane.xlu0 %3042  ;;  %v8351_v17 = vpack.i.bf16 %v3783_v22, %v3782_v12  ;;  %v12249_v12 = vld [vmem:[#allocation38_spill] sm:$0xff] }
 0x9f4   :  { %5130 = vrot.lane.b32.xlu1 %v9347_v7, %s9159_s8  ;;  %v8346_v7 = vpack.i.bf16 %v3781_v41, %v3780_v54 }
 0x9f6   :  { %v8807_v61 = vpop.eup %8806 }
 0x9f7   :  { %v3080_v0 = vmul.f32 %v8807_v61, %v10664_v1  ;;  %v3034_v40 = vpop.xlane.xlu1 %3033  ;;  %v8809_v39 = vpop.eup %8808 }
 0x9f8   :  { %8820 = vrcp.f32 %v3034_v40  ;;  %5299 = vrot.lane.b32.xlu1 %v9413_v31, %s9158_s30  ;;  %v8811_v24 = vpop.eup %8810  ;;  %v3618_v20 = vmul.f32 %v8809_v39, %v10373_v52  ;;  %v12247_v39 = vld [vmem:[#allocation36_spill] sm:$0xff] }
 0x9f9   :  { %v3095_v25 = vpack.c.bf16 %v3081_v60, %v3080_v0  ;;  %8822 = vrcp.f32 %v3043_v58  ;;  %v3083_v55 = vmul.f32 %v8811_v24, %v10658_v37  ;;  %v8320_v0 = vunpack.i.h.bf16 %v10627_v53  ;;  %v12250_v24 = vld [vmem:[#allocation22_spill] sm:$0xff] }
 0x9fa   :  { %8347 = vrot.lane.b32.xlu0 %v8346_v7, %s9155_s11  ;;  %v8813_v2 = vpop.eup %8812  ;;  %v3634_v37 = vmul.f32 %v3618_v20, %v9265_v30  ;;  %v8319_v58 = vunpack.i.l.bf16 %v10627_v53  ;;  %v12248_v7 = vld [vmem:[#allocation34_spill] sm:$0xff] }
 0x9fb   :  { %7750 = vmatmul.mubr.msk.bf16.vlgmr.msra.gmra.mrb[44].mxu1 %vm1272_vm3, %v3095_v25  ;;  %v3040_v1 = vpop.xlane.xlu1 %3039  ;;  %v3082_v10 = vmul.f32 %v8813_v2, %v10668_v33  ;;  %v8815_v47 = vpop.eup %8814 }
 0x9fc   :  { %7760 = vmatpush3.bf16.msra.mxu1 %v10538_v45  ;;  %8824 = vrcp.f32 %v3040_v1  ;;  %7761 = vmatprep.mubr.msk.bf16.mxu1 %vm9154_vm4, %v12180_v36  ;;  %v8817_v35 = vpop.eup %8816  ;;  %v3620_v33 = vmul.f32 %v8815_v47, %v10373_v52  ;;  %v8113_v53 = vpack.c.bf16 %v8320_v0, %v8319_v58  ;;  %v12251_v1 = vld [vmem:[#allocation18_spill] sm:$0xff]  ;;  %v8339_v0 = vunpack.i.l.bf16 %v10731_v48 }
 0x9fd   :  { %7771 = vmatprep.subr.bf16.mxu1 %v12180_v36  ;;  %v3096_v28 = vpack.c.bf16 %v3083_v55, %v3082_v10  ;;  %v8819_v3 = vpop.eup %8818  ;;  %v3085_v46 = vmul.f32 %v8817_v35, %v10670_v21 }
 0x9fe   :  { %8352 = vrot.lane.b32.xlu0 %v8351_v17, %s9155_s11  ;;  %v3636_v5 = vmul.f32 %v3620_v33, %v9299_v50  ;;  %v3622_v61 = vmul.f32 %v8819_v3, %v10373_v52  ;;  %v12252_v17 = vld [vmem:[#allocation52_spill] sm:$0xff] }
 0x9ff   :  { %7756 = vmatmul.mubr.msk.bf16.vlgmr.msra.gmra.mrb[40].mxu0 %vm1272_vm3, %v3096_v28  ;;  %v8325_v47 = vunpack.i.h.bf16 %v12252_v17  ;;  %v8324_v28 = vunpack.i.l.bf16 %v12252_v17 }
 0xa00   :  { %7766 = vmatpush3.bf16.msra.mxu0 %v10620_v16  ;;  %7767 = vmatprep.mubr.msk.bf16.mxu0 %vm9154_vm4, %v12180_v36  ;;  %v2980_v16 = vsub.f32 %v10638_v14, %v10749_v38  ;;  %v3638_v52 = vmul.f32 %v3622_v61, %v12243_v57 }
 0xa01   :  { %7777 = vmatprep.subr.bf16.mxu0 %v12180_v36 }
 0xa02   :  { %v8821_v45 = vpop.eup %8820  ;;  %4264 = vrot.lane.b32.xlu0 %v3634_v37, %s9156_s27  ;;  %v3010_v38 = vmul.f32 1.442695, %v2980_v16  ;;  %v8340_v16 = vunpack.i.h.bf16 %v10731_v48 }
 0xa03   :  { %v3084_v26 = vmul.f32 %v8821_v45, %v10680_v11  ;;  %v8823_v41 = vpop.eup %8822 }
 0xa04   :  { %v3087_v21 = vmul.f32 %v8823_v41, %v10676_v43  ;;  %8826 = vpow2.f32 %v3010_v38  ;;  %v12245_v43 = vld [vmem:[#allocation21_spill] sm:$0xff]  ;;  %v8329_v41 = vunpack.i.l.bf16 %v10629_v29 }
 0xa05   :  { %v3097_v54 = vpack.c.bf16 %v3085_v46, %v3084_v26  ;;  %v10873_v46 = vpack.c.bf16 %v8325_v47, %v8324_v28  ;;  %v8330_v26 = vunpack.i.h.bf16 %v10629_v29 }
 0xa06   :  { %v8825_v60 = vpop.eup %8824  ;;  %4359 = vrot.lane.b32.xlu0 %v3636_v5, %s9156_s27 }
 0xa07   :  { %v3086_v11 = vmul.f32 %v8825_v60, %v10684_v13  ;;  %7762 = vmatmul.mubr.msk.bf16.vlgmr.msra.gmra.mrb[48].mxu1 %vm1272_vm3, %v3097_v54  ;;  %v12246_v13 = vld [vmem:[#allocation19_spill] sm:$0xff]  ;;  %v12254_v54 = vld [vmem:[#allocation37_spill] sm:$0xff]  ;;  %v12255_v60 = vld [vmem:[#allocation60_spill] sm:$0xff] }
 0xa08   :  { %7772 = vmatpush3.bf16.msra.mxu1 %v10540_v27  ;;  %7773 = vmatprep.mubr.msk.bf16.mxu1 %vm9154_vm4, %v12180_v36 }
 0xa09   :  { %v3098_v14 = vpack.c.bf16 %v3087_v21, %v3086_v11  ;;  %7783 = vmatprep.subr.bf16.mxu1 %v12180_v36  ;;  %v12256_v21 = vld [vmem:[#allocation35_spill] sm:$0xff]  ;;  %v8137_v11 = vpack.c.bf16 %v8340_v16, %v8339_v0 }
 0xa0a   :  { %4454 = vrot.lane.b32.xlu0 %v3638_v52, %s9156_s27  ;;  %v12257_v52 = vld [vmem:[#allocation63_spill] sm:$0xff] }
 0xa0b   :  { %7768 = vmatmul.mubr.msk.bf16.vlgmr.msra.gmra.mrb[44].mxu0 %vm1272_vm3, %v3098_v14 }
 0xa0c   :  { %7778 = vmatpush3.bf16.msra.mxu0 %v10625_v51  ;;  %7779 = vmatprep.mubr.msk.bf16.mxu0 %vm9154_vm4, %v12180_v36 }
 0xa0d   :  { %8115 = vmatprep.subr.msk.bf16.mxu0 %vm9575_vm2, %v8113_v53 }
 0xa0e   :  { %5269 = vrot.lane.b32.xlu0 %v12245_v43, %s9158_s30  ;;  %v10841_v40 = vpop.eup %8826 }
 0xa0f   :  { %v3056_v51 = vsel %vm1272_vm3, %v10841_v40, 0.0 }
 0xa12   :  { %5273 = vrot.lane.b32.xlu0 %v12246_v13, %s9158_s30 }
 0xa16   :  { %5108 = vrot.lane.b32.xlu0 %v12245_v43, %s9159_s8 }
 0xa1a   :  { %5112 = vrot.lane.b32.xlu0 %v12246_v13, %s9159_s8 }
 0xa1c   :  { %3057 = vadd.xlane.f32.xlu1 %v3056_v51 }
 0xa1e   :  { %5277 = vrot.lane.b32.xlu0 %v12247_v39, %s9158_s30 }
 0xa22   :  { %5279 = vrot.lane.b32.xlu0 %v9395_v19, %s9158_s30 }
 0xa26   :  { %5281 = vrot.lane.b32.xlu0 %v12248_v7, %s9158_s30 }
 0xa2a   :  { %5116 = vrot.lane.b32.xlu0 %v12247_v39, %s9159_s8 }
 0xa2c   :  { %v3049_v22 = vpop.xlane.xlu0 %3048 }
 0xa2d   :  { %5134 = vrot.lane.b32.xlu1 %v12249_v12, %s9159_s8  ;;  %8828 = vrcp.f32 %v3049_v22 }
 0xa2e   :  { %5120 = vrot.lane.b32.xlu0 %v12248_v7, %s9159_s8 }
 0xa30   :  { %v3055_v25 = vpop.xlane.xlu0 %3054 }
 0xa32   :  { %5285 = vrot.lane.b32.xlu0 %v12250_v24, %s9158_s30 }
 0xa34   :  { %v3046_v2 = vpop.xlane.xlu1 %3045 }
 0xa35   :  { %8830 = vrcp.f32 %v3046_v2 }
 0xa36   :  { %5287 = vrot.lane.b32.xlu0 %v9337_v4, %s9158_s30  ;;  %8832 = vrcp.f32 %v3055_v25 }
 0xa37   :  { %v8829_v55 = vpop.eup %8828 }
 0xa38   :  { %v3052_v19 = vpop.xlane.xlu1 %3051  ;;  %v3089_v35 = vmul.f32 %v8829_v55, %v10696_v18 }
 0xa39   :  { %8834 = vrcp.f32 %v3052_v19 }
 0xa3a   :  { %5289 = vrot.lane.b32.xlu0 %v12251_v1, %s9158_s30 }
 0xa3c   :  { %v4170_v20 = vpop.permute.xlu1 %4169 }
 0xa3e   :  { %5124 = vrot.lane.b32.xlu0 %v12250_v24, %s9159_s8 }
 0xa3f   :  { %v8831_v10 = vpop.eup %8830 }
 0xa40   :  { %v3088_v4 = vmul.f32 %v8831_v10, %v10704_v34  ;;  %v4172_v37 = vpop.permute.xlu1 %4171  ;;  %v8833_v33 = vpop.eup %8832  ;;  %v12253_v34 = vld [vmem:[#allocation59_spill] sm:$0xff] }
 0xa41   :  { %v3091_v5 = vmul.f32 %v8833_v33, %v10700_v23  ;;  %v8125_v23 = vpack.c.bf16 %v8330_v26, %v8329_v41 }
 0xa42   :  { %5128 = vrot.lane.b32.xlu0 %v12251_v1, %s9159_s8  ;;  %v3099_v3 = vpack.c.bf16 %v3089_v35, %v3088_v4 }
 0xa43   :  { %v8835_v45 = vpop.eup %8834 }
 0xa44   :  { %v3090_v61 = vmul.f32 %v8835_v45, %v10709_v9  ;;  %7774 = vmatmul.mubr.msk.bf16.vlgmr.msra.gmra.mrb[52].mxu1 %vm1272_vm3, %v3099_v3  ;;  %v10880_v18 = vpop.permute.xlu1 %4266 }
 0xa45   :  { %7784 = vmatpush3.bf16.msra.mxu1 %v12253_v34  ;;  %7785 = vmatprep.mubr.msk.bf16.mxu1 %vm9154_vm4, %v12180_v36 }
 0xa46   :  { %8121 = vmatprep.subr.msk.bf16.mxu1 %vm9575_vm2, %v10873_v46  ;;  %5293 = vrot.lane.b32.xlu0 %v12254_v54, %s9158_s30  ;;  %v3100_v29 = vpack.c.bf16 %v3091_v5, %v3090_v61 }
 0xa48   :  { %7780 = vmatmul.mubr.msk.bf16.vlgmr.msra.gmra.mrb[48].mxu0 %vm1272_vm3, %v3100_v29  ;;  %v4362_v9 = vpop.permute.xlu1 %4361 }
 0xa49   :  { %8118 = vmatpush3.bf16.xpose.msk.msra.mxu0 %vm9575_vm2, %v8113_v53  ;;  %7793 = vmatprep.mubr.msk.f32.mxu0 %vm268_vm1, %v12255_v60 }
 0xa4a   :  { %8127 = vmatprep.subr.msk.bf16.mxu0 %vm9575_vm2, %v8125_v23  ;;  %5295 = vrot.lane.b32.xlu0 %v12249_v12, %s9158_s30 }
 0xa4c   :  { %v10901_v58 = vpop.permute.xlu1 %4456 }
 0xa4e   :  { %5297 = vrot.lane.b32.xlu0 %v12256_v21, %s9158_s30 }
 0xa50   :  { %7794 = vmatmul.mubr.msk.f32.vlgmr.msra.gmra.mrb[52].mxu0 %vm268_vm1, %v12257_v52  ;;  %v5272_v14 = vpop.permute.xlu1 %5271 }
 0xa51   :  { %8130 = vmatpush3.bf16.xpose.msk.msra.mxu0 %vm9575_vm2, %v8125_v23  ;;  %7807 = vmatprep.mubr.msk.f32.mxu0 %vm268_vm1, %v10726_v63  ;;  %v5320_v38 = vsel %vm268_vm1, %v5272_v14, 0.0 }
 0xa52   :  { %8139 = vmatprep.subr.msk.bf16.mxu0 %vm9575_vm2, %v8137_v11  ;;  %5132 = vrot.lane.b32.xlu0 %v12254_v54, %s9159_s8 }
 0xa53   :  { %5321 = vadd.xlane.f32.xlu1 %v5320_v38 }
 0xa54   :  { %v5276_v63 = vpop.permute.xlu1 %5275 }
 0xa55   :  { %v5326_v47 = vsel %vm268_vm1, %v5276_v63, 0.0 }
 0xa56   :  { %5136 = vrot.lane.b32.xlu0 %v12256_v21, %s9159_s8 }
 0xa58   :  { %7808 = vmatmul.mubr.msk.f32.vlgmr.msra.gmra.mrb[54].mxu0 %vm268_vm1, %v10734_v62  ;;  %v5111_v53 = vpop.permute.xlu1 %5110 }
 0xa59   :  { %8142 = vmatpush3.bf16.xpose.msk.msra.mxu0 %vm9575_vm2, %v8137_v11  ;;  %7821 = vmatprep.mubr.msk.f32.mxu0 %vm268_vm1, %v4170_v20 }
 0xa5a   :  { %5138 = vrot.lane.b32.xlu0 %v9413_v31, %s9159_s8 }
 0xa5c   :  { %v5115_v62 = vpop.permute.xlu1 %5114 }
 0xa5d   :  { %v5165_v5 = vsel %vm268_vm1, %v5115_v62, 0.0 }
 0xa60   :  { %7822 = vmatmul.mubr.msk.f32.vlgmr.msra.gmra.mrb[56].mxu0 %vm268_vm1, %v4172_v37  ;;  %v5284_v12 = vpop.permute.xlu1 %5283  ;;  %v5159_v37 = vsel %vm268_vm1, %v5111_v53, 0.0 }
 0xa61   :  { %v5338_v29 = vsel %vm268_vm1, %v5284_v12, 0.0 }
 0xa64   :  { %v5119_v25 = vpop.permute.xlu1 %5118 }
 0xa65   :  { %v5171_v16 = vsel %vm268_vm1, %v5119_v25, 0.0 }
 0xa68   :  { %v5123_v1 = vpop.permute.xlu1 %5122 }
 0xa6c   :  { %v5292_v28 = vpop.permute.xlu1 %5291 }
 0xa70   :  { %v5127_v33 = vpop.permute.xlu1 %5126 }
 0xa71   :  { %v3061_v48 = vpop.xlane.xlu0 %3060 }
 0xa72   :  { %8836 = vrcp.f32 %v3061_v48  ;;  %v12258_v48 = vld [vmem:[#allocation20_spill] sm:$0xff] }
 0xa74   :  { %v10950_v61 = vpop.permute.xlu1 %5130 }
 0xa75   :  { %v8348_v43 = vpop.permute.xlu0 %8347 }
 0xa76   :  { %v8350_v13 = vunpack.i.h.bf16 %v8348_v43  ;;  %v8349_v51 = vunpack.i.l.bf16 %v8348_v43  ;;  %v5177_v43 = vsel %vm268_vm1, %v5123_v1, 0.0 }
 0xa78   :  { %v8149_v39 = vpack.c.bf16 %v8350_v13, %v8349_v51  ;;  %v10954_v23 = vpop.permute.xlu1 %5299  ;;  %v8335_v51 = vunpack.i.h.bf16 %v12258_v48 }
 0xa79   :  { %v10926_v7 = vpop.permute.xlu0 %8352 }
 0xa7a   :  { %8151 = vmatprep.subr.msk.bf16.mxu0 %vm9575_vm2, %v8149_v39 }
 0xa7b   :  { %8154 = vmatpush3.bf16.xpose.msk.msra.mxu0 %vm9575_vm2, %v8149_v39  ;;  %v8334_v39 = vunpack.i.l.bf16 %v12258_v48 }
 0xa7c   :  { %7845 = vmatprep.subr.bf16.mxu0 %v12180_v36  ;;  %v8837_v63 = vpop.eup %8836 }
 0xa7d   :  { %v10933_v31 = vpop.permute.xlu0 %4264  ;;  %v3093_v62 = vmul.f32 %v8837_v63, %v10757_v32  ;;  %v8131_v1 = vpack.c.bf16 %v8335_v51, %v8334_v39 }
 0xa81   :  { %v4360_v22 = vpop.permute.xlu0 %4359 }
 0xa82   :  { %7835 = vmatprep.mubr.msk.f32.mxu0 %vm268_vm1, %v4360_v22 }
 0xa83   :  { %7836 = vmatmul.mubr.msk.f32.vlgmr.msra.gmra.mrb[58].mxu0 %vm268_vm1, %v4362_v9 }
 0xa84   :  { %7847 = vmatprep.mubr.msk.bf16.mxu0 %vm9154_vm4, %v12180_v36 }
 0xa85   :  { %v10939_v24 = vpop.permute.xlu0 %4454 }
 0xa89   :  { %v5270_v2 = vpop.permute.xlu0 %5269 }
 0xa8a   :  { %v5317_v19 = vsel %vm268_vm1, %v5270_v2, 0.0  ;;  %v5350_v2 = vsel %vm268_vm1, %v5292_v28, 0.0 }
 0xa8b   :  { %5318 = vadd.xlane.f32.xlu0 %v5317_v19 }
 0xa8d   :  { %v5274_v20 = vpop.permute.xlu0 %5273 }
 0xa8e   :  { %v5323_v55 = vsel %vm268_vm1, %v5274_v20, 0.0 }
 0xa8f   :  { %5324 = vadd.xlane.f32.xlu0 %v5323_v55  ;;  %v12259_v55 = vld [vmem:[#allocation68_spill] sm:$0xff] }
 0xa91   :  { %v5109_v10 = vpop.permute.xlu0 %5108 }
 0xa92   :  { %v5156_v17 = vsel %vm268_vm1, %v5109_v10, 0.0  ;;  %v8345_v10 = vunpack.i.h.bf16 %v10738_v44 }
 0xa93   :  { %5157 = vadd.xlane.f32.xlu1 %v5156_v17  ;;  %5327 = vadd.xlane.f32.xlu0 %v5326_v47  ;;  %v8344_v17 = vunpack.i.l.bf16 %v10738_v44 }
 0xa95   :  { %v5113_v35 = vpop.permute.xlu0 %5112 }
 0xa96   :  { %v5162_v4 = vsel %vm268_vm1, %v5113_v35, 0.0 }
 0xa97   :  { %5163 = vadd.xlane.f32.xlu1 %v5162_v4  ;;  %5160 = vadd.xlane.f32.xlu0 %v5159_v37  ;;  %v8143_v4 = vpack.c.bf16 %v8345_v10, %v8344_v17  ;;  %v12275_v10 = vld [vmem:[#allocation46_spill] sm:$0xff]  ;;  %v12276_v17 = vld [vmem:[#allocation41_spill] sm:$0xff] }
 0xa99   :  { %v5278_v3 = vpop.permute.xlu0 %5277 }
 0xa9a   :  { %v5329_v45 = vsel %vm268_vm1, %v5278_v3, 0.0 }
 0xa9b   :  { %5330 = vadd.xlane.f32.xlu0 %v5329_v45  ;;  %v12262_v45 = vld [vmem:[#allocation67_spill] sm:$0xff] }
 0xa9d   :  { %v5280_v26 = vpop.permute.xlu0 %5279 }
 0xa9e   :  { %v5332_v41 = vsel %vm268_vm1, %v5280_v26, 0.0 }
 0xa9f   :  { %5333 = vadd.xlane.f32.xlu1 %v5332_v41  ;;  %5166 = vadd.xlane.f32.xlu0 %v5165_v5  ;;  %v8355_v41 = vunpack.i.h.bf16 %v10926_v7  ;;  %v8354_v5 = vunpack.i.l.bf16 %v10926_v7 }
 0xaa1   :  { %v5282_v34 = vpop.permute.xlu0 %5281 }
 0xaa2   :  { %v5335_v54 = vsel %vm268_vm1, %v5282_v34, 0.0 }
 0xaa3   :  { %5336 = vadd.xlane.f32.xlu1 %v5335_v54  ;;  %5339 = vadd.xlane.f32.xlu0 %v5338_v29  ;;  %v5189_v29 = vsel %vm268_vm1, %v10950_v61, 0.0  ;;  %v5362_v61 = vsel %vm268_vm1, %v10954_v23, 0.0 }
 0xaa5   :  { %v5117_v9 = vpop.permute.xlu0 %5116 }
 0xaa6   :  { %v5168_v60 = vsel %vm268_vm1, %v5117_v9, 0.0  ;;  %v8155_v9 = vpack.c.bf16 %v8355_v41, %v8354_v5 }
 0xaa7   :  { %5169 = vadd.xlane.f32.xlu1 %v5168_v60  ;;  %5172 = vadd.xlane.f32.xlu0 %v5171_v16 }
 0xaa9   :  { %v5121_v0 = vpop.permute.xlu0 %5120  ;;  %v3058_v21 = vpop.xlane.xlu1 %3057 }
 0xaaa   :  { %8838 = vrcp.f32 %v3058_v21  ;;  %v5174_v11 = vsel %vm268_vm1, %v5121_v0, 0.0 }
 0xaab   :  { %5175 = vadd.xlane.f32.xlu1 %v5174_v11 }
 0xaad   :  { %v5286_v52 = vpop.permute.xlu0 %5285  ;;  %v5135_v60 = vpop.permute.xlu1 %5134 }
 0xaae   :  { %v5341_v14 = vsel %vm268_vm1, %v5286_v52, 0.0 }
 0xaaf   :  { %5342 = vadd.xlane.f32.xlu0 %v5341_v14 }
 0xab1   :  { %v5288_v38 = vpop.permute.xlu0 %5287 }
 0xab2   :  { %v5344_v53 = vsel %vm268_vm1, %v5288_v38, 0.0 }
 0xab3   :  { %5345 = vadd.xlane.f32.xlu1 %v5344_v53  ;;  %5178 = vadd.xlane.f32.xlu0 %v5177_v43 }
 0xab4   :  { %v8839_v13 = vpop.eup %8838 }
 0xab5   :  { %v3092_v12 = vmul.f32 %v8839_v13, %v10841_v40  ;;  %v5290_v22 = vpop.permute.xlu0 %5289  ;;  %v5183_v40 = vsel %vm268_vm1, %v5127_v33, 0.0 }
 0xab6   :  { %v5347_v25 = vsel %vm268_vm1, %v5290_v22, 0.0 }
 0xab7   :  { %5348 = vadd.xlane.f32.xlu1 %v5347_v25  ;;  %5351 = vadd.xlane.f32.xlu0 %v5350_v2  ;;  %v3101_v19 = vpack.c.bf16 %v3093_v62, %v3092_v12 }
 0xab9   :  { %v5125_v20 = vpop.permute.xlu0 %5124  ;;  %7786 = vmatmul.mubr.msk.bf16.vlgmr.msra.gmra.mrb[56].mxu1 %vm1272_vm3, %v3101_v19 }
 0xaba   :  { %8124 = vmatpush3.bf16.xpose.msk.msra.mxu1 %vm9575_vm2, %v10873_v46  ;;  %7800 = vmatprep.mubr.msk.f32.mxu1 %vm268_vm1, %v12259_v55  ;;  %v5180_v32 = vsel %vm268_vm1, %v5125_v20, 0.0  ;;  %v12271_v20 = vld [vmem:[#allocation43_spill] sm:$0xff]  ;;  %v12272_v55 = vld [vmem:[#allocation44_spill] sm:$0xff] }
 0xabb   :  { %8133 = vmatprep.subr.msk.bf16.mxu1 %vm9575_vm2, %v8131_v1  ;;  %5181 = vadd.xlane.f32.xlu1 %v5180_v32  ;;  %v12273_v32 = vld [vmem:[#allocation45_spill] sm:$0xff] }
 0xabc   :  { %5184 = vadd.xlane.f32.xlu0 %v5183_v40  ;;  %v12274_v40 = vld [vmem:[#allocation40_spill] sm:$0xff] }
 0xabd   :  { %v5129_v47 = vpop.permute.xlu0 %5128 }
 0xabe   :  { %v5186_v28 = vsel %vm268_vm1, %v5129_v47, 0.0  ;;  %v10981_v46 = vpop.f32.mrb[36].mxu0 }
 0xabf   :  { %12260 = vst [vmem:[#allocation21_spill] sm:$0xff] %v10981_v46  ;;  %5187 = vadd.xlane.f32.xlu1 %v5186_v28  ;;  %v7745_v35 = vpop.f32.mrb[37].mxu0 }
 0xac0   :  { %v10983_v37 = vpop.f32.mrb[38].mxu0 }
 0xac1   :  { %12261 = vst [vmem:[#allocation19_spill] sm:$0xff] %v10983_v37  ;;  %v5294_v3 = vpop.permute.xlu0 %5293  ;;  %7801 = vmatmul.mubr.msk.f32.vlgmr.msra.gmra.mrb[60].mxu1 %vm268_vm1, %v12262_v45  ;;  %v7746_v26 = vpop.f32.mrb[39].mxu0 }
 0xac2   :  { %8136 = vmatpush3.bf16.xpose.msk.msra.mxu1 %vm9575_vm2, %v8131_v1  ;;  %7814 = vmatprep.mubr.msk.f32.mxu1 %vm268_vm1, %v10744_v8  ;;  %v5353_v44 = vsel %vm268_vm1, %v5294_v3, 0.0 }
 0xac3   :  { %8145 = vmatprep.subr.msk.bf16.mxu1 %vm9575_vm2, %v8143_v4  ;;  %5354 = vadd.xlane.f32.xlu0 %v5353_v44 }
 0xac5   :  { %v5296_v34 = vpop.permute.xlu0 %5295 }
 0xac6   :  { %v5356_v54 = vsel %vm268_vm1, %v5296_v34, 0.0 }
 0xac7   :  { %5357 = vadd.xlane.f32.xlu1 %v5356_v54  ;;  %5190 = vadd.xlane.f32.xlu0 %v5189_v29 }
 0xac9   :  { %7815 = vmatmul.mubr.msk.f32.vlgmr.msra.gmra.mrb[62].mxu1 %vm268_vm1, %v10740_v42  ;;  %v5298_v8 = vpop.permute.xlu0 %5297 }
 0xaca   :  { %8148 = vmatpush3.bf16.xpose.msk.msra.mxu1 %vm9575_vm2, %v8143_v4  ;;  %7828 = vmatprep.mubr.msk.f32.mxu1 %vm268_vm1, %v10933_v31  ;;  %v5359_v7 = vsel %vm268_vm1, %v5298_v8, 0.0  ;;  %v5195_v31 = vsel %vm268_vm1, %v5135_v60, 0.0  ;;  %v11083_v8 = vld [vmem:[#allocation9 + $0x28] sm:$0xff] }
 0xacb   :  { %8157 = vmatprep.subr.msk.bf16.mxu1 %vm9575_vm2, %v8155_v9  ;;  %5360 = vadd.xlane.f32.xlu1 %v5359_v7  ;;  %v11085_v7 = vld [vmem:[#allocation9 + $0x20] sm:$0xff] }
 0xacc   :  { %5363 = vadd.xlane.f32.xlu0 %v5362_v61 }
 0xacd   :  { %v5133_v16 = vpop.permute.xlu0 %5132 }
 0xace   :  { %v11012_v42 = vpop.f32.mrb[44].mxu1  ;;  %v5192_v0 = vsel %vm268_vm1, %v5133_v16, 0.0 }
 0xacf   :  { %12263 = vst [vmem:[#allocation36_spill] sm:$0xff] %v11012_v42  ;;  %v7751_v21 = vpop.f32.mrb[45].mxu1  ;;  %5193 = vadd.xlane.f32.xlu1 %v5192_v0 }
 0xad0   :  { %5196 = vadd.xlane.f32.xlu0 %v5195_v31  ;;  %v11016_v11 = vpop.f32.mrb[46].mxu1 }
 0xad1   :  { %12264 = vst [vmem:[#allocation34_spill] sm:$0xff] %v11016_v11  ;;  %7829 = vmatmul.mubr.msk.f32.vlgmr.msra.gmra.mrb[64].mxu1 %vm268_vm1, %v10880_v18  ;;  %v5137_v23 = vpop.permute.xlu0 %5136  ;;  %v7752_v14 = vpop.f32.mrb[47].mxu1 }
 0xad2   :  { %8160 = vmatpush3.bf16.xpose.msk.msra.mxu1 %vm9575_vm2, %v8155_v9  ;;  %7842 = vmatprep.mubr.msk.f32.mxu1 %vm268_vm1, %v10939_v24  ;;  %v5198_v38 = vsel %vm268_vm1, %v5137_v23, 0.0  ;;  %v11027_v63 = vpop.f32.mrb[40].mxu0 }
 0xad3   :  { %12265 = vst [vmem:[#allocation38_spill] sm:$0xff] %v11027_v63  ;;  %5199 = vadd.xlane.f32.xlu1 %v5198_v38  ;;  %7851 = vmatprep.subr.bf16.mxu1 %v12180_v36  ;;  %v7757_v53 = vpop.f32.mrb[41].mxu0 }
 0xad4   :  { %v11030_v43 = vpop.f32.mrb[42].mxu0 }
 0xad5   :  { %12266 = vst [vmem:[#allocation22_spill] sm:$0xff] %v11030_v43  ;;  %v5139_v13 = vpop.permute.xlu0 %5138  ;;  %v7758_v48 = vpop.f32.mrb[43].mxu0 }
 0xad6   :  { %v5201_v51 = vsel %vm268_vm1, %v5139_v13, 0.0 }
 0xad7   :  { %5202 = vadd.xlane.f32.xlu0 %v5201_v51 }
 0xad9   :  { %7843 = vmatmul.mubr.msk.f32.vlgmr.msra.gmra.mrb[66].mxu1 %vm268_vm1, %v10901_v58  ;;  %v12281_v58 = vld [vmem:[#allocation42_spill] sm:$0xff] }
 0xada   :  { %v11037_v24 = vpop.f32.mrb[48].mxu1  ;;  %7853 = vmatprep.mubr.msk.bf16.mxu1 %vm9154_vm4, %v12180_v36 }
 0xadb   :  { %12267 = vst [vmem:[#allocation18_spill] sm:$0xff] %v11037_v24  ;;  %v7763_v39 = vpop.f32.mrb[49].mxu1 }
 0xadc   :  { %v11041_v62 = vpop.f32.mrb[50].mxu1 }
 0xadd   :  { %12268 = vst [vmem:[#allocation52_spill] sm:$0xff] %v11041_v62  ;;  %v7764_v22 = vpop.f32.mrb[51].mxu1 }
 0xade   :  { %v11045_v25 = vpop.f32.mrb[44].mxu0 }
 0xadf   :  { %12269 = vst [vmem:[#allocation59_spill] sm:$0xff] %v11045_v25  ;;  %v7769_v2 = vpop.f32.mrb[45].mxu0 }
 0xae0   :  { %v11047_v19 = vpop.f32.mrb[46].mxu0  ;;  %v11079_v29 = vpop.xlane.xlu1 %5321 }
 0xae1   :  { %12270 = vst [vmem:[#allocation37_spill] sm:$0xff] %v11047_v19  ;;  %v7770_v1 = vpop.f32.mrb[47].mxu0 }
 0xae4   :  { %4731 = vrot.lane.b32.xlu1 %v12271_v20, %s9160_s9  ;;  %v12283_v20 = vld [vmem:[#allocation27_spill] sm:$0xff] }
 0xae8   :  { %4825 = vrot.lane.b32.xlu1 %v12272_v55, %s9160_s9 }
 0xaec   :  { %4872 = vrot.lane.b32.xlu1 %v12273_v32, %s9160_s9  ;;  %v12282_v32 = vld [vmem:[#allocation17_spill] sm:$0xff] }
 0xaed   :  { %4778 = vrot.lane.b32.xlu0 %v12274_v40, %s9160_s9 }
 0xaf0   :  { %4966 = vrot.lane.b32.xlu1 %v12275_v10, %s9160_s9 }
 0xaf1   :  { %4919 = vrot.lane.b32.xlu0 %v12276_v17, %s9160_s9 }
 0xb17   :  { %v11063_v47 = vpop.f32.mrb[52].mxu1 }
 0xb18   :  { %12277 = vst [vmem:[#allocation60_spill] sm:$0xff] %v11063_v47  ;;  %v11065_v28 = vpop.xlane.xlu0 %5318  ;;  %v7775_v35 = vpop.f32.mrb[53].mxu1 }
 0xb19   :  { %v11067_v4 = vpop.f32.mrb[54].mxu1  ;;  %v5365_v46 = vmax.f32 %v11065_v28, 1e-24 }
 0xb1a   :  { %12278 = vst [vmem:[#allocation35_spill] sm:$0xff] %v11067_v4  ;;  %v7776_v45 = vpop.f32.mrb[55].mxu1 }
 0xb1b   :  { %v11071_v26 = vpop.f32.mrb[48].mxu0  ;;  %8840 = vrsqrt.f32 %v5365_v46  ;;  %v12284_v46 = vld [vmem:[#allocation30_spill] sm:$0xff] }
 0xb1c   :  { %12279 = vst [vmem:[#allocation63_spill] sm:$0xff] %v11071_v26  ;;  %v11073_v44 = vpop.xlane.xlu0 %5324  ;;  %v7781_v41 = vpop.f32.mrb[49].mxu0 }
 0xb1d   :  { %v11075_v5 = vpop.f32.mrb[50].mxu0 }
 0xb1e   :  { %12280 = vst [vmem:[#allocation20_spill] sm:$0xff] %v11075_v5  ;;  %v7782_v54 = vpop.f32.mrb[51].mxu0 }
 0xb20   :  { %v11081_v9 = vpop.xlane.xlu0 %5327  ;;  %v11087_v61 = vpop.xlane.xlu1 %5157 }
 0xb23   :  { %v7795_v60 = vpop.f32.mrb[52].mxu0 }
 0xb24   :  { %v11090_v16 = vadd.f32 %v7795_v60, %v11083_v8  ;;  %v3873_v0 = vpop.f32.mrb[53].mxu0  ;;  %v11092_v21 = vpop.xlane.xlu0 %5160 }
 0xb25   :  { %v11095_v31 = vadd.f32 %v3873_v0, %v11085_v7  ;;  %v11101_v53 = vpop.xlane.xlu1 %5163 }
 0xb26   :  { %v4550_v23 = vsel %vm1272_vm3, %v11090_v16, -inf }
 0xb27   :  { %4551 = vmax.xlane.f32.xlu1 %v4550_v23  ;;  %v4547_v14 = vsel %vm1272_vm3, %v11095_v31, -inf }
 0xb28   :  { %v5331_v38 = vpop.xlane.xlu0 %5330  ;;  %4548 = vmax.xlane.f32.xlu0 %v4547_v14 }
 0xb2b   :  { %v11103_v13 = vpop.f32.mrb[54].mxu0 }
 0xb2c   :  { %v4063_v48 = vpop.f32.mrb[55].mxu0  ;;  %v11105_v51 = vpop.xlane.xlu0 %5166 }
 0xb2d   :  { %v11108_v39 = vadd.f32 %v4063_v48, %v11085_v7  ;;  %v5334_v22 = vpop.xlane.xlu1 %5333 }
 0xb2e   :  { %v5370_v10 = vmax.f32 %v5334_v22, 1e-24 }
 0xb2f   :  { %v4559_v2 = vsel %vm1272_vm3, %v11108_v39, -inf }
 0xb30   :  { %4560 = vmax.xlane.f32.xlu0 %v4559_v2  ;;  %v5340_v35 = vpop.xlane.xlu0 %5339 }
 0xb31   :  { %v5337_v1 = vpop.xlane.xlu1 %5336  ;;  %v5372_v17 = vmax.f32 %v5340_v35, 1e-24 }
 0xb33   :  { %v11112_v45 = vpop.f32.mrb[56].mxu0 }
 0xb34   :  { %v4253_v41 = vpop.f32.mrb[57].mxu0  ;;  %v11121_v23 = vpop.xlane.xlu0 %5172 }
 0xb35   :  { %v11115_v54 = vadd.f32 %v4253_v41, %v11085_v7  ;;  %v11117_v60 = vpop.xlane.xlu1 %5169 }
 0xb37   :  { %v4571_v0 = vsel %vm1272_vm3, %v11115_v54, -inf }
 0xb38   :  { %4572 = vmax.xlane.f32.xlu0 %v4571_v0 }
 0xb39   :  { %v11123_v14 = vpop.xlane.xlu1 %5175 }
 0xb3c   :  { %v11125_v48 = vpop.xlane.xlu0 %5342 }
 0xb40   :  { %v11127_v2 = vpop.xlane.xlu0 %5178  ;;  %v11129_v34 = vpop.xlane.xlu1 %5345 }
 0xb44   :  { %v11131_v3 = vpop.xlane.xlu1 %5348  ;;  %v11133_v41 = vpop.xlane.xlu0 %5351 }
 0xb48   :  { %v11135_v12 = vpop.xlane.xlu1 %5181 }
 0xb49   :  { %v11137_v52 = vpop.xlane.xlu0 %5184 }
 0xb4c   :  { %v11141_v0 = vpop.xlane.xlu1 %5187 }
 0xb4e   :  { %5013 = vrot.lane.b32.xlu0 %v12281_v58, %s9160_s9  ;;  %v5366_v58 = vmax.f32 %v11079_v29, 1e-24 }
 0xb50   :  { %v11143_v18 = vpop.xlane.xlu0 %5354  ;;  %8842 = vrsqrt.f32 %v5366_v58 }
 0xb51   :  { %8844 = vrsqrt.f32 %v5370_v10  ;;  %v12285_v10 = vld [vmem:[#allocation25_spill] sm:$0xff] }
 0xb54   :  { %v11145_v33 = vpop.xlane.xlu0 %5190  ;;  %v11147_v26 = vpop.xlane.xlu1 %5357 }
 0xb56   :  { %v11149_v5 = vpop.f32.mrb[58].mxu0 }
 0xb57   :  { %v4443_v47 = vpop.f32.mrb[59].mxu0 }
 0xb58   :  { %v11151_v4 = vpop.xlane.xlu1 %5360  ;;  %v11165_v63 = vadd.f32 %v4443_v47, %v11085_v7  ;;  %v5371_v47 = vmax.f32 %v5337_v1, 1e-24 }
 0xb59   :  { %v11153_v24 = vpop.xlane.xlu0 %5363 }
 0xb5a   :  { %v4583_v37 = vsel %vm1272_vm3, %v11165_v63, -inf }
 0xb5c   :  { %v11155_v62 = vpop.xlane.xlu1 %5193 }
 0xb5d   :  { %v11157_v42 = vpop.xlane.xlu0 %5196 }
 0xb60   :  { %v11159_v11 = vpop.xlane.xlu1 %5199 }
 0xb64   :  { %v11161_v25 = vpop.xlane.xlu0 %5202  ;;  %v4732_v19 = vpop.permute.xlu1 %4731 }
 0xb65   :  { %7846 = vmatpush3.bf16.msra.mxu0 %v4732_v19  ;;  %v5369_v19 = vmax.f32 %v5331_v38, 1e-24 }
 0xb66   :  { %7857 = vmatprep.subr.bf16.mxu0 %v12180_v36 }
 0xb67   :  { %8846 = vrsqrt.f32 %v5369_v19  ;;  %v12287_v19 = vld [vmem:[#allocation28_spill] sm:$0xff] }
 0xb68   :  { %v4779_v43 = vpop.permute.xlu0 %4778  ;;  %8848 = vrsqrt.f32 %v5372_v17  ;;  %v12286_v17 = vld [vmem:[#allocation23_spill] sm:$0xff] }
 0xb69   :  { %7852 = vmatpush3.bf16.msra.mxu1 %v4779_v43  ;;  %8850 = vrsqrt.f32 %v5371_v47  ;;  %v8841_v43 = vpop.eup %8840 }
 0xb6a   :  { %7863 = vmatprep.subr.bf16.mxu1 %v12180_v36  ;;  %v8843_v40 = vpop.eup %8842  ;;  %v5397_v28 = vmul.f32 %v8841_v43, %v12282_v32 }
 0xb6b   :  { %v8845_v55 = vpop.eup %8844  ;;  %v5398_v27 = vmul.f32 %v8843_v40, %v12283_v20 }
 0xb6c   :  { %v5402_v22 = vmul.f32 %v8845_v55, %v12284_v46 }
 0xb6d   :  { %4584 = vmax.xlane.f32.xlu0 %v4583_v37  ;;  %v8356_v29 = vpack.i.bf16 %v5398_v27, %v5397_v28 }
 0xb71   :  { %v8847_v37 = vpop.eup %8846 }
 0xb72   :  { %v8849_v36 = vpop.eup %8848  ;;  %v5401_v38 = vmul.f32 %v8847_v37, %v12285_v10 }
 0xb73   :  { %v8851_v58 = vpop.eup %8850  ;;  %v5404_v47 = vmul.f32 %v8849_v36, %v12287_v19  ;;  %v11192_v36 = vadd.f32 %v11103_v13, %v11083_v8 }
 0xb74   :  { %v8366_v1 = vpack.i.bf16 %v5402_v22, %v5401_v38  ;;  %v5403_v35 = vmul.f32 %v8851_v58, %v12286_v17 }
 0xb76   :  { %v8371_v43 = vpack.i.bf16 %v5404_v47, %v5403_v35  ;;  %v4562_v35 = vsel %vm1272_vm3, %v11192_v36, -inf }
 0xb83   :  { %8357 = vrot.lane.b32.xlu0 %v8356_v29, %s9158_s30 }
 0xb87   :  { %8367 = vrot.lane.b32.xlu0 %v8366_v1, %s9158_s30 }
 0xb8b   :  { %8372 = vrot.lane.b32.xlu0 %v8371_v43, %s9158_s30 }
 0xb8c   :  { %v11181_v40 = vpop.f32.mrb[56].mxu1 }
 0xb8d   :  { %12288 = vst [vmem:[#allocation68_spill] sm:$0xff] %v11181_v40  ;;  %v7787_v27 = vpop.f32.mrb[57].mxu1 }
 0xb8e   :  { %v11183_v28 = vpop.f32.mrb[58].mxu1 }
 0xb8f   :  { %12289 = vst [vmem:[#allocation67_spill] sm:$0xff] %v11183_v28  ;;  %v7788_v29 = vpop.f32.mrb[59].mxu1 }
 0xb90   :  { %v11208_v29 = vadd.f32 %v11112_v45, %v11083_v8 }
 0xb94   :  { %v7802_v37 = vpop.f32.mrb[60].mxu1 }
 0xb95   :  { %v11188_v22 = vadd.f32 %v7802_v37, %v11083_v8  ;;  %v3968_v58 = vpop.f32.mrb[61].mxu1 }
 0xb96   :  { %v11197_v1 = vadd.f32 %v3968_v58, %v11085_v7  ;;  %v11212_v58 = vpop.permute.xlu1 %4825 }
 0xb97   :  { %v4556_v38 = vsel %vm1272_vm3, %v11188_v22, -inf  ;;  %12290 = vst [vmem:[#allocation17_spill] sm:$0xff] %v11212_v58 }
 0xb98   :  { %4557 = vmax.xlane.f32.xlu1 %v4556_v38  ;;  %v4553_v13 = vsel %vm1272_vm3, %v11197_v1, -inf }
 0xb9c   :  { %v7816_v47 = vpop.f32.mrb[62].mxu1  ;;  %4563 = vmax.xlane.f32.xlu1 %v4562_v35 }
 0xb9d   :  { %v4158_v43 = vpop.f32.mrb[63].mxu1  ;;  %v11202_v27 = vadd.f32 %v7816_v47, %v11083_v8  ;;  %v4574_v47 = vsel %vm1272_vm3, %v11208_v29, -inf }
 0xb9e   :  { %v11215_v55 = vadd.f32 %v4158_v43, %v11085_v7  ;;  %v12293_v43 = vld [vmem:[#allocation47_spill] sm:$0xff] }
 0xb9f   :  { %v4568_v37 = vsel %vm1272_vm3, %v11202_v27, -inf }
 0xba0   :  { %4554 = vmax.xlane.f32.xlu1 %v4553_v13  ;;  %v11219_v13 = vpop.permute.xlu1 %4872  ;;  %v4565_v45 = vsel %vm1272_vm3, %v11215_v55, -inf }
 0xba1   :  { %12291 = vst [vmem:[#allocation27_spill] sm:$0xff] %v11219_v13 }
 0xba4   :  { %v7830_v38 = vpop.f32.mrb[64].mxu1  ;;  %4569 = vmax.xlane.f32.xlu1 %v4568_v37  ;;  %v11223_v56 = vpop.permute.xlu1 %4966 }
 0xba5   :  { %v4348_v35 = vpop.f32.mrb[65].mxu1  ;;  %12292 = vst [vmem:[#allocation30_spill] sm:$0xff] %v11223_v56  ;;  %v11233_v13 = vadd.f32 %v7830_v38, %v11083_v8  ;;  %v5204_v38 = vmax.f32 %v11087_v61, 1e-24 }
 0xba8   :  { %4575 = vmax.xlane.f32.xlu1 %v4574_v47 }
 0xbac   :  { %v7844_v40 = vpop.f32.mrb[66].mxu1  ;;  %4566 = vmax.xlane.f32.xlu1 %v4565_v45  ;;  %v11237_v45 = vadd.f32 %v11149_v5, %v11083_v8 }
 0xbad   :  { %v4538_v28 = vpop.f32.mrb[67].mxu1 }
 0xbb4   :  { %v4552_v58 = vpop.xlane.xlu1 %4551 }
 0xbb5   :  { %v4596_v37 = vsub.f32 %v11090_v16, %v4552_v58  ;;  %v4580_v16 = vsel %vm1272_vm3, %v11233_v13, -inf  ;;  %v11243_v58 = vadd.f32 %v4348_v35, %v11085_v7  ;;  %v12295_v35 = vld [vmem:[#allocation32_spill] sm:$0xff] }
 0xbb7   :  { %v4613_v57 = vmul.f32 1.442695, %v4596_v37  ;;  %v4586_v37 = vsel %vm1272_vm3, %v11237_v45, -inf  ;;  %v4577_v5 = vsel %vm1272_vm3, %v11243_v58, -inf }
 0xbb9   :  { %8852 = vpow2.f32 %v4613_v57  ;;  %v5368_v57 = vmax.f32 %v11081_v9, 1e-24 }
 0xbbb   :  { %8854 = vrsqrt.f32 %v5368_v57 }
 0xbbd   :  { %5060 = vrot.lane.b32.xlu1 %v12293_v43, %s9160_s9 }
 0xbc3   :  { %v11228_v50 = vpop.eup %8852 }
 0xbc4   :  { %12294 = vst [vmem:[#allocation25_spill] sm:$0xff] %v11228_v50  ;;  %v4646_v47 = vsel %vm1272_vm3, %v11228_v50, 0.0  ;;  %v11252_v50 = vstv %s7297_s10 }
 0xbc5   :  { %4647 = vadd.xlane.f32.xlu0 %v4646_v47  ;;  %v5367_v47 = vmax.f32 %v11073_v44, 1e-24  ;;  %v8855_v9 = vpop.eup %8854 }
 0xbc6   :  { %v5400_v43 = vmul.f32 %v8855_v9, %v12295_v35 }
 0xbc7   :  { %8856 = vrsqrt.f32 %v5367_v47  ;;  %v11260_v47 = vadd.f32 %v7844_v40, %v11083_v8 }
 0xbc8   :  { %8858 = vrsqrt.f32 %v5204_v38  ;;  %v5205_v38 = vmax.f32 %v11092_v21, 1e-24 }
 0xbc9   :  { %v4592_v9 = vsel %vm1272_vm3, %v11260_v47, -inf }
 0xbca   :  { %8860 = vrsqrt.f32 %v5205_v38 }
 0xbe1   :  { %4581 = vmax.xlane.f32.xlu1 %v4580_v16  ;;  %v8857_v16 = vpop.eup %8856 }
 0xbe2   :  { %v8859_v56 = vpop.eup %8858  ;;  %v5399_v44 = vmul.f32 %v8857_v16, %v12296_v59 }
 0xbe3   :  { %v5237_v57 = vmul.f32 %v8859_v56, %v11252_v50 }
 0xbe5   :  { %4587 = vmax.xlane.f32.xlu1 %v4586_v37  ;;  %v8361_v37 = vpack.i.bf16 %v5400_v43, %v5399_v44  ;;  %v5253_v61 = vmul.f32 %v5237_v57, %v12282_v32 }
 0xbe9   :  { %4578 = vmax.xlane.f32.xlu1 %v4577_v5  ;;  %v11264_v5 = vadd.f32 %v4538_v28, %v11085_v7  ;;  %v8861_v28 = vpop.eup %8860 }
 0xbeb   :  { %v4589_v43 = vsel %vm1272_vm3, %v11264_v5, -inf }
 0xbfa   :  { %8362 = vrot.lane.b32.xlu1 %v8361_v37, %s9158_s30  ;;  %v5238_v37 = vmul.f32 %v8861_v28, %v11252_v50 }
 0xbfe   :  { %5418 = vrot.lane.b32.xlu1 %v5253_v61, %s9159_s8 }
 0xc22   :  { %4593 = vmax.xlane.f32.xlu1 %v4592_v9 }
 0xc25   :  { %v4558_v56 = vpop.xlane.xlu1 %4557 }
 0xc26   :  { %v4598_v32 = vsub.f32 %v11188_v22, %v4558_v56  ;;  %4590 = vmax.xlane.f32.xlu1 %v4589_v43  ;;  %v5254_v56 = vmul.f32 %v5238_v37, %v12283_v20 }
 0xc28   :  { %v4617_v16 = vmul.f32 1.442695, %v4598_v32 }
 0xc29   :  { %v4564_v8 = vpop.xlane.xlu1 %4563 }
 0xc2a   :  { %8862 = vpow2.f32 %v4617_v16  ;;  %v4600_v21 = vsub.f32 %v11192_v36, %v4564_v8  ;;  %v11285_v16 = vpop.permute.xlu0 %4919 }
 0xc2c   :  { %v4621_v40 = vmul.f32 1.442695, %v4600_v21 }
 0xc2d   :  { %v4555_v7 = vpop.xlane.xlu1 %4554 }
 0xc2e   :  { %8864 = vpow2.f32 %v4621_v40  ;;  %v4549_v21 = vpop.xlane.xlu0 %4548  ;;  %v4597_v37 = vsub.f32 %v11197_v1, %v4555_v7 }
 0xc2f   :  { %v4595_v40 = vsub.f32 %v11095_v31, %v4549_v21 }
 0xc31   :  { %v4570_v44 = vpop.xlane.xlu1 %4569 }
 0xc32   :  { %v4602_v57 = vsub.f32 %v11202_v27, %v4570_v44  ;;  %v4611_v44 = vmul.f32 1.442695, %v4595_v40 }
 0xc34   :  { %v11274_v61 = vpop.eup %8862  ;;  %v4625_v38 = vmul.f32 1.442695, %v4602_v57  ;;  %v4561_v57 = vpop.xlane.xlu0 %4560 }
 0xc35   :  { %v4576_v9 = vpop.xlane.xlu1 %4575  ;;  %v4652_v22 = vsel %vm1272_vm3, %v11274_v61, 0.0 }
 0xc36   :  { %8866 = vpow2.f32 %v4625_v38  ;;  %v4604_v36 = vsub.f32 %v11208_v29, %v4576_v9  ;;  %4653 = vadd.xlane.f32.xlu0 %v4652_v22  ;;  %v4599_v38 = vsub.f32 %v11108_v39, %v4561_v57  ;;  %v4615_v9 = vmul.f32 1.442695, %v4597_v37 }
 0xc37   :  { %5420 = vrot.lane.b32.xlu1 %v5254_v56, %s9159_s8 }
 0xc38   :  { %v11281_v43 = vpop.eup %8864  ;;  %v4629_v32 = vmul.f32 1.442695, %v4604_v36  ;;  %v4619_v56 = vmul.f32 1.442695, %v4599_v38 }
 0xc39   :  { %v4658_v27 = vsel %vm1272_vm3, %v11281_v43, 0.0  ;;  %v4567_v22 = vpop.xlane.xlu1 %4566 }
 0xc3a   :  { %8868 = vpow2.f32 %v4629_v32  ;;  %4659 = vadd.xlane.f32.xlu0 %v4658_v27  ;;  %v4601_v36 = vsub.f32 %v11215_v55, %v4567_v22  ;;  %v4573_v32 = vpop.xlane.xlu0 %4572 }
 0xc3b   :  { %8870 = vpow2.f32 %v4611_v44  ;;  %v4603_v31 = vsub.f32 %v11115_v54, %v4573_v32 }
 0xc3c   :  { %8872 = vpow2.f32 %v4615_v9  ;;  %v4623_v27 = vmul.f32 1.442695, %v4601_v36 }
 0xc3d   :  { %8874 = vpow2.f32 %v4619_v56  ;;  %v4627_v21 = vmul.f32 1.442695, %v4603_v31  ;;  %v11318_v37 = vpop.permute.xlu1 %5060 }
 0xc3e   :  { %8876 = vpow2.f32 %v4623_v27  ;;  %v11322_v38 = vpop.permute.xlu0 %5013 }
 0xc3f   :  { %8878 = vpow2.f32 %v4627_v21 }
 0xc40   :  { %v11287_v8 = vpop.eup %8866 }
 0xc41   :  { %v4664_v20 = vsel %vm1272_vm3, %v11287_v8, 0.0 }
 0xc42   :  { %4665 = vadd.xlane.f32.xlu0 %v4664_v20  ;;  %v4585_v36 = vpop.xlane.xlu0 %4584 }
 0xc43   :  { %v4607_v27 = vsub.f32 %v11165_v63, %v4585_v36 }
 0xc44   :  { %v11291_v29 = vpop.eup %8868 }
 0xc45   :  { %v4670_v28 = vsel %vm1272_vm3, %v11291_v29, 0.0  ;;  %v11300_v20 = vpop.eup %8870 }
 0xc46   :  { %4671 = vadd.xlane.f32.xlu0 %v4670_v28  ;;  %v4643_v1 = vsel %vm1272_vm3, %v11300_v20, 0.0  ;;  %v11304_v7 = vpop.eup %8872 }
 0xc47   :  { %v4649_v39 = vsel %vm1272_vm3, %v11304_v7, 0.0  ;;  %v11308_v55 = vpop.eup %8874 }
 0xc48   :  { %v4655_v54 = vsel %vm1272_vm3, %v11308_v55, 0.0  ;;  %v11312_v40 = vpop.eup %8876 }
 0xc49   :  { %v4661_v28 = vsel %vm1272_vm3, %v11312_v40, 0.0  ;;  %v11316_v44 = vpop.eup %8878 }
 0xc4a   :  { %v4667_v57 = vsel %vm1272_vm3, %v11316_v44, 0.0 }
 0xc5b   :  { %4644 = vadd.xlane.f32.xlu1 %v4643_v1 }
 0xc5f   :  { %4650 = vadd.xlane.f32.xlu1 %v4649_v39 }
 0xc63   :  { %4656 = vadd.xlane.f32.xlu1 %v4655_v54  ;;  %v4635_v54 = vmul.f32 1.442695, %v4607_v27 }
 0xc67   :  { %4662 = vadd.xlane.f32.xlu1 %v4661_v28 }
 0xc6b   :  { %4668 = vadd.xlane.f32.xlu1 %v4667_v57 }
 0xc6e   :  { %v4582_v9 = vpop.xlane.xlu1 %4581 }
 0xc6f   :  { %v4606_v22 = vsub.f32 %v11233_v13, %v4582_v9 }
 0xc71   :  { %v4633_v56 = vmul.f32 1.442695, %v4606_v22 }
 0xc72   :  { %v4588_v32 = vpop.xlane.xlu1 %4587 }
 0xc73   :  { %8880 = vpow2.f32 %v4633_v56  ;;  %v4608_v31 = vsub.f32 %v11237_v45, %v4588_v32 }
 0xc75   :  { %v4637_v21 = vmul.f32 1.442695, %v4608_v31 }
 0xc76   :  { %v4579_v1 = vpop.xlane.xlu1 %4578 }
 0xc77   :  { %8882 = vpow2.f32 %v4637_v21  ;;  %v4605_v39 = vsub.f32 %v11243_v58, %v4579_v1  ;;  %v5207_v58 = vmax.f32 %v11105_v51, 1e-24 }
 0xc79   :  { %v4631_v28 = vmul.f32 1.442695, %v4605_v39 }
 0xc7a   :  { %v11348_v21 = vpop.permute.xlu1 %8362 }
 0xc7b   :  { %8884 = vpow2.f32 %v4631_v28 }
 0xc7c   :  { %8886 = vpow2.f32 %v4635_v54 }
 0xc7d   :  { %v11328_v57 = vpop.eup %8880  ;;  %8888 = vrsqrt.f32 %v5207_v58 }
 0xc7e   :  { %v4676_v13 = vsel %vm1272_vm3, %v11328_v57, 0.0  ;;  %v11350_v51 = vpop.permute.xlu1 %5418 }
 0xc7f   :  { %4677 = vadd.xlane.f32.xlu0 %v4676_v13 }
 0xc81   :  { %v11332_v9 = vpop.eup %8882 }
 0xc82   :  { %v4682_v63 = vsel %vm1272_vm3, %v11332_v9, 0.0 }
 0xc83   :  { %4683 = vadd.xlane.f32.xlu0 %v4682_v63 }
 0xc85   :  { %v11336_v45 = vpop.eup %8884 }
 0xc86   :  { %v4673_v22 = vsel %vm1272_vm3, %v11336_v45, 0.0  ;;  %v11341_v56 = vpop.eup %8886 }
 0xc87   :  { %4674 = vadd.xlane.f32.xlu1 %v4673_v22  ;;  %v4679_v36 = vsel %vm1272_vm3, %v11341_v56, 0.0  ;;  %v8889_v32 = vpop.eup %8888  ;;  %v5206_v22 = vmax.f32 %v11101_v53, 1e-24  ;;  %v5211_v53 = vmax.f32 %v11127_v2, 1e-24 }
 0xc88   :  { %v5240_v31 = vmul.f32 %v8889_v32, %v11252_v50  ;;  %v5378_v2 = vmax.f32 %v11147_v26, 1e-24  ;;  %v5380_v26 = vmax.f32 %v11153_v24, 1e-24 }
 0xc8a   :  { %v5256_v27 = vmul.f32 %v5240_v31, %v12295_v35  ;;  %v5208_v35 = vmax.f32 %v11117_v60, 1e-24  ;;  %v5376_v60 = vmax.f32 %v11133_v41, 1e-24 }
 0xc8b   :  { %4680 = vadd.xlane.f32.xlu1 %v4679_v36 }
 0xc9c   :  { %5515 = vrot.lane.b32.xlu1 %v5256_v27, %s9159_s8  ;;  %v5373_v27 = vmax.f32 %v11125_v48, 1e-24  ;;  %v5213_v48 = vmax.f32 %v11137_v52, 1e-24  ;;  %v5379_v52 = vmax.f32 %v11151_v4, 1e-24 }
 0xcaf   :  { %v4594_v1 = vpop.xlane.xlu1 %4593 }
 0xcb0   :  { %v4610_v39 = vsub.f32 %v11260_v47, %v4594_v1  ;;  %v5209_v47 = vmax.f32 %v11121_v23, 1e-24  ;;  %v5375_v1 = vmax.f32 %v11131_v3, 1e-24  ;;  %v5212_v23 = vmax.f32 %v11135_v12, 1e-24 }
 0xcb1   :  { %v5377_v3 = vmax.f32 %v11143_v18, 1e-24 }
 0xcb2   :  { %v4641_v54 = vmul.f32 1.442695, %v4610_v39 }
 0xcb3   :  { %v4591_v28 = vpop.xlane.xlu1 %4590 }
 0xcb4   :  { %8890 = vpow2.f32 %v4641_v54  ;;  %v4609_v13 = vsub.f32 %v11264_v5, %v4591_v28  ;;  %v5374_v5 = vmax.f32 %v11129_v34, 1e-24  ;;  %v5210_v34 = vmax.f32 %v11123_v14, 1e-24 }
 0xcb5   :  { %v5215_v14 = vmax.f32 %v11145_v33, 1e-24  ;;  %v5217_v33 = vmax.f32 %v11157_v42, 1e-24 }
 0xcb6   :  { %v4639_v63 = vmul.f32 1.442695, %v4609_v13  ;;  %v11376_v13 = vpop.permute.xlu0 %8357 }
 0xcb8   :  { %8892 = vpow2.f32 %v4639_v63 }
 0xcb9   :  { %8894 = vrsqrt.f32 %v5208_v35 }
 0xcba   :  { %8896 = vrsqrt.f32 %v5206_v22  ;;  %v11388_v4 = vpop.permute.xlu0 %8367 }
 0xcbb   :  { %8898 = vrsqrt.f32 %v5209_v47 }
 0xcbc   :  { %8900 = vrsqrt.f32 %v5374_v5 }
 0xcbd   :  { %8902 = vrsqrt.f32 %v5373_v27 }
 0xcbe   :  { %v11354_v58 = vpop.eup %8890  ;;  %8904 = vrsqrt.f32 %v5211_v53 }
 0xcbf   :  { %v4688_v36 = vsel %vm1272_vm3, %v11354_v58, 0.0  ;;  %8906 = vrsqrt.f32 %v5376_v60 }
 0xcc0   :  { %4689 = vadd.xlane.f32.xlu0 %v4688_v36  ;;  %8908 = vrsqrt.f32 %v5375_v1 }
 0xcc1   :  { %8910 = vrsqrt.f32 %v5212_v23 }
 0xcc2   :  { %v11360_v32 = vpop.eup %8892  ;;  %8912 = vrsqrt.f32 %v5210_v34 }
 0xcc3   :  { %v4685_v31 = vsel %vm1272_vm3, %v11360_v32, 0.0  ;;  %v8895_v39 = vpop.eup %8894  ;;  %8914 = vrsqrt.f32 %v5213_v48 }
 0xcc4   :  { %4686 = vadd.xlane.f32.xlu1 %v4685_v31  ;;  %v8897_v54 = vpop.eup %8896  ;;  %v5241_v41 = vmul.f32 %v8895_v39, %v11252_v50  ;;  %8916 = vrsqrt.f32 %v5378_v2  ;;  %v5219_v39 = vmax.f32 %v11161_v25, 1e-24  ;;  %v11403_v2 = vpop.permute.xlu0 %8372 }
 0xcc5   :  { %v8899_v28 = vpop.eup %8898  ;;  %v5239_v12 = vmul.f32 %v8897_v54, %v11252_v50  ;;  %8918 = vrsqrt.f32 %v5377_v3 }
 0xcc6   :  { %v8901_v63 = vpop.eup %8900  ;;  %v5257_v36 = vmul.f32 %v5241_v41, %v12285_v10  ;;  %v5242_v47 = vmul.f32 %v8899_v28, %v11252_v50  ;;  %8920 = vrsqrt.f32 %v5215_v14  ;;  %v5214_v10 = vmax.f32 %v11141_v0, 1e-24 }
 0xcc7   :  { %v8903_v35 = vpop.eup %8902  ;;  %v5255_v5 = vmul.f32 %v5239_v12, %v12296_v59  ;;  %v5406_v31 = vmul.f32 %v8901_v63, %v12232_v15  ;;  %8922 = vrsqrt.f32 %v5379_v52  ;;  %v5216_v0 = vmax.f32 %v11155_v62, 1e-24 }
 0xcc8   :  { %v8905_v22 = vpop.eup %8904  ;;  %v5405_v24 = vmul.f32 %v8903_v35, %v12233_v49  ;;  %8924 = vrsqrt.f32 %v5380_v26  ;;  %v5258_v59 = vmul.f32 %v5242_v47, %v12284_v46  ;;  %v5218_v62 = vmax.f32 %v11159_v11, 1e-24  ;;  %v4648_v35 = vpop.xlane.xlu0 %4647  ;;  %v12298_v47 = vld [vmem:[#allocation26_spill] sm:$0xff] }
 0xcc9   :  { %v8907_v18 = vpop.eup %8906  ;;  %v5244_v53 = vmul.f32 %v8905_v22, %v11252_v50  ;;  %8926 = vrsqrt.f32 %v5217_v33  ;;  %v12297_v22 = vld [vmem:[#allocation31_spill] sm:$0xff] }
 0xcca   :  { %v8909_v27 = vpop.eup %8908  ;;  %v8376_v1 = vpack.i.bf16 %v5406_v31, %v5405_v24  ;;  %v5408_v34 = vmul.f32 %v8907_v18, %v9341_v6  ;;  %8928 = vrsqrt.f32 %v5214_v10  ;;  %v11418_v31 = vpop.permute.xlu1 %5420  ;;  %v12300_v10 = vld [vmem:[#allocation29_spill] sm:$0xff] }
 0xccb   :  { %v8911_v60 = vpop.eup %8910  ;;  %v5407_v23 = vmul.f32 %v8909_v27, %v9265_v30  ;;  %v5260_v46 = vmul.f32 %v5244_v53, %v12287_v19  ;;  %8930 = vrsqrt.f32 %v5219_v39 }
 0xccc   :  { %v8913_v42 = vpop.eup %8912  ;;  %v5245_v54 = vmul.f32 %v8911_v60, %v11252_v50  ;;  %8932 = vrsqrt.f32 %v5216_v0  ;;  %v4654_v27 = vpop.xlane.xlu0 %4653 }
 0xccd   :  { %v8915_v48 = vpop.eup %8914  ;;  %v8381_v41 = vpack.i.bf16 %v5408_v34, %v5407_v23  ;;  %v5243_v28 = vmul.f32 %v8913_v42, %v11252_v50  ;;  %8934 = vrsqrt.f32 %v5218_v62 }
 0xcce   :  { %v8917_v3 = vpop.eup %8916  ;;  %v5261_v19 = vmul.f32 %v5245_v54, %v12233_v49  ;;  %v5246_v63 = vmul.f32 %v8915_v48, %v11252_v50  ;;  %8936 = vrcp.f32 %v4648_v35 }
 0xccf   :  { %v8919_v12 = vpop.eup %8918  ;;  %v5259_v52 = vmul.f32 %v5243_v28, %v12286_v17  ;;  %v5410_v26 = vmul.f32 %v8917_v3, %v12297_v22  ;;  %v12299_v17 = vld [vmem:[#allocation24_spill] sm:$0xff] }
 0xcd0   :  { %v8921_v25 = vpop.eup %8920  ;;  %v5409_v18 = vmul.f32 %v8919_v12, %v12298_v47  ;;  %v5262_v11 = vmul.f32 %v5246_v63, %v12232_v15  ;;  %v4660_v0 = vpop.xlane.xlu0 %4659 }
 0xcd1   :  { %v8923_v14 = vpop.eup %8922  ;;  %v5248_v49 = vmul.f32 %v8921_v25, %v11252_v50 }
 0xcd2   :  { %v8386_v33 = vpack.i.bf16 %v5410_v26, %v5409_v18  ;;  %v5411_v24 = vmul.f32 %v8923_v14, %v12299_v17  ;;  %v12301_v14 = vld [vmem:[#allocation25_spill] sm:$0xff] }
 0xcd3   :  { %v5264_v60 = vmul.f32 %v5248_v49, %v9341_v6 }
 0xcd4   :  { %v4666_v3 = vpop.xlane.xlu0 %4665 }
 0xcd5   :  { %5608 = vrot.lane.b32.xlu1 %v5257_v36, %s9159_s8  ;;  %v8925_v36 = vpop.eup %8924 }
 0xcd6   :  { %5513 = vrot.lane.b32.xlu0 %v5255_v5, %s9159_s8  ;;  %v8927_v5 = vpop.eup %8926 }
 0xcd7   :  { %v8929_v53 = vpop.eup %8928  ;;  %v5250_v15 = vmul.f32 %v8927_v5, %v11252_v50 }
 0xcd8   :  { %v5247_v42 = vmul.f32 %v8929_v53, %v11252_v50 }
 0xcd9   :  { %5610 = vrot.lane.b32.xlu1 %v5258_v59, %s9159_s8  ;;  %v5412_v59 = vmul.f32 %v8925_v36, %v12300_v10 }
 0xcda   :  { %8377 = vrot.lane.b32.xlu0 %v8376_v1, %s9158_s30  ;;  %v8931_v1 = vpop.eup %8930  ;;  %v5263_v48 = vmul.f32 %v5247_v42, %v9265_v30  ;;  %v8359_v42 = vunpack.i.l.bf16 %v11376_v13 }
 0xcdb   :  { %v8391_v34 = vpack.i.bf16 %v5412_v59, %v5411_v24  ;;  %v8933_v39 = vpop.eup %8932  ;;  %v5252_v54 = vmul.f32 %v8931_v1, %v11252_v50  ;;  %v12304_v59 = vld [vmem:[#allocation27_spill] sm:$0xff] }
 0xcdc   :  { %v8935_v28 = vpop.eup %8934 }
 0xcdd   :  { %5705 = vrot.lane.b32.xlu1 %v5260_v46, %s9159_s8  ;;  %v5266_v46 = vmul.f32 %v5250_v15, %v12297_v22  ;;  %v5268_v12 = vmul.f32 %v5252_v54, %v12300_v10  ;;  %v8937_v63 = vpop.eup %8936 }
 0xcde   :  { %8382 = vrot.lane.b32.xlu0 %v8381_v41, %s9158_s30  ;;  %v5249_v41 = vmul.f32 %v8933_v39, %v11252_v50  ;;  %v4708_v35 = vmul.f32 %v8937_v63, %v12301_v14  ;;  %v12305_v39 = vld [vmem:[#allocation30_spill] sm:$0xff]  ;;  %v8369_v63 = vunpack.i.l.bf16 %v11388_v4 }
 0xce0   :  { %v5265_v62 = vmul.f32 %v5249_v41, %v12298_v47  ;;  %v8365_v41 = vunpack.i.h.bf16 %v11348_v21 }
 0xce1   :  { %5798 = vrot.lane.b32.xlu1 %v5261_v19, %s9159_s8  ;;  %v5251_v19 = vmul.f32 %v8935_v28, %v11252_v50 }
 0xce2   :  { %5703 = vrot.lane.b32.xlu0 %v5259_v52, %s9159_s8  ;;  %v4672_v52 = vpop.xlane.xlu0 %4671 }
 0xce3   :  { %v5267_v36 = vmul.f32 %v5251_v19, %v12299_v17  ;;  %v8370_v19 = vunpack.i.h.bf16 %v11388_v4 }
 0xce5   :  { %5800 = vrot.lane.b32.xlu1 %v5262_v11, %s9159_s8 }
 0xce6   :  { %8387 = vrot.lane.b32.xlu0 %v8386_v33, %s9158_s30  ;;  %v12302_v33 = vld [vmem:[#allocation17_spill] sm:$0xff] }
 0xce8   :  { %v4645_v23 = vpop.xlane.xlu1 %4644 }
 0xce9   :  { %8938 = vrcp.f32 %v4645_v23  ;;  %5895 = vrot.lane.b32.xlu1 %v5264_v60, %s9159_s8 }
 0xcea   :  { %8392 = vrot.lane.b32.xlu0 %v8391_v34, %s9158_s30  ;;  %8940 = vrcp.f32 %v4654_v27  ;;  %v8360_v34 = vunpack.i.h.bf16 %v11376_v13 }
 0xcec   :  { %v4651_v6 = vpop.xlane.xlu1 %4650 }
 0xced   :  { %8942 = vrcp.f32 %v4651_v6  ;;  %5990 = vrot.lane.b32.xlu1 %v5266_v46, %s9159_s8 }
 0xcee   :  { %5893 = vrot.lane.b32.xlu0 %v5263_v48, %s9159_s8  ;;  %8944 = vrcp.f32 %v4660_v0  ;;  %v8161_v0 = vpack.c.bf16 %v8360_v34, %v8359_v42 }
 0xcf0   :  { %v4657_v25 = vpop.xlane.xlu1 %4656 }
 0xcf1   :  { %8946 = vrcp.f32 %v4657_v25  ;;  %6085 = vrot.lane.b32.xlu1 %v5268_v12, %s9159_s8 }
 0xcf2   :  { %5988 = vrot.lane.b32.xlu0 %v5265_v62, %s9159_s8  ;;  %8948 = vrcp.f32 %v4666_v3 }
 0xcf3   :  { %v8939_v30 = vpop.eup %8938 }
 0xcf4   :  { %v4707_v22 = vmul.f32 %v8939_v30, %v11300_v20  ;;  %v4663_v26 = vpop.xlane.xlu1 %4662  ;;  %v8941_v18 = vpop.eup %8940  ;;  %v12303_v20 = vmov 0.0  }
 0xcf5   :  { %8950 = vrcp.f32 %v4663_v26  ;;  %v4710_v11 = vmul.f32 %v8941_v18, %v11274_v61 }
 0xcf6   :  { %6083 = vrot.lane.b32.xlu0 %v5267_v36, %s9159_s8  ;;  %v4723_v50 = vpack.c.bf16 %v4708_v35, %v4707_v22  ;;  %8952 = vrcp.f32 %v4672_v52 }
 0xcf7   :  { %v8943_v47 = vpop.eup %8942 }
 0xcf8   :  { %v4709_v49 = vmul.f32 %v8943_v47, %v11304_v7  ;;  %7848 = vmatmul.mubr.msk.bf16.vlgmr.msra.gmra.mrb[60].mxu0 %vm1272_vm3, %v4723_v50  ;;  %v4669_v5 = vpop.xlane.xlu1 %4668  ;;  %v8945_v27 = vpop.eup %8944  ;;  %v8375_v47 = vunpack.i.h.bf16 %v11403_v2 }
 0xcf9   :  { %7858 = vmatpush3.bf16.msra.mxu0 %v12302_v33  ;;  %8954 = vrcp.f32 %v4669_v5  ;;  %7859 = vmatprep.mubr.msk.bf16.mxu0 %vm9154_vm4, %v12303_v20  ;;  %v4712_v10 = vmul.f32 %v8945_v27, %v11281_v43 }
 0xcfa   :  { %v4724_v17 = vpack.c.bf16 %v4710_v11, %v4709_v49  ;;  %7869 = vmatprep.subr.bf16.mxu0 %v12303_v20  ;;  %v8374_v11 = vunpack.i.l.bf16 %v11403_v2 }
 0xcfb   :  { %v8947_v24 = vpop.eup %8946 }
 0xcfc   :  { %v4711_v61 = vmul.f32 %v8947_v24, %v11308_v55  ;;  %7854 = vmatmul.mubr.msk.bf16.vlgmr.msra.gmra.mrb[68].mxu1 %vm1272_vm3, %v4724_v17  ;;  %v8949_v7 = vpop.eup %8948  ;;  %v8179_v24 = vpack.c.bf16 %v8375_v47, %v8374_v11  ;;  %v11596_v47 = vld [vmem:[#allocation9 + $0x30] sm:$0xff] }
 0xcfd   :  { %7864 = vmatpush3.bf16.msra.mxu1 %v12304_v59  ;;  %7865 = vmatprep.mubr.msk.bf16.mxu1 %vm9154_vm4, %v12303_v20  ;;  %v4714_v15 = vmul.f32 %v8949_v7, %v11287_v8 }
 0xcfe   :  { %v4725_v53 = vpack.c.bf16 %v4712_v10, %v4711_v61  ;;  %7875 = vmatprep.subr.bf16.mxu1 %v12303_v20 }
 0xcff   :  { %v8951_v60 = vpop.eup %8950 }
 0xd00   :  { %v4713_v1 = vmul.f32 %v8951_v60, %v11312_v40  ;;  %7860 = vmatmul.mubr.msk.bf16.vlgmr.msra.gmra.mrb[64].mxu0 %vm1272_vm3, %v4725_v53  ;;  %v8953_v43 = vpop.eup %8952 }
 0xd01   :  { %7870 = vmatpush3.bf16.msra.mxu0 %v11285_v16  ;;  %7871 = vmatprep.mubr.msk.bf16.mxu0 %vm9154_vm4, %v12303_v20  ;;  %v4716_v8 = vmul.f32 %v8953_v43, %v11291_v29 }
 0xd02   :  { %v4726_v55 = vpack.c.bf16 %v4714_v15, %v4713_v1  ;;  %7881 = vmatprep.subr.bf16.mxu0 %v12303_v20 }
 0xd03   :  { %v8955_v23 = vpop.eup %8954 }
 0xd04   :  { %v4715_v40 = vmul.f32 %v8955_v23, %v11316_v44  ;;  %7866 = vmatmul.mubr.msk.bf16.vlgmr.msra.gmra.mrb[72].mxu1 %vm1272_vm3, %v4726_v55 }
 0xd05   :  { %7876 = vmatpush3.bf16.msra.mxu1 %v12305_v39  ;;  %7877 = vmatprep.mubr.msk.bf16.mxu1 %vm9154_vm4, %v12303_v20 }
 0xd06   :  { %v4727_v16 = vpack.c.bf16 %v4716_v8, %v4715_v40  ;;  %7887 = vmatprep.subr.bf16.mxu1 %v12303_v20 }
 0xd08   :  { %7872 = vmatmul.mubr.msk.bf16.vlgmr.msra.gmra.mrb[68].mxu0 %vm1272_vm3, %v4727_v16 }
 0xd09   :  { %7882 = vmatpush3.bf16.msra.mxu0 %v11322_v38  ;;  %7883 = vmatprep.mubr.msk.bf16.mxu0 %vm9154_vm4, %v12303_v20  ;;  %v8364_v38 = vunpack.i.l.bf16 %v11348_v21 }
 0xd0a   :  { %8163 = vmatprep.subr.msk.bf16.mxu0 %vm9575_vm2, %v8161_v0 }
 0xd0b   :  { %v8167_v30 = vpack.c.bf16 %v8365_v41, %v8364_v38 }
 0xd0c   :  { %v4678_v44 = vpop.xlane.xlu0 %4677 }
 0xd0d   :  { %8956 = vrcp.f32 %v4678_v44 }
 0xd10   :  { %v4684_v13 = vpop.xlane.xlu0 %4683 }
 0xd14   :  { %v4675_v46 = vpop.xlane.xlu1 %4674 }
 0xd15   :  { %8958 = vrcp.f32 %v4675_v46 }
 0xd16   :  { %8960 = vrcp.f32 %v4684_v13 }
 0xd17   :  { %v8957_v6 = vpop.eup %8956 }
 0xd18   :  { %v4681_v54 = vpop.xlane.xlu1 %4680  ;;  %v4718_v28 = vmul.f32 %v8957_v6, %v11328_v57 }
 0xd19   :  { %8962 = vrcp.f32 %v4681_v54 }
 0xd1f   :  { %v8959_v48 = vpop.eup %8958 }
 0xd20   :  { %v4717_v3 = vmul.f32 %v8959_v48, %v11336_v45  ;;  %v8961_v12 = vpop.eup %8960  ;;  %v8173_v45 = vpack.c.bf16 %v8370_v19, %v8369_v63 }
 0xd21   :  { %v4720_v14 = vmul.f32 %v8961_v12, %v11332_v9 }
 0xd22   :  { %v4728_v25 = vpack.c.bf16 %v4718_v28, %v4717_v3 }
 0xd23   :  { %v8963_v62 = vpop.eup %8962 }
 0xd24   :  { %v4719_v35 = vmul.f32 %v8963_v62, %v11341_v56  ;;  %7878 = vmatmul.mubr.msk.bf16.vlgmr.msra.gmra.mrb[76].mxu1 %vm1272_vm3, %v4728_v25 }
 0xd25   :  { %7888 = vmatpush3.bf16.msra.mxu1 %v11318_v37  ;;  %7889 = vmatprep.mubr.msk.bf16.mxu1 %vm9154_vm4, %v12303_v20  ;;  %v5516_v37 = vpop.permute.xlu1 %5515 }
 0xd26   :  { %8169 = vmatprep.subr.msk.bf16.mxu1 %vm9575_vm2, %v8167_v30  ;;  %v4729_v57 = vpack.c.bf16 %v4720_v14, %v4719_v35 }
 0xd28   :  { %7884 = vmatmul.mubr.msk.bf16.vlgmr.msra.gmra.mrb[72].mxu0 %vm1272_vm3, %v4729_v57 }
 0xd29   :  { %8166 = vmatpush3.bf16.xpose.msk.msra.mxu0 %vm9575_vm2, %v8161_v0  ;;  %7897 = vmatprep.mubr.msk.f32.mxu0 %vm268_vm1, %v11350_v51 }
 0xd2a   :  { %8175 = vmatprep.subr.msk.bf16.mxu0 %vm9575_vm2, %v8173_v45 }
 0xd30   :  { %7898 = vmatmul.mubr.msk.f32.vlgmr.msra.gmra.mrb[76].mxu0 %vm268_vm1, %v11418_v31 }
 0xd31   :  { %8178 = vmatpush3.bf16.xpose.msk.msra.mxu0 %vm9575_vm2, %v8173_v45 }
 0xd4d   :  { %v4690_v9 = vpop.xlane.xlu0 %4689 }
 0xd4e   :  { %8964 = vrcp.f32 %v4690_v9 }
 0xd51   :  { %v5514_v56 = vpop.permute.xlu0 %5513  ;;  %v4687_v21 = vpop.xlane.xlu1 %4686 }
 0xd52   :  { %8966 = vrcp.f32 %v4687_v21 }
 0xd55   :  { %v8378_v4 = vpop.permute.xlu0 %8377  ;;  %v5609_v52 = vpop.permute.xlu1 %5608 }
 0xd56   :  { %v8380_v22 = vunpack.i.h.bf16 %v8378_v4  ;;  %v8379_v26 = vunpack.i.l.bf16 %v8378_v4  ;;  %7911 = vmatprep.mubr.msk.f32.mxu0 %vm268_vm1, %v5609_v52 }
 0xd58   :  { %v8185_v51 = vpack.c.bf16 %v8380_v22, %v8379_v26  ;;  %v8965_v50 = vpop.eup %8964 }
 0xd59   :  { %v8383_v36 = vpop.permute.xlu0 %8382  ;;  %v5611_v18 = vpop.permute.xlu1 %5610  ;;  %v4722_v49 = vmul.f32 %v8965_v50, %v11354_v58 }
 0xd5a   :  { %7912 = vmatmul.mubr.msk.f32.vlgmr.msra.gmra.mrb[78].mxu0 %vm268_vm1, %v5611_v18  ;;  %8187 = vmatprep.subr.msk.bf16.mxu0 %vm9575_vm2, %v8185_v51  ;;  %v8384_v2 = vunpack.i.l.bf16 %v8383_v36 }
 0xd5b   :  { %8190 = vmatpush3.bf16.xpose.msk.msra.mxu0 %vm9575_vm2, %v8185_v51 }
 0xd5c   :  { %v8967_v31 = vpop.eup %8966 }
 0xd5d   :  { %v4721_v5 = vmul.f32 %v8967_v31, %v11360_v32  ;;  %v5704_v27 = vpop.permute.xlu0 %5703  ;;  %v5706_v33 = vpop.permute.xlu1 %5705  ;;  %v8385_v32 = vunpack.i.h.bf16 %v8383_v36  ;;  %v11594_v31 = vld [vmem:[#allocation9 + $0x38] sm:$0xff] }
 0xd5f   :  { %v4730_v17 = vpack.c.bf16 %v4722_v49, %v4721_v5  ;;  %v8191_v15 = vpack.c.bf16 %v8385_v32, %v8384_v2 }
 0xd61   :  { %v8388_v10 = vpop.permute.xlu0 %8387  ;;  %7890 = vmatmul.mubr.msk.bf16.vlgmr.msra.gmra.mrb[80].mxu1 %vm1272_vm3, %v4730_v17  ;;  %v5799_v61 = vpop.permute.xlu1 %5798 }
 0xd62   :  { %v8390_v7 = vunpack.i.h.bf16 %v8388_v10  ;;  %v8389_v59 = vunpack.i.l.bf16 %v8388_v10  ;;  %8172 = vmatpush3.bf16.xpose.msk.msra.mxu1 %vm9575_vm2, %v8167_v30  ;;  %7904 = vmatprep.mubr.msk.f32.mxu1 %vm268_vm1, %v5514_v56 }
 0xd63   :  { %8181 = vmatprep.subr.msk.bf16.mxu1 %vm9575_vm2, %v8179_v24  ;;  %7925 = vmatprep.mubr.msk.f32.mxu0 %vm268_vm1, %v5799_v61 }
 0xd64   :  { %v8197_v58 = vpack.c.bf16 %v8390_v7, %v8389_v59 }
 0xd65   :  { %v8393_v53 = vpop.permute.xlu0 %8392  ;;  %v5801_v60 = vpop.permute.xlu1 %5800 }
 0xd66   :  { %7926 = vmatmul.mubr.msk.f32.vlgmr.msra.gmra.mrb[80].mxu0 %vm268_vm1, %v5801_v60  ;;  %8199 = vmatprep.subr.msk.bf16.mxu0 %vm9575_vm2, %v8197_v58  ;;  %v8395_v55 = vunpack.i.h.bf16 %v8393_v53  ;;  %v8394_v23 = vunpack.i.l.bf16 %v8393_v53 }
 0xd67   :  { %8202 = vmatpush3.bf16.xpose.msk.msra.mxu0 %vm9575_vm2, %v8197_v58 }
 0xd68   :  { %7949 = vmatprep.subr.bf16.mxu0 %v12303_v20  ;;  %v8203_v8 = vpack.c.bf16 %v8395_v55, %v8394_v23 }
 0xd69   :  { %v5894_v1 = vpop.permute.xlu0 %5893  ;;  %v5896_v43 = vpop.permute.xlu1 %5895  ;;  %7905 = vmatmul.mubr.msk.f32.vlgmr.msra.gmra.mrb[84].mxu1 %vm268_vm1, %v5516_v37 }
 0xd6a   :  { %8184 = vmatpush3.bf16.xpose.msk.msra.mxu1 %vm9575_vm2, %v8179_v24  ;;  %7918 = vmatprep.mubr.msk.f32.mxu1 %vm268_vm1, %v5704_v27  ;;  %v12307_v24 = vld [vmem:[#allocation43_spill] sm:$0xff] }
 0xd6b   :  { %8193 = vmatprep.subr.msk.bf16.mxu1 %vm9575_vm2, %v8191_v15 }
 0xd6d   :  { %v5989_v34 = vpop.permute.xlu0 %5988  ;;  %v5991_v42 = vpop.permute.xlu1 %5990 }
 0xd6e   :  { %7939 = vmatprep.mubr.msk.f32.mxu0 %vm268_vm1, %v5989_v34 }
 0xd6f   :  { %7940 = vmatmul.mubr.msk.f32.vlgmr.msra.gmra.mrb[82].mxu0 %vm268_vm1, %v5991_v42 }
 0xd70   :  { %7951 = vmatprep.mubr.msk.bf16.mxu0 %vm9154_vm4, %v12303_v20 }
 0xd71   :  { %7919 = vmatmul.mubr.msk.f32.vlgmr.msra.gmra.mrb[86].mxu1 %vm268_vm1, %v5706_v33  ;;  %v6084_v40 = vpop.permute.xlu0 %6083  ;;  %v6086_v39 = vpop.permute.xlu1 %6085 }
 0xd72   :  { %8196 = vmatpush3.bf16.xpose.msk.msra.mxu1 %vm9575_vm2, %v8191_v15  ;;  %7932 = vmatprep.mubr.msk.f32.mxu1 %vm268_vm1, %v5894_v1 }
 0xd73   :  { %8205 = vmatprep.subr.msk.bf16.mxu1 %vm9575_vm2, %v8203_v8 }
 0xd79   :  { %7933 = vmatmul.mubr.msk.f32.vlgmr.msra.gmra.mrb[88].mxu1 %vm268_vm1, %v5896_v43 }
 0xd7a   :  { %8208 = vmatpush3.bf16.xpose.msk.msra.mxu1 %vm9575_vm2, %v8203_v8  ;;  %7946 = vmatprep.mubr.msk.f32.mxu1 %vm268_vm1, %v6084_v40 }
 0xd7b   :  { %7955 = vmatprep.subr.bf16.mxu1 %v12303_v20 }
 0xd81   :  { %7947 = vmatmul.mubr.msk.f32.vlgmr.msra.gmra.mrb[90].mxu1 %vm268_vm1, %v6086_v39 }
 0xd82   :  { %7957 = vmatprep.mubr.msk.bf16.mxu1 %vm9154_vm4, %v12303_v20 }
 0xdcb   :  { %v11552_v16 = vpop.f32.mrb[60].mxu0 }
 0xdcc   :  { %v7849_v0 = vpop.f32.mrb[61].mxu0 }
 0xdcd   :  { %v11554_v44 = vpop.f32.mrb[62].mxu0 }
 0xdce   :  { %v8406_v13 = vpack.i.bf16 %v11554_v44, %v11552_v16  ;;  %v7850_v29 = vpop.f32.mrb[63].mxu0 }
 0xdcf   :  { %v11558_v46 = vpop.f32.mrb[68].mxu1 }
 0xdd0   :  { %v7855_v54 = vpop.f32.mrb[69].mxu1 }
 0xdd1   :  { %v11560_v6 = vpop.f32.mrb[70].mxu1 }
 0xdd2   :  { %v8411_v48 = vpack.i.bf16 %v11560_v6, %v11558_v46  ;;  %v7856_v41 = vpop.f32.mrb[71].mxu1  ;;  %v12330_v46 = vld [vmem:[#allocation35_spill] sm:$0xff]  ;;  %v12331_v6 = vld [vmem:[#allocation60_spill] sm:$0xff] }
 0xdd3   :  { %v11564_v38 = vpop.f32.mrb[64].mxu0 }
 0xdd4   :  { %v7861_v28 = vpop.f32.mrb[65].mxu0 }
 0xdd5   :  { %v11566_v3 = vpop.f32.mrb[66].mxu0 }
 0xdd6   :  { %v8426_v12 = vpack.i.bf16 %v11566_v3, %v11564_v38  ;;  %v7862_v25 = vpop.f32.mrb[67].mxu0  ;;  %v12327_v3 = vld [vmem:[#allocation52_spill] sm:$0xff] }
 0xdd7   :  { %v11570_v62 = vpop.f32.mrb[72].mxu1 }
 0xdd8   :  { %v7867_v19 = vpop.f32.mrb[73].mxu1 }
 0xdd9   :  { %v11572_v63 = vpop.f32.mrb[74].mxu1 }
 0xdda   :  { %v8431_v30 = vpack.i.bf16 %v11572_v63, %v11570_v62  ;;  %v7868_v14 = vpop.f32.mrb[75].mxu1 }
 0xddb   :  { %v11576_v35 = vpop.f32.mrb[68].mxu0 }
 0xddc   :  { %v7873_v57 = vpop.f32.mrb[69].mxu0 }
 0xddd   :  { %v11578_v45 = vpop.f32.mrb[70].mxu0 }
 0xdde   :  { %v8451_v37 = vpack.i.bf16 %v11578_v45, %v11576_v35  ;;  %v7874_v9 = vpop.f32.mrb[71].mxu0 }
 0xdf7   :  { %v11582_v56 = vpop.f32.mrb[76].mxu1 }
 0xdf8   :  { %v7879_v21 = vpop.f32.mrb[77].mxu1 }
 0xdf9   :  { %v11584_v4 = vpop.f32.mrb[78].mxu1 }
 0xdfa   :  { %v8461_v52 = vpack.i.bf16 %v11584_v4, %v11582_v56  ;;  %v7880_v22 = vpop.f32.mrb[79].mxu1  ;;  %v12336_v4 = vld [vmem:[#allocation67_spill] sm:$0xff] }
 0xdfb   :  { %v11588_v26 = vpop.f32.mrb[72].mxu0 }
 0xdfc   :  { %v7885_v51 = vpop.f32.mrb[73].mxu0 }
 0xdfd   :  { %v11590_v36 = vpop.f32.mrb[74].mxu0 }
 0xdfe   :  { %v8491_v18 = vpack.i.bf16 %v11590_v36, %v11588_v26  ;;  %v7886_v50 = vpop.f32.mrb[75].mxu0 }
 0xe03   :  { %v7899_v11 = vpop.f32.mrb[76].mxu0 }
 0xe04   :  { %v11599_v49 = vadd.f32 %v7899_v11, %v11594_v31  ;;  %v5502_v5 = vpop.f32.mrb[77].mxu0 }
 0xe05   :  { %v11602_v27 = vadd.f32 %v5502_v5, %v11596_v47 }
 0xe06   :  { %v6179_v33 = vsel %vm1272_vm3, %v11599_v49, -inf }
 0xe07   :  { %6180 = vmax.xlane.f32.xlu1 %v6179_v33  ;;  %v6176_v17 = vsel %vm1272_vm3, %v11602_v27, -inf }
 0xe08   :  { %6177 = vmax.xlane.f32.xlu0 %v6176_v17 }
 0xe18   :  { %6360 = vrot.lane.b32.xlu1 %v12307_v24, %s9161_s12 }
 0xe2d   :  { %v7913_v10 = vpop.f32.mrb[78].mxu0 }
 0xe2e   :  { %v5692_v61 = vpop.f32.mrb[79].mxu0  ;;  %v11630_v40 = vadd.f32 %v7913_v10, %v11594_v31 }
 0xe2f   :  { %v11615_v32 = vadd.f32 %v5692_v61, %v11596_v47 }
 0xe30   :  { %v6191_v25 = vsel %vm1272_vm3, %v11630_v40, -inf }
 0xe31   :  { %v6188_v1 = vsel %vm1272_vm3, %v11615_v32, -inf }
 0xe34   :  { %v11610_v7 = vpop.f32.mrb[80].mxu1 }
 0xe35   :  { %v7891_v59 = vpop.f32.mrb[81].mxu1 }
 0xe36   :  { %v11612_v58 = vpop.f32.mrb[82].mxu1 }
 0xe37   :  { %v8501_v2 = vpack.i.bf16 %v11612_v58, %v11610_v7  ;;  %v7892_v53 = vpop.f32.mrb[83].mxu1 }
 0xe39   :  { %v7927_v60 = vpop.f32.mrb[80].mxu0 }
 0xe3a   :  { %v5882_v15 = vpop.f32.mrb[81].mxu0  ;;  %v11648_v57 = vadd.f32 %v7927_v60, %v11594_v31 }
 0xe3b   :  { %v11643_v19 = vadd.f32 %v5882_v15, %v11596_v47 }
 0xe3c   :  { %6189 = vmax.xlane.f32.xlu1 %v6188_v1  ;;  %v7906_v43 = vpop.f32.mrb[84].mxu1  ;;  %v6203_v5 = vsel %vm1272_vm3, %v11648_v57, -inf }
 0xe3d   :  { %v11622_v55 = vadd.f32 %v7906_v43, %v11594_v31  ;;  %v5597_v23 = vpop.f32.mrb[85].mxu1  ;;  %v6200_v22 = vsel %vm1272_vm3, %v11643_v19, -inf  ;;  %v12308_v43 = vld [vmem:[#allocation44_spill] sm:$0xff] }
 0xe3e   :  { %v11625_v34 = vadd.f32 %v5597_v23, %v11596_v47  ;;  %v12309_v23 = vld [vmem:[#allocation45_spill] sm:$0xff] }
 0xe3f   :  { %v6185_v42 = vsel %vm1272_vm3, %v11622_v55, -inf }
 0xe40   :  { %6186 = vmax.xlane.f32.xlu0 %v6185_v42  ;;  %v6182_v0 = vsel %vm1272_vm3, %v11625_v34, -inf  ;;  %v12310_v42 = vld [vmem:[#allocation40_spill] sm:$0xff] }
 0xe42   :  { %v7941_v8 = vpop.f32.mrb[82].mxu0 }
 0xe43   :  { %v6072_v39 = vpop.f32.mrb[83].mxu0  ;;  %v11668_v24 = vadd.f32 %v7941_v8, %v11594_v31 }
 0xe44   :  { %v7920_v29 = vpop.f32.mrb[86].mxu1  ;;  %6183 = vmax.xlane.f32.xlu0 %v6182_v0  ;;  %v11663_v33 = vadd.f32 %v6072_v39, %v11596_v47 }
 0xe45   :  { %v5787_v54 = vpop.f32.mrb[87].mxu1  ;;  %v11638_v28 = vadd.f32 %v7920_v29, %v11594_v31  ;;  %v6215_v15 = vsel %vm1272_vm3, %v11668_v24, -inf }
 0xe46   :  { %v11635_v41 = vadd.f32 %v5787_v54, %v11596_v47  ;;  %v6212_v59 = vsel %vm1272_vm3, %v11663_v33, -inf }
 0xe47   :  { %v6197_v9 = vsel %vm1272_vm3, %v11638_v28, -inf }
 0xe48   :  { %v6194_v14 = vsel %vm1272_vm3, %v11635_v41, -inf  ;;  %6192 = vmax.xlane.f32.xlu0 %v6191_v25 }
 0xe49   :  { %6195 = vmax.xlane.f32.xlu1 %v6194_v14  ;;  %v12312_v14 = vld [vmem:[#allocation46_spill] sm:$0xff] }
 0xe4c   :  { %v7934_v21 = vpop.f32.mrb[88].mxu1  ;;  %6198 = vmax.xlane.f32.xlu0 %v6197_v9 }
 0xe4d   :  { %v5977_v51 = vpop.f32.mrb[89].mxu1  ;;  %6201 = vmax.xlane.f32.xlu1 %v6200_v22  ;;  %v11658_v11 = vadd.f32 %v7934_v21, %v11594_v31 }
 0xe4e   :  { %v11655_v50 = vadd.f32 %v5977_v51, %v11596_v47 }
 0xe4f   :  { %v6209_v10 = vsel %vm1272_vm3, %v11658_v11, -inf }
 0xe50   :  { %v6206_v17 = vsel %vm1272_vm3, %v11655_v50, -inf  ;;  %6204 = vmax.xlane.f32.xlu0 %v6203_v5 }
 0xe51   :  { %6207 = vmax.xlane.f32.xlu1 %v6206_v17 }
 0xe54   :  { %v7948_v61 = vpop.f32.mrb[90].mxu1  ;;  %6210 = vmax.xlane.f32.xlu0 %v6209_v10 }
 0xe55   :  { %v6167_v53 = vpop.f32.mrb[91].mxu1  ;;  %6213 = vmax.xlane.f32.xlu1 %v6212_v59  ;;  %v11675_v60 = vadd.f32 %v7948_v61, %v11594_v31  ;;  %v12311_v31 = vld [vmem:[#allocation41_spill] sm:$0xff] }
 0xe56   :  { %v11690_v8 = vadd.f32 %v6167_v53, %v11596_v47 }
 0xe57   :  { %v6221_v1 = vsel %vm1272_vm3, %v11675_v60, -inf }
 0xe58   :  { %6216 = vmax.xlane.f32.xlu0 %v6215_v15  ;;  %v6218_v39 = vsel %vm1272_vm3, %v11690_v8, -inf }
 0xe5c   :  { %6222 = vmax.xlane.f32.xlu0 %v6221_v1 }
 0xe66   :  { %6454 = vrot.lane.b32.xlu1 %v12308_v43, %s9161_s12 }
 0xe6a   :  { %6501 = vrot.lane.b32.xlu1 %v12309_v23, %s9161_s12 }
 0xe72   :  { %6407 = vrot.lane.b32.xlu0 %v12310_v42, %s9161_s12 }
 0xe76   :  { %6548 = vrot.lane.b32.xlu0 %v12311_v31, %s9161_s12 }
 0xe8e   :  { %6219 = vmax.xlane.f32.xlu1 %v6218_v39 }
 0xe94   :  { %v6181_v0 = vpop.xlane.xlu1 %6180 }
 0xe95   :  { %v6225_v29 = vsub.f32 %v11599_v49, %v6181_v0  ;;  %v6178_v21 = vpop.xlane.xlu0 %6177 }
 0xe96   :  { %v6224_v22 = vsub.f32 %v11602_v27, %v6178_v21 }
 0xe97   :  { %v6242_v54 = vmul.f32 1.442695, %v6225_v29 }
 0xe98   :  { %v6361_v25 = vpop.permute.xlu1 %6360  ;;  %v6240_v51 = vmul.f32 1.442695, %v6224_v22 }
 0xe99   :  { %8968 = vpow2.f32 %v6242_v54  ;;  %7950 = vmatpush3.bf16.msra.mxu0 %v6361_v25 }
 0xe9a   :  { %7961 = vmatprep.subr.bf16.mxu0 %v12303_v20  ;;  %8970 = vpow2.f32 %v6240_v51 }
 0xe9f   :  { %6595 = vrot.lane.b32.xlu1 %v12312_v14, %s9161_s12 }
 0xea3   :  { %v11698_v9 = vpop.eup %8968 }
 0xea4   :  { %v6275_v47 = vsel %vm1272_vm3, %v11698_v9, 0.0  ;;  %v11703_v49 = vpop.eup %8970 }
 0xea5   :  { %6276 = vadd.xlane.f32.xlu0 %v6275_v47  ;;  %v6272_v5 = vsel %vm1272_vm3, %v11703_v49, 0.0 }
 0xec3   :  { %6273 = vadd.xlane.f32.xlu1 %v6272_v5 }
 0xec9   :  { %v6190_v17 = vpop.xlane.xlu1 %6189 }
 0xeca   :  { %v6228_v59 = vsub.f32 %v11615_v32, %v6190_v17 }
 0xecc   :  { %v6248_v27 = vmul.f32 1.442695, %v6228_v59 }
 0xecd   :  { %v6187_v10 = vpop.xlane.xlu0 %6186 }
 0xece   :  { %v6227_v61 = vsub.f32 %v11622_v55, %v6187_v10 }
 0xed0   :  { %v6246_v53 = vmul.f32 1.442695, %v6227_v61 }
 0xed1   :  { %v6184_v15 = vpop.xlane.xlu0 %6183 }
 0xed2   :  { %8972 = vpow2.f32 %v6246_v53  ;;  %v6226_v1 = vsub.f32 %v11625_v34, %v6184_v15 }
 0xed4   :  { %v6244_v43 = vmul.f32 1.442695, %v6226_v1 }
 0xed5   :  { %v6193_v23 = vpop.xlane.xlu0 %6192 }
 0xed6   :  { %8974 = vpow2.f32 %v6244_v43  ;;  %v6196_v42 = vpop.xlane.xlu1 %6195  ;;  %v6229_v31 = vsub.f32 %v11630_v40, %v6193_v23 }
 0xed7   :  { %v6230_v39 = vsub.f32 %v11635_v41, %v6196_v42  ;;  %8976 = vpow2.f32 %v6248_v27 }
 0xed8   :  { %v6250_v0 = vmul.f32 1.442695, %v6229_v31 }
 0xed9   :  { %v6252_v29 = vmul.f32 1.442695, %v6230_v39  ;;  %v6199_v55 = vpop.xlane.xlu0 %6198 }
 0xeda   :  { %8978 = vpow2.f32 %v6250_v0  ;;  %v6202_v32 = vpop.xlane.xlu1 %6201  ;;  %v6231_v54 = vsub.f32 %v11638_v28, %v6199_v55 }
 0xedb   :  { %v6232_v25 = vsub.f32 %v11643_v19, %v6202_v32  ;;  %8980 = vpow2.f32 %v6252_v29 }
 0xedc   :  { %v11714_v34 = vpop.eup %8972  ;;  %v6254_v14 = vmul.f32 1.442695, %v6231_v54 }
 0xedd   :  { %v6256_v47 = vmul.f32 1.442695, %v6232_v25  ;;  %v6205_v21 = vpop.xlane.xlu0 %6204  ;;  %v6281_v40 = vsel %vm1272_vm3, %v11714_v34, 0.0 }
 0xede   :  { %8982 = vpow2.f32 %v6254_v14  ;;  %v6208_v41 = vpop.xlane.xlu1 %6207  ;;  %v6233_v22 = vsub.f32 %v11648_v57, %v6205_v21  ;;  %6282 = vadd.xlane.f32.xlu0 %v6281_v40 }
 0xedf   :  { %v6234_v51 = vsub.f32 %v11655_v50, %v6208_v41  ;;  %8984 = vpow2.f32 %v6256_v47 }
 0xee0   :  { %v11720_v5 = vpop.eup %8974  ;;  %v6258_v28 = vmul.f32 1.442695, %v6233_v22 }
 0xee1   :  { %v6260_v19 = vmul.f32 1.442695, %v6234_v51  ;;  %v6211_v17 = vpop.xlane.xlu0 %6210  ;;  %v6278_v10 = vsel %vm1272_vm3, %v11720_v5, 0.0  ;;  %v11724_v61 = vpop.eup %8976 }
 0xee2   :  { %8986 = vpow2.f32 %v6258_v28  ;;  %v6214_v59 = vpop.xlane.xlu1 %6213  ;;  %v6235_v53 = vsub.f32 %v11658_v11, %v6211_v17  ;;  %6279 = vadd.xlane.f32.xlu1 %v6278_v10  ;;  %v6284_v43 = vsel %vm1272_vm3, %v11724_v61, 0.0 }
 0xee3   :  { %v6236_v57 = vsub.f32 %v11663_v33, %v6214_v59  ;;  %8988 = vpow2.f32 %v6260_v19  ;;  %v12313_v59 = vld [vmem:[#allocation42_spill] sm:$0xff] }
 0xee4   :  { %v11728_v15 = vpop.eup %8978  ;;  %v6262_v50 = vmul.f32 1.442695, %v6235_v53 }
 0xee5   :  { %v6264_v1 = vmul.f32 1.442695, %v6236_v57  ;;  %v6217_v27 = vpop.xlane.xlu0 %6216  ;;  %v6287_v23 = vsel %vm1272_vm3, %v11728_v15, 0.0  ;;  %v11734_v42 = vpop.eup %8980  ;;  %v12314_v57 = vld [vmem:[#allocation19_spill] sm:$0xff] }
 0xee6   :  { %8990 = vpow2.f32 %v6262_v50  ;;  %v6237_v11 = vsub.f32 %v11668_v24, %v6217_v27  ;;  %6285 = vadd.xlane.f32.xlu1 %v6284_v43  ;;  %6288 = vadd.xlane.f32.xlu0 %v6287_v23  ;;  %v6290_v0 = vsel %vm1272_vm3, %v11734_v42, 0.0  ;;  %v6455_v53 = vpop.permute.xlu1 %6454  ;;  %v12315_v50 = vld [vmem:[#allocation21_spill] sm:$0xff] }
 0xee7   :  { %8992 = vpow2.f32 %v6264_v1  ;;  %v12316_v1 = vpack.i.bf16 %v12314_v57, %v12315_v50 }
 0xee8   :  { %v11737_v33 = vpop.eup %8982  ;;  %v6266_v31 = vmul.f32 1.442695, %v6237_v11  ;;  %v12317_v11 = vld [vmem:[#allocation22_spill] sm:$0xff] }
 0xee9   :  { %v6223_v39 = vpop.xlane.xlu0 %6222  ;;  %v6293_v29 = vsel %vm1272_vm3, %v11737_v33, 0.0  ;;  %v11743_v55 = vpop.eup %8984 }
 0xeea   :  { %8994 = vpow2.f32 %v6266_v31  ;;  %v6239_v32 = vsub.f32 %v11675_v60, %v6223_v39  ;;  %6291 = vadd.xlane.f32.xlu1 %v6290_v0  ;;  %6294 = vadd.xlane.f32.xlu0 %v6293_v29  ;;  %v6296_v14 = vsel %vm1272_vm3, %v11743_v55, 0.0  ;;  %v6502_v27 = vpop.permute.xlu1 %6501  ;;  %v12318_v31 = vld [vmem:[#allocation38_spill] sm:$0xff]  ;;  %v12320_v29 = vld [vmem:[#allocation37_spill] sm:$0xff] }
 0xeeb   :  { %v12319_v39 = vpack.i.bf16 %v12317_v11, %v12318_v31 }
 0xeec   :  { %v11746_v24 = vpop.eup %8986  ;;  %v6270_v54 = vmul.f32 1.442695, %v6239_v32  ;;  %v12321_v32 = vld [vmem:[#allocation59_spill] sm:$0xff] }
 0xeed   :  { %v6408_v25 = vpop.permute.xlu0 %6407  ;;  %v6299_v47 = vsel %vm1272_vm3, %v11746_v24, 0.0  ;;  %v11752_v21 = vpop.eup %8988  ;;  %v12322_v16 = vpack.i.bf16 %v12320_v29, %v12321_v32 }
 0xeee   :  { %8996 = vpow2.f32 %v6270_v54  ;;  %6297 = vadd.xlane.f32.xlu1 %v6296_v14  ;;  %6300 = vadd.xlane.f32.xlu0 %v6299_v47  ;;  %v6302_v60 = vsel %vm1272_vm3, %v11752_v21, 0.0  ;;  %v12324_v54 = vld [vmem:[#allocation34_spill] sm:$0xff] }
 0xeef   :  { %7956 = vmatpush3.bf16.msra.mxu1 %v6408_v25  ;;  %v12325_v25 = vld [vmem:[#allocation36_spill] sm:$0xff] }
 0xef0   :  { %v11754_v40 = vpop.eup %8990  ;;  %7967 = vmatprep.subr.bf16.mxu1 %v12303_v20  ;;  %v12326_v14 = vpack.i.bf16 %v12324_v54, %v12325_v25 }
 0xef1   :  { %v6305_v41 = vsel %vm1272_vm3, %v11754_v40, 0.0  ;;  %v11761_v22 = vpop.eup %8992  ;;  %v6549_v38 = vpop.permute.xlu0 %6548 }
 0xef2   :  { %6303 = vadd.xlane.f32.xlu1 %v6302_v60  ;;  %6306 = vadd.xlane.f32.xlu0 %v6305_v41  ;;  %v6308_v28 = vsel %vm1272_vm3, %v11761_v22, 0.0 }
 0xef4   :  { %v11763_v51 = vpop.eup %8994 }
 0xef5   :  { %v6311_v19 = vsel %vm1272_vm3, %v11763_v51, 0.0 }
 0xef6   :  { %6309 = vadd.xlane.f32.xlu1 %v6308_v28  ;;  %6312 = vadd.xlane.f32.xlu0 %v6311_v19 }
 0xef8   :  { %v11769_v17 = vpop.eup %8996 }
 0xef9   :  { %v6317_v10 = vsel %vm1272_vm3, %v11769_v17, 0.0 }
 0xefa   :  { %6318 = vadd.xlane.f32.xlu0 %v6317_v10 }
 0xf10   :  { %6642 = vrot.lane.b32.xlu0 %v12313_v59, %s9161_s12 }
 0xf14   :  { %8397 = vrot.lane.b32.xlu0 %v12316_v1, %s9147_s25 }
 0xf18   :  { %8407 = vrot.lane.b32.xlu0 %v8406_v13, %s9162_s13 }
 0xf1b   :  { %v6220_v43 = vpop.xlane.xlu1 %6219 }
 0xf1c   :  { %v6238_v23 = vsub.f32 %v11690_v8, %v6220_v43  ;;  %8417 = vrot.lane.b32.xlu0 %v12319_v39, %s9147_s25  ;;  %v12323_v8 = vld [vmem:[#allocation47_spill] sm:$0xff] }
 0xf1e   :  { %v6268_v0 = vmul.f32 1.442695, %v6238_v23 }
 0xf1f   :  { %v11814_v60 = vpop.permute.xlu1 %6595 }
 0xf20   :  { %8998 = vpow2.f32 %v6268_v0  ;;  %8427 = vrot.lane.b32.xlu0 %v8426_v12, %s9162_s13  ;;  %v12328_v12 = vld [vmem:[#allocation18_spill] sm:$0xff] }
 0xf21   :  { %v12329_v47 = vpack.i.bf16 %v12327_v3, %v12328_v12 }
 0xf24   :  { %8437 = vrot.lane.b32.xlu0 %v12322_v16, %s9147_s25 }
 0xf2a   :  { %v11796_v44 = vpop.eup %8998 }
 0xf2b   :  { %v6314_v13 = vsel %vm1272_vm3, %v11796_v44, 0.0 }
 0xf2c   :  { %6315 = vadd.xlane.f32.xlu1 %v6314_v13 }
 0xf32   :  { %v6277_v41 = vpop.xlane.xlu0 %6276 }
 0xf33   :  { %9000 = vrcp.f32 %v6277_v41 }
 0xf3d   :  { %6689 = vrot.lane.b32.xlu1 %v12323_v8, %s9161_s12  ;;  %v9001_v19 = vpop.eup %9000 }
 0xf3e   :  { %v6337_v59 = vmul.f32 %v9001_v19, %v11698_v9 }
 0xf41   :  { %8402 = vrot.lane.b32.xlu1 %v12326_v14, %s9147_s25 }
 0xf45   :  { %8412 = vrot.lane.b32.xlu1 %v8411_v48, %s9162_s13  ;;  %v12332_v48 = vpack.i.bf16 %v12330_v46, %v12331_v6 }
 0xf49   :  { %8422 = vrot.lane.b32.xlu1 %v12329_v47, %s9147_s25 }
 0xf4d   :  { %8432 = vrot.lane.b32.xlu1 %v8431_v30, %s9162_s13 }
 0xf50   :  { %v6274_v28 = vpop.xlane.xlu1 %6273 }
 0xf51   :  { %9002 = vrcp.f32 %v6274_v28  ;;  %8442 = vrot.lane.b32.xlu1 %v12332_v48, %s9147_s25 }
 0xf5b   :  { %v9003_v10 = vpop.eup %9002 }
 0xf5c   :  { %v6336_v57 = vmul.f32 %v9003_v10, %v11703_v49 }
 0xf5e   :  { %v6352_v50 = vpack.c.bf16 %v6337_v59, %v6336_v57 }
 0xf60   :  { %7952 = vmatmul.mubr.msk.bf16.vlgmr.msra.gmra.mrb[84].mxu0 %vm1272_vm3, %v6352_v50 }
 0xf61   :  { %7962 = vmatpush3.bf16.msra.mxu0 %v6455_v53  ;;  %7963 = vmatprep.mubr.msk.bf16.mxu0 %vm9154_vm4, %v12303_v20 }
 0xf62   :  { %7973 = vmatprep.subr.bf16.mxu0 %v12303_v20 }
 0xf6b   :  { %v6283_v62 = vpop.xlane.xlu0 %6282 }
 0xf6c   :  { %9004 = vrcp.f32 %v6283_v62 }
 0xf6f   :  { %v6280_v63 = vpop.xlane.xlu1 %6279 }
 0xf70   :  { %9006 = vrcp.f32 %v6280_v63 }
 0xf73   :  { %v6286_v30 = vpop.xlane.xlu1 %6285  ;;  %v6289_v1 = vpop.xlane.xlu0 %6288 }
 0xf74   :  { %9008 = vrcp.f32 %v6286_v30 }
 0xf75   :  { %9010 = vrcp.f32 %v6289_v1 }
 0xf76   :  { %v9005_v49 = vpop.eup %9004 }
 0xf77   :  { %v6292_v9 = vpop.xlane.xlu1 %6291  ;;  %v6295_v43 = vpop.xlane.xlu0 %6294  ;;  %v6339_v53 = vmul.f32 %v9005_v49, %v11714_v34 }
 0xf78   :  { %9012 = vrcp.f32 %v6292_v9 }
 0xf79   :  { %9014 = vrcp.f32 %v6295_v43 }
 0xf7a   :  { %v9007_v23 = vpop.eup %9006 }
 0xf7b   :  { %v6338_v11 = vmul.f32 %v9007_v23, %v11720_v5  ;;  %v6298_v31 = vpop.xlane.xlu1 %6297  ;;  %v6301_v39 = vpop.xlane.xlu0 %6300 }
 0xf7c   :  { %9016 = vrcp.f32 %v6298_v31 }
 0xf7d   :  { %9018 = vrcp.f32 %v6301_v39  ;;  %v6353_v0 = vpack.c.bf16 %v6339_v53, %v6338_v11 }
 0xf7e   :  { %v9009_v29 = vpop.eup %9008 }
 0xf7f   :  { %v9011_v32 = vpop.eup %9010  ;;  %v6340_v16 = vmul.f32 %v9009_v29, %v11724_v61  ;;  %v6304_v13 = vpop.xlane.xlu1 %6303  ;;  %7958 = vmatmul.mubr.msk.bf16.vlgmr.msra.gmra.mrb[92].mxu1 %vm1272_vm3, %v6353_v0 }
 0xf80   :  { %v6307_v8 = vpop.xlane.xlu0 %6306  ;;  %v6341_v54 = vmul.f32 %v9011_v32, %v11728_v15  ;;  %9020 = vrcp.f32 %v6304_v13  ;;  %7968 = vmatpush3.bf16.msra.mxu1 %v6502_v27  ;;  %7969 = vmatprep.mubr.msk.bf16.mxu1 %vm9154_vm4, %v12303_v20 }
 0xf81   :  { %9022 = vrcp.f32 %v6307_v8  ;;  %7979 = vmatprep.subr.bf16.mxu1 %v12303_v20 }
 0xf82   :  { %v9013_v34 = vpop.eup %9012  ;;  %v6354_v5 = vpack.c.bf16 %v6341_v54, %v6340_v16 }
 0xf83   :  { %v9015_v25 = vpop.eup %9014  ;;  %v6342_v14 = vmul.f32 %v9013_v34, %v11734_v42  ;;  %v6310_v61 = vpop.xlane.xlu1 %6309  ;;  %v12333_v34 = vld [vmem:[#allocation20_spill] sm:$0xff] }
 0xf84   :  { %v6313_v3 = vpop.xlane.xlu0 %6312  ;;  %v6343_v12 = vmul.f32 %v9015_v25, %v11737_v33  ;;  %9024 = vrcp.f32 %v6310_v61  ;;  %7964 = vmatmul.mubr.msk.bf16.vlgmr.msra.gmra.mrb[88].mxu0 %vm1272_vm3, %v6354_v5  ;;  %v12334_v5 = vld [vmem:[#allocation63_spill] sm:$0xff] }
 0xf85   :  { %7974 = vmatpush3.bf16.msra.mxu0 %v6549_v38  ;;  %9026 = vrcp.f32 %v6313_v3  ;;  %7975 = vmatprep.mubr.msk.bf16.mxu0 %vm9154_vm4, %v12303_v20  ;;  %v12335_v25 = vpack.i.bf16 %v12333_v34, %v12334_v5 }
 0xf86   :  { %v9017_v15 = vpop.eup %9016  ;;  %v6355_v27 = vpack.c.bf16 %v6343_v12, %v6342_v14  ;;  %7985 = vmatprep.subr.bf16.mxu0 %v12303_v20 }
 0xf87   :  { %v9019_v47 = vpop.eup %9018  ;;  %v6344_v41 = vmul.f32 %v9017_v15, %v11743_v55 }
 0xf88   :  { %v6319_v42 = vpop.xlane.xlu0 %6318  ;;  %v6345_v28 = vmul.f32 %v9019_v47, %v11746_v24  ;;  %7970 = vmatmul.mubr.msk.bf16.vlgmr.msra.gmra.mrb[96].mxu1 %vm1272_vm3, %v6355_v27 }
 0xf89   :  { %7980 = vmatpush3.bf16.msra.mxu1 %v11814_v60  ;;  %7981 = vmatprep.mubr.msk.bf16.mxu1 %vm9154_vm4, %v12303_v20  ;;  %9028 = vrcp.f32 %v6319_v42 }
 0xf8a   :  { %v9021_v33 = vpop.eup %9020  ;;  %v6356_v38 = vpack.c.bf16 %v6345_v28, %v6344_v41  ;;  %7991 = vmatprep.subr.bf16.mxu1 %v12303_v20 }
 0xf8b   :  { %v9023_v46 = vpop.eup %9022  ;;  %v6346_v6 = vmul.f32 %v9021_v33, %v11752_v21 }
 0xf8c   :  { %v6643_v48 = vpop.permute.xlu0 %6642  ;;  %v6347_v55 = vmul.f32 %v9023_v46, %v11754_v40  ;;  %7976 = vmatmul.mubr.msk.bf16.vlgmr.msra.gmra.mrb[92].mxu0 %vm1272_vm3, %v6356_v38 }
 0xf8d   :  { %7986 = vmatpush3.bf16.msra.mxu0 %v6643_v48  ;;  %7987 = vmatprep.mubr.msk.bf16.mxu0 %vm9154_vm4, %v12303_v20 }
 0xf8e   :  { %v9025_v24 = vpop.eup %9024  ;;  %v6357_v60 = vpack.c.bf16 %v6347_v55, %v6346_v6 }
 0xf8f   :  { %v9027_v19 = vpop.eup %9026  ;;  %v6348_v10 = vmul.f32 %v9025_v24, %v11761_v22 }
 0xf90   :  { %v6349_v59 = vmul.f32 %v9027_v19, %v11763_v51  ;;  %7982 = vmatmul.mubr.msk.bf16.vlgmr.msra.gmra.mrb[100].mxu1 %vm1272_vm3, %v6357_v60  ;;  %v8398_v48 = vpop.permute.xlu0 %8397 }
 0xf91   :  { %7993 = vmatprep.mubr.msk.bf16.mxu1 %vm9154_vm4, %v12303_v20  ;;  %v8518_v20 = vld [vmem:[%s12022_s5] sm:$0xff]  }
 0xf92   :  { %v6358_v21 = vpack.c.bf16 %v6349_v59, %v6348_v10  ;;  %7997 = vmatprep.subr.bf16.mxu0 %v8518_v20 }
 0xf93   :  { %v9029_v50 = vpop.eup %9028 }
 0xf94   :  { %7988 = vmatmul.mubr.msk.bf16.vlgmr.msra.gmra.mrb[96].mxu0 %vm1272_vm3, %v6358_v21  ;;  %v6351_v63 = vmul.f32 %v9029_v50, %v11769_v17  ;;  %v8519_v17 = vld [vmem:[%s12022_s5 + $0x8] sm:$0xff]   ;;  %v8408_v55 = vpop.permute.xlu0 %8407  ;;  %v8400_v21 = vunpack.i.h.bf16 %v8398_v48 }
 0xf95   :  { %7998 = vmatpush3.bf16.msra.mxu0 %v8518_v20  ;;  %v8409_v7 = vunpack.i.l.bf16 %v8408_v55 }
 0xf96   :  { %7999 = vmatprep.subr.bf16.mxu0 %v8519_v17 }
 0xf98   :  { %v8418_v24 = vpop.permute.xlu0 %8417 }
 0xf99   :  { %8000 = vmatpush3.bf16.msra.mxu0 %v8519_v17 }
 0xf9c   :  { %v8428_v10 = vpop.permute.xlu0 %8427 }
 0xfa0   :  { %v11903_v59 = vpop.permute.xlu0 %8437 }
 0xfb9   :  { %v6316_v40 = vpop.xlane.xlu1 %6315 }
 0xfba   :  { %9030 = vrcp.f32 %v6316_v40  ;;  %v8399_v40 = vunpack.i.l.bf16 %v8398_v48 }
 0xfbd   :  { %v6690_v57 = vpop.permute.xlu1 %6689 }
 0xfbe   :  { %7992 = vmatpush3.bf16.msra.mxu1 %v6690_v57  ;;  %v8410_v57 = vunpack.i.h.bf16 %v8408_v55 }
 0xfc4   :  { %v9031_v62 = vpop.eup %9030 }
 0xfc5   :  { %v6350_v22 = vmul.f32 %v9031_v62, %v11796_v44  ;;  %v12340_v62 = vld [vmem:[#allocation51_spill] sm:$0xff] }
 0xfc7   :  { %v6359_v51 = vpack.c.bf16 %v6351_v63, %v6350_v22  ;;  %v6928_v63 = vsel %vm268_vm1, %v12340_v62, %v8399_v40 }
 0xfc8   :  { %v6944_v20 = vsel %vm1272_vm3, %v6928_v63, %v8409_v7 }
 0xfc9   :  { %7994 = vmatmul.mubr.msk.bf16.vlgmr.msra.gmra.mrb[104].mxu1 %vm1272_vm3, %v6359_v51 }
0x1033   :  { %v6400_v30 = vpop.f32.mrb[84].mxu0 }
0x1034   :  { %v7953_v1 = vpop.f32.mrb[85].mxu0 }
0x1035   :  { %v6403_v9 = vpop.f32.mrb[86].mxu0  ;;  %v8403_v1 = vpop.permute.xlu1 %8402 }
0x1036   :  { %v8446_v43 = vpack.i.bf16 %v6403_v9, %v6400_v30  ;;  %v7954_v49 = vpop.f32.mrb[87].mxu0 }
0x1038   :  { %8447 = vrot.lane.b32.xlu0 %v8446_v43, %s9163_s15 }
0x1039   :  { %v8413_v17 = vpop.permute.xlu1 %8412 }
0x103c   :  { %8452 = vrot.lane.b32.xlu0 %v8451_v37, %s9162_s13 }
0x1052   :  { %v6447_v44 = vpop.f32.mrb[92].mxu1 }
0x1053   :  { %v7959_v23 = vpop.f32.mrb[93].mxu1 }
0x1054   :  { %v6450_v53 = vpop.f32.mrb[94].mxu1 }
0x1055   :  { %v8456_v11 = vpack.i.bf16 %v6450_v53, %v6447_v44  ;;  %v7960_v31 = vpop.f32.mrb[95].mxu1  ;;  %v8423_v44 = vpop.permute.xlu1 %8422 }
0x1056   :  { %v8404_v31 = vunpack.i.l.bf16 %v8403_v1 }
0x1057   :  { %v6494_v39 = vpop.f32.mrb[88].mxu0  ;;  %8457 = vrot.lane.b32.xlu1 %v8456_v11, %s9163_s15  ;;  %v8405_v11 = vunpack.i.h.bf16 %v8403_v1 }
0x1058   :  { %v7965_v0 = vpop.f32.mrb[89].mxu0 }
0x1059   :  { %v6497_v29 = vpop.f32.mrb[90].mxu0  ;;  %v8433_v23 = vpop.permute.xlu1 %8432  ;;  %v8414_v0 = vunpack.i.l.bf16 %v8413_v17 }
0x105a   :  { %v8466_v32 = vpack.i.bf16 %v6497_v29, %v6494_v39  ;;  %v7966_v16 = vpop.f32.mrb[91].mxu0  ;;  %v8415_v39 = vunpack.i.h.bf16 %v8413_v17  ;;  %v8420_v29 = vunpack.i.h.bf16 %v8418_v24  ;;  %v8435_v48 = vunpack.i.h.bf16 %v8433_v23 }
0x105b   :  { %v6541_v35 = vpop.f32.mrb[96].mxu1  ;;  %8462 = vrot.lane.b32.xlu1 %v8461_v52, %s9162_s13  ;;  %v12337_v52 = vld [vmem:[#allocation68_spill] sm:$0xff]  ;;  %v8434_v55 = vunpack.i.l.bf16 %v8433_v23 }
0x105c   :  { %8467 = vrot.lane.b32.xlu0 %v8466_v32, %s9163_s15  ;;  %v7971_v45 = vpop.f32.mrb[97].mxu1  ;;  %v12338_v15 = vpack.i.bf16 %v12336_v4, %v12337_v52  ;;  %v8419_v32 = vunpack.i.l.bf16 %v8418_v24  ;;  %v12343_v52 = vld [vmem:[#allocation48_spill] sm:$0xff] }
0x105d   :  { %v6544_v37 = vpop.f32.mrb[98].mxu1  ;;  %v11914_v53 = vpop.permute.xlu1 %8442 }
0x105e   :  { %v8476_v13 = vpack.i.bf16 %v6544_v37, %v6541_v35  ;;  %v7972_v8 = vpop.f32.mrb[99].mxu1  ;;  %v12341_v35 = vld [vmem:[#allocation57_spill] sm:$0xff] }
0x105f   :  { %v6588_v54 = vpop.f32.mrb[92].mxu0  ;;  %v6931_v45 = vsel %vm268_vm1, %v12341_v35, %v8405_v11  ;;  %v12342_v37 = vld [vmem:[#allocation61_spill] sm:$0xff]  ;;  %v12349_v35 = vld [vmem:[#allocation58_spill] sm:$0xff] }
0x1060   :  { %8472 = vrot.lane.b32.xlu0 %v12335_v25, %s9147_s25  ;;  %8477 = vrot.lane.b32.xlu1 %v8476_v13, %s9163_s15  ;;  %v7977_v14 = vpop.f32.mrb[93].mxu0  ;;  %v6930_v13 = vsel %vm268_vm1, %v12342_v37, %v8404_v31  ;;  %v6947_v25 = vsel %vm1272_vm3, %v6931_v45, %v8415_v39  ;;  %v12350_v37 = vld [vmem:[#allocation56_spill] sm:$0xff] }
0x1061   :  { %v6591_v61 = vpop.f32.mrb[94].mxu0  ;;  %v6946_v5 = vsel %vm1272_vm3, %v6930_v13, %v8414_v0  ;;  %v8430_v14 = vunpack.i.h.bf16 %v8428_v10 }
0x1062   :  { %v8486_v3 = vpack.i.bf16 %v6591_v61, %v6588_v54  ;;  %v7978_v12 = vpop.f32.mrb[95].mxu0  ;;  %v8429_v61 = vunpack.i.l.bf16 %v8428_v10 }
0x1063   :  { %v6635_v56 = vpop.f32.mrb[100].mxu1 }
0x1064   :  { %8482 = vrot.lane.b32.xlu1 %v12338_v15, %s9147_s25  ;;  %8487 = vrot.lane.b32.xlu0 %v8486_v3, %s9163_s15  ;;  %v7983_v27 = vpop.f32.mrb[101].mxu1  ;;  %v6933_v15 = vsel %vm268_vm1, %v12343_v52, %v8420_v29 }
0x1065   :  { %v6638_v47 = vpop.f32.mrb[102].mxu1  ;;  %v12344_v27 = vld [vmem:[#allocation53_spill] sm:$0xff] }
0x1066   :  { %v8496_v41 = vpack.i.bf16 %v6638_v47, %v6635_v56  ;;  %v7984_v42 = vpop.f32.mrb[103].mxu1  ;;  %v6932_v47 = vsel %vm268_vm1, %v12344_v27, %v8419_v32 }
0x1067   :  { %v6682_v28 = vpop.f32.mrb[96].mxu0  ;;  %v8425_v42 = vunpack.i.h.bf16 %v8423_v44 }
0x1068   :  { %8492 = vrot.lane.b32.xlu0 %v8491_v18, %s9162_s13  ;;  %8497 = vrot.lane.b32.xlu1 %v8496_v41, %s9163_s15  ;;  %v7989_v33 = vpop.f32.mrb[97].mxu0 }
0x1069   :  { %v6685_v38 = vpop.f32.mrb[98].mxu0 }
0x106a   :  { %v8506_v46 = vpack.i.bf16 %v6685_v38, %v6682_v28  ;;  %v7990_v6 = vpop.f32.mrb[99].mxu0  ;;  %v8424_v28 = vunpack.i.l.bf16 %v8423_v44  ;;  %v12348_v44 = vld [vmem:[#allocation50_spill] sm:$0xff] }
0x106b   :  { %v6949_v6 = vsel %vm1272_vm3, %v6933_v15, %v8430_v14 }
0x106c   :  { %8502 = vrot.lane.b32.xlu1 %v8501_v2, %s9162_s13  ;;  %8507 = vrot.lane.b32.xlu0 %v8506_v46, %s9163_s15  ;;  %v12339_v2 = vld [vmem:[#allocation54_spill] sm:$0xff]  ;;  %v6948_v46 = vsel %vm1272_vm3, %v6932_v47, %v8429_v61 }
0x106d   :  { %v6929_v50 = vsel %vm268_vm1, %v12339_v2, %v8400_v21  ;;  %v12345_v21 = vld [vmem:[#allocation66_spill] sm:$0xff] }
0x106e   :  { %v6945_v30 = vsel %vm1272_vm3, %v6929_v50, %v8410_v57  ;;  %v6935_v40 = vsel %vm268_vm1, %v12345_v21, %v8425_v42  ;;  %v12346_v57 = vld [vmem:[#allocation65_spill] sm:$0xff] }
0x106f   :  { %v6934_v7 = vsel %vm268_vm1, %v12346_v57, %v8424_v28  ;;  %v6951_v62 = vsel %vm1272_vm3, %v6935_v40, %v8435_v48  ;;  %v12352_v28 = vld [vmem:[#allocation62_spill] sm:$0xff]  ;;  %v12353_v40 = vld [vmem:[#allocation33_spill] sm:$0xff] }
0x1070   :  { %v6950_v50 = vsel %vm1272_vm3, %v6934_v7, %v8434_v55  ;;  %v12354_v7 = vld [vmem:[#allocation55_spill] sm:$0xff] }
0x109c   :  { %v6729_v60 = vpop.f32.mrb[104].mxu1 }
0x109d   :  { %v7995_v19 = vpop.f32.mrb[105].mxu1 }
0x109e   :  { %v6732_v26 = vpop.f32.mrb[106].mxu1  ;;  %v8440_v19 = vunpack.i.h.bf16 %v11903_v59 }
0x109f   :  { %v8511_v36 = vpack.i.bf16 %v6732_v26, %v6729_v60  ;;  %v7996_v18 = vpop.f32.mrb[107].mxu1  ;;  %v8439_v26 = vunpack.i.l.bf16 %v11903_v59 }
0x10a1   :  { %8512 = vrot.lane.b32.xlu1 %v8511_v36, %s9163_s15  ;;  %v6936_v23 = vsel %vm268_vm1, %v12348_v44, %v8439_v26 }
0x10aa   :  { %v8448_v58 = vpop.permute.xlu0 %8447 }
0x10ab   :  { %v8450_v22 = vunpack.i.h.bf16 %v8448_v58  ;;  %v8449_v51 = vunpack.i.l.bf16 %v8448_v58 }
0x10ad   :  { %v6961_v9 = vsel %vm6960_vm5, %v6944_v20, %v8449_v51  ;;  %v6962_v43 = vsel %vm6960_vm5, %v6945_v30, %v8450_v22  ;;  %v8445_v20 = vunpack.i.h.bf16 %v11914_v53  ;;  %v8444_v30 = vunpack.i.l.bf16 %v11914_v53 }
0x10ae   :  { %v6977_v49 = vpack.c.bf16 %v6962_v43, %v6961_v9  ;;  %v8453_v8 = vpop.permute.xlu0 %8452 }
0x10af   :  { %v8455_v63 = vunpack.i.h.bf16 %v8453_v8  ;;  %v8454_v22 = vunpack.i.l.bf16 %v8453_v8  ;;  %v6939_v45 = vsel %vm268_vm1, %v12349_v35, %v8445_v20  ;;  %v6938_v13 = vsel %vm268_vm1, %v12350_v37, %v8444_v30  ;;  %v7338_v20 = vld [vmem:[%s12023_s6] ss:$0 sm:$0xff]  ;;  %s9164_s6 = smov [#allocation10]  }
0x10b0   :  { %8001 = vmatprep.mubr.msk.bf16.mxu0 %vm129_vm0, %v6977_v49  ;;  %v12347_v49 = vld [vmem:[#allocation49_spill] sm:$0xff]  ;;  %s7150_s18 = sshll.u32 %s9164_s6, 4  ;;  %s7151_s18 = int_to_ptr.vmem [resolvable:$true] %s7150_s18 }
0x10b1   :  { %v6937_v17 = vsel %vm268_vm1, %v12347_v49, %v8440_v19  ;;  %v6952_v39 = vsel %vm1272_vm3, %v6936_v23, %v8454_v22  ;;  %s9110_s19 = scalar_lea.vmem %s7151_s18, 2048  ;;  %p9115_p2 = scmp.lt.s32.totalorder %s7151_s18, %s7151_s18 }
0x10b2   :  { %v6953_v0 = vsel %vm1272_vm3, %v6937_v17, %v8455_v63  ;;  %p9111_p1 = scmp.ne.s32.totalorder %s7151_s18, %s9110_s19  ;;  %p9116_p3 = scmp.lt.s32.totalorder %s9110_s19, %s9110_s19 }
0x10b4   :  { %p9117_p4 = por %p9116_p3, %p9115_p2 }
0x10b6   :  { %p9118_p5 = pnand %p9117_p4, %p9111_p1 }
0x10c9   :  { %v8458_v16 = vpop.permute.xlu1 %8457 }
0x10ca   :  { %v8460_v54 = vunpack.i.h.bf16 %v8458_v16  ;;  %v8459_v34 = vunpack.i.l.bf16 %v8458_v16 }
0x10cc   :  { %v6964_v3 = vsel %vm6960_vm5, %v6947_v25, %v8460_v54  ;;  %v6963_v12 = vsel %vm6960_vm5, %v6946_v5, %v8459_v34 }
0x10cd   :  { %v6978_v56 = vpack.c.bf16 %v6964_v3, %v6963_v12  ;;  %v8463_v4 = vpop.permute.xlu1 %8462 }
0x10ce   :  { %v8468_v41 = vpop.permute.xlu0 %8467  ;;  %v8465_v29 = vunpack.i.h.bf16 %v8463_v4  ;;  %v8464_v32 = vunpack.i.l.bf16 %v8463_v4 }
0x10cf   :  { %v8470_v33 = vunpack.i.h.bf16 %v8468_v41  ;;  %v8469_v38 = vunpack.i.l.bf16 %v8468_v41  ;;  %8002 = vmatmul.mubr.msk.bf16.vlgmr.msra.gmra.mrb[100].mxu0 %vm129_vm0, %v6978_v56  ;;  %v12351_v41 = vld [vmem:[#allocation64_spill] sm:$0xff] }
0x10d0   :  { %v6955_v3 = vsel %vm1272_vm3, %v6939_v45, %v8465_v29  ;;  %v6954_v12 = vsel %vm1272_vm3, %v6938_v13, %v8464_v32 }
0x10d1   :  { %v6965_v24 = vsel %vm6960_vm5, %v6948_v46, %v8469_v38  ;;  %v6966_v60 = vsel %vm6960_vm5, %v6949_v6, %v8470_v33 }
0x10d2   :  { %v6979_v36 = vpack.c.bf16 %v6966_v60, %v6965_v24  ;;  %v8478_v18 = vpop.permute.xlu1 %8477  ;;  %v8473_v10 = vpop.permute.xlu0 %8472 }
0x10d3   :  { %v8480_v58 = vunpack.i.h.bf16 %v8478_v18  ;;  %v8479_v2 = vunpack.i.l.bf16 %v8478_v18  ;;  %v8475_v5 = vunpack.i.h.bf16 %v8473_v10  ;;  %v8474_v25 = vunpack.i.l.bf16 %v8473_v10 }
0x10d4   :  { %8005 = vmatprep.mubr.msk.bf16.mxu0 %vm129_vm0, %v6979_v36 }
0x10d5   :  { %v6968_v59 = vsel %vm6960_vm5, %v6951_v62, %v8480_v58  ;;  %v6967_v51 = vsel %vm6960_vm5, %v6950_v50, %v8479_v2  ;;  %v6941_v42 = vsel %vm268_vm1, %v12351_v41, %v8475_v5  ;;  %v6940_v33 = vsel %vm268_vm1, %v12352_v28, %v8474_v25 }
0x10d6   :  { %v6980_v1 = vpack.c.bf16 %v6968_v59, %v6967_v51  ;;  %v8483_v9 = vpop.permute.xlu1 %8482  ;;  %v8488_v43 = vpop.permute.xlu0 %8487 }
0x10d7   :  { %v8490_v11 = vunpack.i.h.bf16 %v8488_v43  ;;  %v8489_v31 = vunpack.i.l.bf16 %v8488_v43  ;;  %v8485_v26 = vunpack.i.h.bf16 %v8483_v9  ;;  %v8484_v36 = vunpack.i.l.bf16 %v8483_v9 }
0x10d8   :  { %8006 = vmatmul.mubr.msk.bf16.gmra.mrb[104].mxu0 %vm129_vm0, %v6980_v1 }
0x10d9   :  { %v6969_v53 = vsel %vm6960_vm5, %v6952_v39, %v8489_v31  ;;  %v6970_v16 = vsel %vm6960_vm5, %v6953_v0, %v8490_v11  ;;  %v6943_v57 = vsel %vm268_vm1, %v12353_v40, %v8485_v26  ;;  %v6942_v58 = vsel %vm268_vm1, %v12354_v7, %v8484_v36 }
0x10da   :  { %v6981_v8 = vpack.c.bf16 %v6970_v16, %v6969_v53  ;;  %v8498_v54 = vpop.permute.xlu1 %8497  ;;  %v8493_v34 = vpop.permute.xlu0 %8492 }
0x10db   :  { %v8500_v14 = vunpack.i.h.bf16 %v8498_v54  ;;  %v8499_v61 = vunpack.i.l.bf16 %v8498_v54  ;;  %v8495_v56 = vunpack.i.h.bf16 %v8493_v34  ;;  %v8494_v4 = vunpack.i.l.bf16 %v8493_v34 }
0x10dc   :  { %8009 = vmatprep.mubr.msk.bf16.mxu0 %vm129_vm0, %v6981_v8 }
0x10dd   :  { %v6972_v52 = vsel %vm6960_vm5, %v6955_v3, %v8500_v14  ;;  %v6971_v15 = vsel %vm6960_vm5, %v6954_v12, %v8499_v61  ;;  %v6956_v6 = vsel %vm1272_vm3, %v6940_v33, %v8494_v4  ;;  %v6957_v48 = vsel %vm1272_vm3, %v6941_v42, %v8495_v56 }
0x10de   :  { %v6982_v27 = vpack.c.bf16 %v6972_v52, %v6971_v15  ;;  %v8508_v47 = vpop.permute.xlu0 %8507  ;;  %v8503_v19 = vpop.permute.xlu1 %8502 }
0x10df   :  { %v8510_v38 = vunpack.i.h.bf16 %v8508_v47  ;;  %v8509_v46 = vunpack.i.l.bf16 %v8508_v47  ;;  %v8505_v18 = vunpack.i.h.bf16 %v8503_v19  ;;  %v8504_v10 = vunpack.i.l.bf16 %v8503_v19 }
0x10e0   :  { %8010 = vmatmul.mubr.msk.bf16.gmra.mrb[108].mxu0 %vm129_vm0, %v6982_v27 }
0x10e1   :  { %v6973_v55 = vsel %vm6960_vm5, %v6956_v6, %v8509_v46  ;;  %v6974_v24 = vsel %vm6960_vm5, %v6957_v48, %v8510_v38  ;;  %v6959_v62 = vsel %vm1272_vm3, %v6943_v57, %v8505_v18  ;;  %v6958_v63 = vsel %vm1272_vm3, %v6942_v58, %v8504_v10 }
0x10e2   :  { %v6983_v60 = vpack.c.bf16 %v6974_v24, %v6973_v55 }
0x10e4   :  { %8013 = vmatprep.mubr.msk.bf16.mxu0 %vm129_vm0, %v6983_v60 }
0x1113   :  { %v8513_v21 = vpop.permute.xlu1 %8512 }
0x1114   :  { %v8515_v2 = vunpack.i.h.bf16 %v8513_v21  ;;  %v8514_v50 = vunpack.i.l.bf16 %v8513_v21 }
0x1116   :  { %v6976_v22 = vsel %vm6960_vm5, %v6959_v62, %v8515_v2  ;;  %v6975_v59 = vsel %vm6960_vm5, %v6958_v63, %v8514_v50 }
0x1117   :  { %v6984_v51 = vpack.c.bf16 %v6976_v22, %v6975_v59 }
0x1119   :  { %8014 = vmatmul.mubr.msk.bf16.gmra.mrb[112].mxu0 %vm129_vm0, %v6984_v51 }
0x11a2   :  { %v8003_v30 = vpop.f32.mrb[100].mxu0 }
0x11a3   :  { %v7075_v1 = vadd.f32 %v8003_v30, %v7338_v20  ;;  %v7066_v9 = vpop.f32.mrb[101].mxu0 }
0x11a4   :  { %v7067_v43 = vadd.f32 %v7338_v20, %v7066_v9  ;;  %v8004_v49 = vpop.f32.mrb[102].mxu0 }
0x11a5   :  { %7131 = vst.msk [vmem:[#allocation10 + $0x10] sm:$0xff] %vm129_vm0, %v7075_v1  ;;  %v7078_v17 = vadd.f32 %v8004_v49, %v7338_v20  ;;  %v7069_v44 = vpop.f32.mrb[103].mxu0 }
0x11a6   :  { %7129 = vst.msk [vmem:[#allocation10] sm:$0xff] %vm129_vm0, %v7067_v43  ;;  %v7070_v23 = vadd.f32 %v7338_v20, %v7069_v44 }
0x11a7   :  { %7132 = vst.msk [vmem:[#allocation10 + $0x18] sm:$0xff] %vm129_vm0, %v7078_v17 }
0x11a8   :  { %7130 = vst.msk [vmem:[#allocation10 + $0x8] sm:$0xff] %vm129_vm0, %v7070_v23 }
0x11ab   :  { %v8007_v11 = vpop.f32.mrb[104].mxu0 }
0x11ac   :  { %v7091_v31 = vadd.f32 %v8007_v11, %v7338_v20  ;;  %v7082_v39 = vpop.f32.mrb[105].mxu0 }
0x11ad   :  { %v7083_v0 = vadd.f32 %v7338_v20, %v7082_v39  ;;  %v8008_v29 = vpop.f32.mrb[106].mxu0 }
0x11ae   :  { %7135 = vst.msk [vmem:[#allocation10 + $0x30] sm:$0xff] %vm129_vm0, %v7091_v31  ;;  %v7094_v32 = vadd.f32 %v8008_v29, %v7338_v20  ;;  %v7085_v53 = vpop.f32.mrb[107].mxu0 }
0x11af   :  { %7133 = vst.msk [vmem:[#allocation10 + $0x20] sm:$0xff] %vm129_vm0, %v7083_v0  ;;  %v7086_v16 = vadd.f32 %v7338_v20, %v7085_v53 }
0x11b0   :  { %7136 = vst.msk [vmem:[#allocation10 + $0x38] sm:$0xff] %vm129_vm0, %v7094_v32 }
0x11b1   :  { %7134 = vst.msk [vmem:[#allocation10 + $0x28] sm:$0xff] %vm129_vm0, %v7086_v16 }
0x11b3   :  { %v8011_v35 = vpop.f32.mrb[108].mxu0 }
0x11b4   :  { %v7107_v45 = vadd.f32 %v8011_v35, %v7338_v20  ;;  %v7098_v37 = vpop.f32.mrb[109].mxu0 }
0x11b5   :  { %v7099_v13 = vadd.f32 %v7338_v20, %v7098_v37  ;;  %v8012_v8 = vpop.f32.mrb[110].mxu0 }
0x11b6   :  { %7139 = vst.msk [vmem:[#allocation10 + $0x50] sm:$0xff] %vm129_vm0, %v7107_v45  ;;  %v7110_v54 = vadd.f32 %v8012_v8, %v7338_v20  ;;  %v7101_v34 = vpop.f32.mrb[111].mxu0 }
0x11b7   :  { %7137 = vst.msk [vmem:[#allocation10 + $0x40] sm:$0xff] %vm129_vm0, %v7099_v13  ;;  %v7102_v5 = vadd.f32 %v7338_v20, %v7101_v34 }
0x11b8   :  { %7140 = vst.msk [vmem:[#allocation10 + $0x58] sm:$0xff] %vm129_vm0, %v7110_v54 }
0x11b9   :  { %7138 = vst.msk [vmem:[#allocation10 + $0x48] sm:$0xff] %vm129_vm0, %v7102_v5 }
0x11ec   :  { %v8015_v25 = vpop.f32.mrb[112].mxu0 }
0x11ed   :  { %v7123_v14 = vadd.f32 %v8015_v25, %v7338_v20  ;;  %v7114_v61 = vpop.f32.mrb[113].mxu0 }
0x11ee   :  { %v7115_v3 = vadd.f32 %v7338_v20, %v7114_v61  ;;  %v8016_v12 = vpop.f32.mrb[114].mxu0 }
0x11ef   :  { %7143 = vst.msk [vmem:[#allocation10 + $0x70] sm:$0xff] %vm129_vm0, %v7123_v14  ;;  %v7126_v56 = vadd.f32 %v8016_v12, %v7338_v20  ;;  %v7117_v4 = vpop.f32.mrb[115].mxu0 }
0x11f0   :  { %7141 = vst.msk [vmem:[#allocation10 + $0x60] sm:$0xff] %vm129_vm0, %v7115_v3  ;;  %v7118_v52 = vadd.f32 %v7338_v20, %v7117_v4 }
0x11f1   :  { %7144 = vst.msk [vmem:[#allocation10 + $0x78] sm:$0xff] %vm129_vm0, %v7126_v56 }
0x11f2   :  { %7142 = vst.msk [vmem:[#allocation10 + $0x68] sm:$0xff] %vm129_vm0, %v7118_v52 }
0x11f3   :  { %9121 = shalt.err (!%p9118_p5)
}
0x11f4   :  { %s9122_s21 = scalar_lea.hbm %s12024_s7, 2048 }
0x11f5   :  { %p9123_p6 = scmp.ne.s32.totalorder %s12024_s7, %s9122_s21  ;;  %p9126_p7 = scmp.lt.u32.totalorder %s9122_s21, %s12024_s7 }
0x11f7   :  { %p9128_p8 = pnand %p9126_p7, %p9123_p6 }
0x11f9   :  { %9131 = shalt.err (!%p9128_p8)
}
0x11fa   :  { %7156 = dma.vmem_to_hbm [thread:$0]  %s7151_s18, 2048, %s12024_s7, [#allocation4], %s9146_s1, %s9146_s1, %s9147_s25  }
0x11fb   :  { %9140 = dma.done.wait [#allocation4], 2048  }
0x11fc   :  { %9141 = vsyncadd [#allocation4], 4294965248 }
0x11fd   :  { %7160 = vsyncpa [#allocation3], 1 }
0x11fe   :  { %7161 = vsyncpa [#allocation7], 1 }
0x11ff   :  { %7162 = vsyncpa [#allocation4], 1 }
0x1200   :  { %7163 = vsyncpa [#allocation5], 1 }

</bundles_post_ra>
